<compile_context>
chip_gen: v6e
topology: v6e:2x2x1
jax: 0.10.0
libtpu: 0.0.40
codegen_flags: <defaults>
</compile_context>

<pallas_src>
import functools

import jax
import jax.numpy as jnp
from jax.experimental import pallas as pl
from jax.experimental.pallas import tpu as pltpu

_PAD_ROWS = 8  # sublane-aligned "ones" rows appended to the x slab


def _quantize_kernel(x_ref, cb_aug_ref, cbt_ref,
                     xd_ref, sse_ref, counts_ref,
                     xaug_ref, *, T, tt):
    """One grid step handles a (C, tt) slab of x for one batch element."""
    tj = pl.program_id(1)

    # counts is a per-batch-element (1, K) block, resident across the t axis.
    @pl.when(tj == 0)
    def _():
        counts_ref[...] = jnp.zeros_like(counts_ref)

    C = x_ref.shape[0]
    K = cb_aug_ref.shape[0]
    search_dtype = xaug_ref.dtype

    x = x_ref[...].astype(jnp.float32)                          # (C, tt)

    # Augmented slab [x ; 1]: the -2 scale and ||c_k||^2 bias were folded into
    # cb_aug in the wrapper, so `dist` is a single MXU matmul (no VPU pass
    # over the (K, tt) slab for scaling / bias / lane-broadcast).
    xaug_ref[:C, :] = x.astype(search_dtype)
    xaug_ref[C:, :] = jnp.ones((_PAD_ROWS, tt), search_dtype)

    dist = jnp.dot(cb_aug_ref[...], xaug_ref[...],
                   preferred_element_type=jnp.float32)          # (K, tt)

    # Nearest code with first-minimum tie-break (matches torch.min / argmin).
    # The ||x||^2 term is argmin-invariant and dropped.
    iota_k = jax.lax.broadcasted_iota(jnp.int32, dist.shape, 0)  # (K, tt)
    min_d = jnp.min(dist, axis=0, keepdims=True)                 # (1, tt)
    idx = jnp.min(jnp.where(dist <= min_d, iota_k, K),
                  axis=0, keepdims=True)                         # (1, tt)
    onehot = (iota_k == idx).astype(jnp.float32)                 # (K, tt)

    # Dequantize: exact row gather expressed as codebook^T @ one-hot (MXU),
    # kept in f32 so emitted codes are bit-exact codebook rows.
    xd = jnp.dot(cbt_ref[...], onehot, preferred_element_type=jnp.float32)
    xd_ref[...] = xd.astype(xd_ref.dtype)                        # (C, tt)

    # Per-position squared error summed over channels; final mean is done in
    # the wrapper (lane-dense (1, tt) store).
    diff = x - xd
    sse_ref[...] = jnp.sum(diff * diff, axis=0, keepdims=True)   # (1, tt)

    # Per-code counts via a (1,tt) x (K,tt)^T MXU contraction. The ragged-tail
    # mask is only materialized when T % tt != 0 (trace-time decision); the
    # masked pad columns never reach counts, and their x_d / sse writes are
    # clipped by Pallas.
    if T % tt == 0:
        valid = jnp.ones((1, tt), jnp.float32)
    else:
        col = tj * tt + jax.lax.broadcasted_iota(jnp.int32, (1, tt), 1)
        valid = (col < T).astype(jnp.float32)
    counts_ref[...] += jax.lax.dot_general(
        valid, onehot, (((1,), (1,)), ((), ())),
        preferred_element_type=jnp.float32)                      # (1, K)


def quantize_ema_reset_forward(x, codebook, *, tt_target=1024, eps=1e-7,
                               use_bf16_search=False):
    """Eval-mode forward of QuantizeEMAReset.

    x:        (N, C, T)  with C == code_dim
    codebook: (nb_code, code_dim)
    returns:  (x_d (N, C, T), commit_loss scalar, perplexity scalar)
    """
    N, C, T = x.shape
    K, D = codebook.shape
    assert D == C, "code_dim mismatch"

    # T-tile: full T when it fits the target (single block per batch element,
    # no ragged tail); otherwise the largest lane-aligned multiple of 128 that
    # keeps ~5 live (K, tt) f32 intermediates inside the scoped-VMEM budget.
    slab_budget_bytes = 16 * 1024 * 1024
    tt_cap = max(128, ((slab_budget_bytes // (6 * 4 * K)) // 128) * 128)
    tt_target = max(128, min(tt_target, tt_cap))
    if T <= tt_target:
        tt = T
    else:
        tt = (tt_target // 128) * 128
    t_tiles = pl.cdiv(T, tt)

    search_dtype = jnp.bfloat16 if use_bf16_search else jnp.float32

    # Codebook-invariant work hoisted out of the per-step body. The -2 scale
    # and ||c_k||^2 bias are folded into an augmented codebook so the distance
    # is a single MXU contraction against [x ; 1].
    cb = codebook.astype(jnp.float32)                        # (K, C)
    cb2 = jnp.sum(cb * cb, axis=1, keepdims=True)            # (K, 1)
    zpad = jnp.zeros((K, _PAD_ROWS - 1), jnp.float32)
    cb_aug = jnp.concatenate([-2.0 * cb, cb2, zpad], axis=1)  # (K, C + 8)
    cb_aug = cb_aug.astype(search_dtype)
    cb_t = cb.T                                              # (C, K), f32

    kernel = functools.partial(_quantize_kernel, T=T, tt=tt)

    x_d, sse, counts_nk = pl.pallas_call(
        kernel,
        out_shape=(
            jax.ShapeDtypeStruct((N, C, T), x.dtype),        # dequantized x
            jax.ShapeDtypeStruct((N, 1, T), jnp.float32),    # per-position SSE
            jax.ShapeDtypeStruct((N, 1, K), jnp.float32),    # per-n code counts
        ),
        grid_spec=pltpu.PrefetchScalarGridSpec(
            num_scalar_prefetch=0,
            grid=(N, t_tiles),
            in_specs=[
                pl.BlockSpec((None, C, tt), lambda n, t: (n, 0, t)),    # x slab
                pl.BlockSpec((K, C + _PAD_ROWS), lambda n, t: (0, 0)),  # cb_aug
                pl.BlockSpec((C, K), lambda n, t: (0, 0)),              # cb^T
            ],
            out_specs=[
                pl.BlockSpec((None, C, tt), lambda n, t: (n, 0, t)),
                pl.BlockSpec((None, 1, tt), lambda n, t: (n, 0, t)),
                pl.BlockSpec((None, 1, K), lambda n, t: (n, 0, 0)),
            ],
            scratch_shapes=[pltpu.VMEM((C + _PAD_ROWS, tt), search_dtype)],
        ),
        compiler_params=pltpu.CompilerParams(
            dimension_semantics=("parallel", "arbitrary"),
            vmem_limit_bytes=32 * 1024 * 1024),
    )(x, cb_aug, cb_t)

    # Tiny final reductions finished outside the kernel.
    commit_loss = jnp.sum(sse) / (N * T * C)
    counts = jnp.sum(counts_nk, axis=(0, 1))                 # (K,)
    prob = counts / jnp.sum(counts)
    perplexity = jnp.exp(-jnp.sum(prob * jnp.log(prob + eps)))
    # straight-through: forward value of x + (x_d - x).detach() is x_d itself
    return x_d, commit_loss, perplexity


def _reference_forward(x, codebook, eps=1e-7):
    """Pure-JAX reference mirroring the PyTorch eval forward."""
    N, C, T = x.shape
    xf = jnp.transpose(x, (0, 2, 1)).reshape(-1, C).astype(jnp.float32)
    cb = codebook.astype(jnp.float32)
    dist = (jnp.sum(xf ** 2, axis=-1, keepdims=True)
            - 2.0 * xf @ cb.T
            + jnp.sum(cb ** 2, axis=-1)[None, :])
    idx = jnp.argmin(dist, axis=-1)
    xd = cb[idx]
    counts = jnp.sum(jax.nn.one_hot(idx, codebook.shape[0], dtype=jnp.float32), axis=0)
    prob = counts / jnp.sum(counts)
    perplexity = jnp.exp(-jnp.sum(prob * jnp.log(prob + eps)))
    commit_loss = jnp.mean((xf - xd) ** 2)
    xd = xd.reshape(N, T, C).transpose(0, 2, 1)
    return xd, commit_loss, perplexity


if __name__ == "__main__":
    # Deterministic synthetic setup: nb_code=512, code_dim=32, N=2, T=200.
    key = jax.random.PRNGKey(0)
    k_cb, k_idx, k_noise = jax.random.split(key, 3)
    N, code_dim, T = 2, 32, 200
    nb_code = 512

    codebook = 0.5 * jax.random.normal(k_cb, (nb_code, code_dim), dtype=jnp.float32)
    # Plant each position near a known code so the nearest-code decision is
    # unambiguous (keeps the check robust to matmul rounding / tie-breaking).
    plant_idx = jax.random.randint(k_idx, (N * T,), 0, nb_code)
    x_rows = codebook[plant_idx] + 0.01 * jax.random.normal(
        k_noise, (N * T, code_dim), dtype=jnp.float32)
    x = x_rows.reshape(N, T, code_dim).transpose(0, 2, 1)   # (N, C, T)

    xd_ref, loss_ref, perp_ref = _reference_forward(x, codebook)

    # Default path: full-T block (no ragged tail), single t-tile per batch.
    x_d, commit_loss, perplexity = quantize_ema_reset_forward(x, codebook)
    jax.block_until_ready((x_d, commit_loss, perplexity))
    assert x_d.shape == (N, code_dim, T)
    assert jnp.allclose(x_d, xd_ref, rtol=1e-5, atol=1e-5)
    assert jnp.allclose(commit_loss, loss_ref, rtol=1e-3, atol=1e-7)
    assert jnp.allclose(perplexity, perp_ref, rtol=1e-4, atol=1e-4)

    # Tiled path: force tt=128 so T=200 exercises multi-tile accumulation and
    # the ragged-tail mask.
    x_d2, commit_loss2, perplexity2 = quantize_ema_reset_forward(
        x, codebook, tt_target=128)
    jax.block_until_ready((x_d2, commit_loss2, perplexity2))
    assert jnp.allclose(x_d2, xd_ref, rtol=1e-5, atol=1e-5)
    assert jnp.allclose(commit_loss2, loss_ref, rtol=1e-3, atol=1e-7)
    assert jnp.allclose(perplexity2, perp_ref, rtol=1e-4, atol=1e-4)

    print("KERNEL_OK")
</pallas_src>

<mosaic_0001>
module attributes {stable_mosaic.version = 11 : i64} {
  func.func @_quantize_kernel(%arg0: i32, %arg1: i32, %arg2: memref<1x32x200xf32, #tpu.memory_space<vmem>>, %arg3: memref<512x40xf32, #tpu.memory_space<vmem>>, %arg4: memref<32x512xf32, #tpu.memory_space<vmem>>, %arg5: memref<1x32x200xf32, #tpu.memory_space<vmem>>, %arg6: memref<1x1x200xf32, #tpu.memory_space<vmem>>, %arg7: memref<1x1x512xf32, #tpu.memory_space<vmem>>, %arg8: memref<40x200xf32, #tpu.memory_space<vmem>>) attributes {dimension_semantics = [#tpu.dimension_semantics<parallel>, #tpu.dimension_semantics<arbitrary>], iteration_bounds = array<i64: 2, 1>, scalar_prefetch = 0 : i64, scratch_operands = 1 : i64, tpu.core_type = #tpu.core_type<tc>, window_params = [{transform_indices = @transform_0, window_bounds = array<i64: 1, 32, 200>}, {pipeline_mode = #tpu.pipeline_mode<synchronous>, transform_indices = @transform_1, window_bounds = array<i64: 512, 40>}, {pipeline_mode = #tpu.pipeline_mode<synchronous>, transform_indices = @transform_2, window_bounds = array<i64: 32, 512>}, {transform_indices = @transform_3, window_bounds = array<i64: 1, 32, 200>}, {transform_indices = @transform_4, window_bounds = array<i64: 1, 1, 200>}, {transform_indices = @transform_5, window_bounds = array<i64: 1, 1, 512>}]} {
    %c0_i32 = arith.constant 0 : i32
    %0 = arith.cmpi eq, %arg1, %c0_i32 : i32
    %1 = arith.extui %0 : i1 to i32
    %c0_i32_0 = arith.constant 0 : i32
    %2 = arith.cmpi ne, %1, %c0_i32_0 : i32
    scf.if %2 {
      %cst_31 = arith.constant 0.000000e+00 : f32
      %44 = vector.broadcast %cst_31 : f32 to vector<1x512xf32>
      %c0_32 = arith.constant 0 : index
      %c0_33 = arith.constant 0 : index
      %c0_34 = arith.constant 0 : index
      %45 = vector.load %arg7[%c0_32, %c0_33, %c0_34] : memref<1x1x512xf32, #tpu.memory_space<vmem>>, vector<1x1x512xf32>
      %46 = vector.shape_cast %45 : vector<1x1x512xf32> to vector<1x512xf32>
      %47 = vector.shape_cast %44 : vector<1x512xf32> to vector<1x1x512xf32>
      tpu.vector_store %arg7[%c0_32, %c0_33, %c0_34], %47 {strides = array<i32>} : memref<1x1x512xf32, #tpu.memory_space<vmem>>, vector<1x1x512xf32>,
    } else {
    }
    %c0 = arith.constant 0 : index
    %c0_1 = arith.constant 0 : index
    %c0_2 = arith.constant 0 : index
    %3 = vector.load %arg2[%c0, %c0_1, %c0_2] : memref<1x32x200xf32, #tpu.memory_space<vmem>>, vector<1x32x200xf32>
    %4 = vector.shape_cast %3 : vector<1x32x200xf32> to vector<32x200xf32>
    %c0_3 = arith.constant 0 : index
    %c0_4 = arith.constant 0 : index
    %5 = vector.load %arg8[%c0_3, %c0_4] : memref<40x200xf32, #tpu.memory_space<vmem>>, vector<32x200xf32>
    tpu.vector_store %arg8[%c0_3, %c0_4], %4 {strides = array<i32>} : memref<40x200xf32, #tpu.memory_space<vmem>>, vector<32x200xf32>,
    %cst = arith.constant 1.000000e+00 : f32
    %6 = vector.broadcast %cst : f32 to vector<8x200xf32>
    %c32 = arith.constant 32 : index
    %c0_5 = arith.constant 0 : index
    %7 = vector.load %arg8[%c32, %c0_5] : memref<40x200xf32, #tpu.memory_space<vmem>>, vector<8x200xf32>
    tpu.vector_store %arg8[%c32, %c0_5], %6 {strides = array<i32>} : memref<40x200xf32, #tpu.memory_space<vmem>>, vector<8x200xf32>,
    %c0_6 = arith.constant 0 : index
    %c0_7 = arith.constant 0 : index
    %8 = vector.load %arg3[%c0_6, %c0_7] : memref<512x40xf32, #tpu.memory_space<vmem>>, vector<512x40xf32>
    %c0_8 = arith.constant 0 : index
    %c0_9 = arith.constant 0 : index
    %9 = vector.load %arg8[%c0_8, %c0_9] : memref<40x200xf32, #tpu.memory_space<vmem>>, vector<40x200xf32>
    %cst_10 = arith.constant dense<0.000000e+00> : vector<512x200xf32>
    %10 = tpu.matmul %8, %9, %cst_10 {dimension_numbers = #tpu.dot_dimension_numbers<[1], [0], [0], [1], [0, 0, 1, 1], [], []>} : vector<512x40xf32>, vector<40x200xf32>, vector<512x200xf32> -> vector<512x200xf32>
    %11 = tpu.iota {dimensions = array<i32: 0>} : vector<512x200xi32>
    %cst_11 = arith.constant dense<0x7F800000> : vector<200xf32>
    %12 = vector.multi_reduction <minimumf>, %10, %cst_11 [0] : vector<512x200xf32> to vector<200xf32>
    %13 = vector.shape_cast %12 : vector<200xf32> to vector<1x200xf32>
    %14 = vector.broadcast %13 : vector<1x200xf32> to vector<512x200xf32>
    %15 = arith.cmpf ole, %10, %14 : vector<512x200xf32>
    %c512_i32 = arith.constant 512 : i32
    %16 = vector.broadcast %c512_i32 : i32 to vector<512x200xi32>
    %17 = arith.select %15, %11, %16 : vector<512x200xi1>, vector<512x200xi32>
    %cst_12 = arith.constant dense<2147483647> : vector<200xi32>
    %18 = vector.multi_reduction <minsi>, %17, %cst_12 [0] : vector<512x200xi32> to vector<200xi32>
    %19 = vector.shape_cast %18 : vector<200xi32> to vector<1x200xi32>
    %20 = vector.broadcast %19 : vector<1x200xi32> to vector<512x200xi32>
    %21 = arith.cmpi eq, %11, %20 : vector<512x200xi32>
    %22 = arith.extui %21 : vector<512x200xi1> to vector<512x200xi32>
    %23 = arith.sitofp %22 : vector<512x200xi32> to vector<512x200xf32>
    %c0_13 = arith.constant 0 : index
    %c0_14 = arith.constant 0 : index
    %24 = vector.load %arg4[%c0_13, %c0_14] : memref<32x512xf32, #tpu.memory_space<vmem>>, vector<32x512xf32>
    %cst_15 = arith.constant dense<0.000000e+00> : vector<32x200xf32>
    %25 = tpu.matmul %24, %23, %cst_15 {dimension_numbers = #tpu.dot_dimension_numbers<[1], [0], [0], [1], [0, 0, 1, 1], [], []>} : vector<32x512xf32>, vector<512x200xf32>, vector<32x200xf32> -> vector<32x200xf32>
    %c0_16 = arith.constant 0 : index
    %c0_17 = arith.constant 0 : index
    %c0_18 = arith.constant 0 : index
    %26 = vector.load %arg5[%c0_16, %c0_17, %c0_18] : memref<1x32x200xf32, #tpu.memory_space<vmem>>, vector<1x32x200xf32>
    %27 = vector.shape_cast %26 : vector<1x32x200xf32> to vector<32x200xf32>
    %28 = vector.shape_cast %25 : vector<32x200xf32> to vector<1x32x200xf32>
    tpu.vector_store %arg5[%c0_16, %c0_17, %c0_18], %28 {strides = array<i32>} : memref<1x32x200xf32, #tpu.memory_space<vmem>>, vector<1x32x200xf32>,
    %29 = arith.subf %4, %25 : vector<32x200xf32>
    %30 = arith.mulf %29, %29 : vector<32x200xf32>
    %cst_19 = arith.constant dense<0.000000e+00> : vector<200xf32>
    %31 = vector.multi_reduction <add>, %30, %cst_19 [0] : vector<32x200xf32> to vector<200xf32>
    %32 = vector.shape_cast %31 : vector<200xf32> to vector<1x200xf32>
    %c0_20 = arith.constant 0 : index
    %c0_21 = arith.constant 0 : index
    %c0_22 = arith.constant 0 : index
    %33 = vector.load %arg6[%c0_20, %c0_21, %c0_22] : memref<1x1x200xf32, #tpu.memory_space<vmem>>, vector<1x1x200xf32>
    %34 = vector.shape_cast %33 : vector<1x1x200xf32> to vector<1x200xf32>
    %35 = vector.shape_cast %32 : vector<1x200xf32> to vector<1x1x200xf32>
    tpu.vector_store %arg6[%c0_20, %c0_21, %c0_22], %35 {strides = array<i32>} : memref<1x1x200xf32, #tpu.memory_space<vmem>>, vector<1x1x200xf32>,
    %cst_23 = arith.constant 1.000000e+00 : f32
    %36 = vector.broadcast %cst_23 : f32 to vector<1x200xf32>
    %c0_24 = arith.constant 0 : index
    %c0_25 = arith.constant 0 : index
    %c0_26 = arith.constant 0 : index
    %37 = vector.load %arg7[%c0_24, %c0_25, %c0_26] : memref<1x1x512xf32, #tpu.memory_space<vmem>>, vector<1x1x512xf32>
    %38 = vector.shape_cast %37 : vector<1x1x512xf32> to vector<1x512xf32>
    %cst_27 = arith.constant dense<0.000000e+00> : vector<1x512xf32>
    %39 = tpu.matmul %36, %23, %cst_27 {dimension_numbers = #tpu.dot_dimension_numbers<[1], [1], [0], [0], [0, 0, 1, 0], [], []>} : vector<1x200xf32>, vector<512x200xf32>, vector<1x512xf32> -> vector<1x512xf32>
    %40 = arith.addf %38, %39 : vector<1x512xf32>
    %c0_28 = arith.constant 0 : index
    %c0_29 = arith.constant 0 : index
    %c0_30 = arith.constant 0 : index
    %41 = vector.load %arg7[%c0_28, %c0_29, %c0_30] : memref<1x1x512xf32, #tpu.memory_space<vmem>>, vector<1x1x512xf32>
    %42 = vector.shape_cast %41 : vector<1x1x512xf32> to vector<1x512xf32>
    %43 = vector.shape_cast %40 : vector<1x512xf32> to vector<1x1x512xf32>
    tpu.vector_store %arg7[%c0_28, %c0_29, %c0_30], %43 {strides = array<i32>} : memref<1x1x512xf32, #tpu.memory_space<vmem>>, vector<1x1x512xf32>,
    return
  }
  func.func @transform_0(%arg0: i32, %arg1: i32) -> (i32, i32, i32) {
    %c0_i32 = arith.constant 0 : i32
    %c0_i32_0 = arith.constant 0 : i32
    return %arg0, %c0_i32, %arg1 : i32, i32, i32
  }
  func.func @transform_1(%arg0: i32, %arg1: i32) -> (i32, i32) {
    %c0_i32 = arith.constant 0 : i32
    %c0_i32_0 = arith.constant 0 : i32
    %c0_i32_1 = arith.constant 0 : i32
    return %c0_i32, %c0_i32_0 : i32, i32
  }
  func.func @transform_2(%arg0: i32, %arg1: i32) -> (i32, i32) {
    %c0_i32 = arith.constant 0 : i32
    %c0_i32_0 = arith.constant 0 : i32
    %c0_i32_1 = arith.constant 0 : i32
    return %c0_i32, %c0_i32_0 : i32, i32
  }
  func.func @transform_3(%arg0: i32, %arg1: i32) -> (i32, i32, i32) {
    %c0_i32 = arith.constant 0 : i32
    %c0_i32_0 = arith.constant 0 : i32
    return %arg0, %c0_i32, %arg1 : i32, i32, i32
  }
  func.func @transform_4(%arg0: i32, %arg1: i32) -> (i32, i32, i32) {
    %c0_i32 = arith.constant 0 : i32
    %c0_i32_0 = arith.constant 0 : i32
    return %arg0, %c0_i32, %arg1 : i32, i32, i32
  }
  func.func @transform_5(%arg0: i32, %arg1: i32) -> (i32, i32, i32) {
    %c0_i32 = arith.constant 0 : i32
    %c0_i32_0 = arith.constant 0 : i32
    %c0_i32_1 = arith.constant 0 : i32
    return %arg0, %c0_i32, %c0_i32_0 : i32, i32, i32
  }
}

</mosaic_0001>

<bundles_post_ra>
// kernel: tpu_custom_call.1
= control target key start
LH: loop header
LB: loop body
LE: loop exit
PB: predicated region body
PF: predicated region fallthrough
CT: control target
= control target key end

     0   :  { %11 = vsyncpa [#allocation4], 0  ;;  %s7223_s0 = inlined_call_operand.vmem [shape: f32[2,32,200], index: 0, kind: input, shape index: {}]   ;;  %s7224_s1 = inlined_call_operand.vmem [shape: f32[512,40], index: 1, kind: input, shape index: {}]   ;;  %s7225_s2 = inlined_call_operand.vmem [shape: f32[32,512], index: 2, kind: input, shape index: {}]   ;;  %s7226_s3 = inlined_call_operand.hbm [shape: f32[2,32,200], index: 3, kind: output, shape index: {0}]   ;;  %s7227_s4 = inlined_call_operand.hbm [shape: f32[2,1,200], index: 4, kind: output, shape index: {1}]   ;;  %s7228_s5 = inlined_call_operand.hbm [shape: f32[2,1,512], index: 5, kind: output, shape index: {2}]  }
   0x1   :  { %13 = vsyncpa [#allocation4 + $0x1], 0 }
   0x2   :  { %14 = vsyncpa [#allocation6], 0 }
   0x3   :  { %16 = vsyncpa [#allocation6 + $0x1], 0  ;;  %s3815_s18 = smov 0   ;;  %s3817_s19 = smov 0  }
   0x4   :  { %s3819_s20 = smov 0   ;;  %s3821_s21 = smov 0  }
   0x5   :  { %s3823_s22 = smov 0   ;;  %s3825_s23 = smov 0  }
   0x6 LB: > { %s3093_s24 = sadd.s32 4294967295, %s3775_s23   ;;  %s7571_s25 = sadd.s32 4294967294, %s3775_s23   ;;  %s3775_s23 = sphi %s3825_s23, %s22_s23   ;;  %s3771_s22 = sphi %s3823_s22, %s8228_s22   ;;  %s3767_s21 = sphi %s3821_s21, %s8227_s21   ;;  %s3763_s20 = sphi %s3819_s20, %s8226_s20   ;;  %s3759_s19 = sphi %s3817_s19, %s8225_s19   ;;  %s3755_s18 = sphi %s3815_s18, %s8224_s18  }
   0x7   : > { %s34_s26 = sadd.s32 1, %s3771_s22  ;;  %s113_s27 = sadd.s32 1, %s3763_s20 }
   0x8   : > { %p36_p0 = scmp.ge.s32.totalorder %s34_s26, 2  ;;  %p123_p1 = scmp.ne.s32.totalorder %s3763_s20, %s3759_s19 }
   0x9   : > { %p124_p2 = scmp.eq.s32.totalorder %s3093_s24, 1  ;;  %p129_p3 = scmp.ne.s32.totalorder %s3759_s19, %s3755_s18 }
   0xa   : > { %s8230_s26 = smov (%p36_p0, %s34_s26), 0  ;;  %p130_p5 = scmp.eq.s32.totalorder %s7571_s25, 1 }
   0xb   : > { %p3857_p4 = por %p124_p2, %p123_p1  ;;  %s108_s29 = ssub.s32 %s3771_s22, %s8230_s26 }
   0xc   : > { %p3097_p6 = scmp.ge.s32.totalorder %s3775_s23, 1  ;;  %p111_p7 = scmp.eq.s32.totalorder %s108_s29, 0 }
   0xd   : > { %p3866_p8 = por %p130_p5, %p129_p3  ;;  %p221_p9 = scmp.lt.s32.totalorder %s3775_s23, 3 }
   0xe   : > { %s3872_s6 = scalar_select %p111_p7, %s3763_s20, %s113_s27  }
   0xf   : > { %p222_p10 = pnand %p3097_p6, %p221_p9 }
  0x11   : > { %225 = sbr.rel (%p222_p10) target bundleno = 1157 (0x485), region = 32 }
  0x16   : > { %vm7443_vm0 = vcmask 588800   ;;  %p264_p11 = scmp.lt.s32.totalorder %s3767_s21, 1  ;;  %v3777_v0 = vmov 1.0   ;;  %v7229_v1 = vmov 0.0   ;;  %v303_v15 = vld [vmem:[%s7224_s1] sm:$0xff]  ;;  %vm377_vm1 = vcmask 326656  }
  0x17   : > { %302 = vst.msk [vmem:[#allocation2 + $0x48] sm:$0xff] %vm7443_vm0, %v3777_v0  ;;  %301 = vst [vmem:[#allocation2 + $0x40] sm:$0xff] %v3777_v0  ;;  %634 = vmatprep.mubr.f32.mxu0 %v7229_v1  ;;  %v304_v16 = vld [vmem:[%s7224_s1 + $0x8] sm:$0xff]  ;;  %v305_v17 = vld [vmem:[%s7224_s1 + $0x10] sm:$0xff]  ;;  %s7081_s16 = sand.u32 1, %s3759_s19   ;;  %s3779_s15 = smov [#allocation3]  }
  0x18   : > { %s265_s7 = scalar_select %p264_p11, %s3767_s21, 1  ;;  %v306_v18 = vld [vmem:[%s7224_s1 + $0x18] sm:$0xff]  ;;  %v307_v19 = vld [vmem:[%s7224_s1 + $0x20] sm:$0xff]  ;;  %v308_v20 = vld [vmem:[%s7224_s1 + $0x28] sm:$0xff] }
  0x19   : > { %v309_v21 = vld [vmem:[%s7224_s1 + $0x30] sm:$0xff]  ;;  %v310_v22 = vld [vmem:[%s7224_s1 + $0x38] sm:$0xff]  ;;  %v311_v23 = vld [vmem:[%s7224_s1 + $0x40] sm:$0xff]  ;;  %s3098_s17 = sshll.u32 %s7081_s16, 6  ;;  %s3100_s29 = sshll.u32 %s7081_s16, 2 }
  0x1a   : > { %s3564_s8 = sshll.u32 %s265_s7, 6  ;;  %v312_v24 = vld [vmem:[%s7224_s1 + $0x48] sm:$0xff]  ;;  %v313_v25 = vld [vmem:[%s7224_s1 + $0x50] sm:$0xff]  ;;  %v314_v26 = vld [vmem:[%s7224_s1 + $0x58] sm:$0xff]  ;;  %s7084_s27 = scalar_lea.vmem [#allocation3], %s3098_s17 }
  0x1b   : > { %s271_s11 = scalar_lea.vmem %s7223_s0, %s3564_s8  ;;  %v315_v27 = vld [vmem:[%s7224_s1 + $0x60] sm:$0xff]  ;;  %v316_v28 = vld [vmem:[%s7224_s1 + $0x68] sm:$0xff]  ;;  %v317_v29 = vld [vmem:[%s7224_s1 + $0x70] sm:$0xff]  ;;  %s7096_s7 = scalar_lea.vmem [#allocation7], %s3100_s29 }
  0x1c   : > { %v3883_v2 = vld [vmem:[%s271_s11 + $0x38] sm:$0xff]  ;;  %v290_v3 = vld [vmem:[%s271_s11 + $0x30] sm:$0xff]  ;;  %v3885_v4 = vld [vmem:[%s271_s11 + $0x28] sm:$0xff]  ;;  %s3565_s8 = sshll.u32 %s3767_s21, 10  ;;  %s2920_s12 = sshll.u32 %s7084_s27, 4  ;;  %s7124_s12 = int_to_ptr.vmem [resolvable:$true] %s2920_s12 }
  0x1d   : > { %7574 = vst [vmem:[#allocation10_spill] sm:$0xff] %v3883_v2  ;;  %7575 = vst [vmem:[#allocation11_spill] sm:$0xff] %v3885_v4  ;;  %v288_v5 = vld [vmem:[%s271_s11 + $0x20] sm:$0xff]  ;;  %v3891_v6 = vld [vmem:[%s271_s11 + $0x18] sm:$0xff]  ;;  %s2895_s13 = scalar_lea.sflag [#allocation4], %s7081_s16  ;;  %s3643_s14 = scalar_lea.vmem %s7124_s12, 1024 }
  0x1e   : > { %300 = vst.msk [vmem:[#allocation2 + $0x38] sm:$0xff] %vm7443_vm0, %v3883_v2  ;;  %299 = vst [vmem:[#allocation2 + $0x30] sm:$0xff] %v290_v3  ;;  %v286_v7 = vld [vmem:[%s271_s11 + $0x10] sm:$0xff]  ;;  %v376_v8 = vld [vmem:[#allocation2 + $0x48] sm:$0xff]  ;;  %p3644_p12 = scmp.ne.s32.totalorder %s7124_s12, %s3643_s14  ;;  %s3647_s17 = sshll.u32 %s3779_s15, 4  ;;  %s3648_s17 = int_to_ptr.vmem [resolvable:$false] %s3647_s17 }
  0x1f   : > { %298 = vst.msk [vmem:[#allocation2 + $0x28] sm:$0xff] %vm7443_vm0, %v3885_v4  ;;  %7576 = vst [vmem:[#allocation12_spill] sm:$0xff] %v3891_v6  ;;  %v3895_v9 = vld [vmem:[%s271_s11 + $0x8] sm:$0xff]  ;;  %v284_v10 = vld [vmem:[%s271_s11] sm:$0xff]  ;;  %592 = vmatprep.subr.mxu0 %v376_v8  ;;  %s7117_s11 = scalar_lea.hbm %s7226_s3, %s3565_s8  ;;  %s3649_s29 = scalar_lea.vmem %s3648_s17, 2048 }
  0x20   : > { %297 = vst [vmem:[#allocation2 + $0x20] sm:$0xff] %v288_v5  ;;  %296 = vst.msk [vmem:[#allocation2 + $0x18] sm:$0xff] %vm7443_vm0, %v3891_v6  ;;  %593 = vmatpush1.msra.mxu0 %v3777_v0  ;;  %v318_v30 = vld [vmem:[%s7224_s1 + $0x78] sm:$0xff]  ;;  %v319_v31 = vld [vmem:[%s7224_s1 + $0x80] sm:$0xff]  ;;  %p3645_p13 = pnand %p3644_p12, %p3857_p4  ;;  %p3650_p1 = scmp.lt.s32.totalorder %s7124_s12, %s3648_s17 }
  0x21   : > { %295 = vst [vmem:[#allocation2 + $0x10] sm:$0xff] %v286_v7  ;;  %7577 = vst [vmem:[#allocation13_spill] sm:$0xff] %v3895_v9  ;;  %v320_v32 = vld [vmem:[%s7224_s1 + $0x88] sm:$0xff]  ;;  %v321_v33 = vld [vmem:[%s7224_s1 + $0x90] sm:$0xff]  ;;  %p3651_p2 = scmp.lt.s32.totalorder %s3649_s29, %s3643_s14 }
  0x22   : > { %294 = vst.msk [vmem:[#allocation2 + $0x8] sm:$0xff] %vm7443_vm0, %v3895_v9  ;;  %292 = vst [vmem:[#allocation2] sm:$0xff] %v284_v10  ;;  %v322_v34 = vld [vmem:[%s7224_s1 + $0x98] sm:$0xff]  ;;  %v323_v35 = vld [vmem:[%s7224_s1 + $0xa0] sm:$0xff]  ;;  %p3646_p0 = pneg %p3645_p13 }
  0x23   : > { %v324_v36 = vld [vmem:[%s7224_s1 + $0xa8] sm:$0xff]  ;;  %v325_v37 = vld [vmem:[%s7224_s1 + $0xb0] sm:$0xff]  ;;  %v326_v38 = vld [vmem:[%s7224_s1 + $0xb8] sm:$0xff]  ;;  %p3652_p3 = por %p3651_p2, %p3650_p1 }
  0x24   : > { %v327_v39 = vld [vmem:[%s7224_s1 + $0xc0] sm:$0xff]  ;;  %v328_v40 = vld [vmem:[%s7224_s1 + $0xc8] sm:$0xff]  ;;  %v329_v41 = vld [vmem:[%s7224_s1 + $0xd0] sm:$0xff] }
  0x25   : > { %v374_v11 = vld [vmem:[#allocation2 + $0x38] sm:$0xff]  ;;  %v331_v43 = vld [vmem:[%s7224_s1 + $0xe0] sm:$0xff]  ;;  %v332_v44 = vld [vmem:[%s7224_s1 + $0xe8] sm:$0xff]  ;;  %p3653_p5 = pnand %p3652_p3, %p3646_p0 }
  0x26   : > { %v372_v12 = vld [vmem:[#allocation2 + $0x28] sm:$0xff]  ;;  %594 = vmatprep.subr.mxu0 %v374_v11  ;;  %v330_v42 = vld [vmem:[%s7224_s1 + $0xd8] sm:$0xff]  ;;  %v333_v45 = vld [vmem:[%s7224_s1 + $0xf0] sm:$0xff] }
  0x27   : > { %595 = vmatpush1.msra.mxu0 %v290_v3  ;;  %v370_v13 = vld [vmem:[#allocation2 + $0x18] sm:$0xff]  ;;  %v335_v47 = vld [vmem:[%s7224_s1 + $0x100] sm:$0xff]  ;;  %v336_v48 = vld [vmem:[%s7224_s1 + $0x108] sm:$0xff] }
  0x28   : > { %596 = vmatprep.subr.mxu0 %v372_v12  ;;  %v334_v46 = vld [vmem:[%s7224_s1 + $0xf8] sm:$0xff]  ;;  %v337_v49 = vld [vmem:[%s7224_s1 + $0x110] sm:$0xff]  ;;  %v339_v51 = vld [vmem:[%s7224_s1 + $0x120] sm:$0xff] }
  0x29   : > { %597 = vmatpush1.msra.mxu0 %v288_v5  ;;  %v368_v14 = vld [vmem:[#allocation2 + $0x8] sm:$0xff]  ;;  %v338_v50 = vld [vmem:[%s7224_s1 + $0x118] sm:$0xff]  ;;  %v341_v53 = vld [vmem:[%s7224_s1 + $0x130] sm:$0xff] }
  0x2a   : > { %598 = vmatprep.subr.mxu0 %v370_v13  ;;  %v340_v52 = vld [vmem:[%s7224_s1 + $0x128] sm:$0xff]  ;;  %v342_v54 = vld [vmem:[%s7224_s1 + $0x138] sm:$0xff]  ;;  %v343_v55 = vld [vmem:[%s7224_s1 + $0x140] sm:$0xff] }
  0x2b   : > { %599 = vmatpush1.msra.mxu0 %v286_v7  ;;  %v344_v56 = vld [vmem:[%s7224_s1 + $0x148] sm:$0xff]  ;;  %v345_v57 = vld [vmem:[%s7224_s1 + $0x150] sm:$0xff]  ;;  %v346_v58 = vld [vmem:[%s7224_s1 + $0x158] sm:$0xff] }
  0x2c   : > { %600 = vmatprep.subr.mxu0 %v368_v14  ;;  %v347_v59 = vld [vmem:[%s7224_s1 + $0x160] sm:$0xff]  ;;  %v348_v60 = vld [vmem:[%s7224_s1 + $0x168] sm:$0xff]  ;;  %v349_v61 = vld [vmem:[%s7224_s1 + $0x170] sm:$0xff] }
  0x2d   : > { %601 = vmatpush1.msra.mxu0 %v284_v10  ;;  %v350_v62 = vld [vmem:[%s7224_s1 + $0x178] sm:$0xff]  ;;  %v351_v63 = vld [vmem:[%s7224_s1 + $0x180] sm:$0xff]  ;;  %v352_v5 = vld [vmem:[%s7224_s1 + $0x188] sm:$0xff] }
  0x2e   : > { %3103 = vmatmul.mubr.msk.f32.vlgmr.msra.gmra.mxu0 %vm377_vm1, %v303_v15  ;;  %v353_v10 = vld [vmem:[%s7224_s1 + $0x190] sm:$0xff]  ;;  %v354_v13 = vld [vmem:[%s7224_s1 + $0x198] sm:$0xff] }
  0x2f   : > { %640 = vmatprep.mubr.f32.mxu0 %v7229_v1 }
  0x32   : > { %3104 = vmatmul.mubr.msk.f32.gmra.mxu0 %vm377_vm1, %v304_v16  ;;  %v355_v16 = vld [vmem:[%s7224_s1 + $0x1a0] sm:$0xff] }
  0x33   : > { %646 = vmatprep.mubr.f32.mxu0 %v7229_v1 }
  0x36   : > { %3105 = vmatmul.mubr.msk.f32.gmra.mxu0 %vm377_vm1, %v305_v17 }
  0x37   : > { %652 = vmatprep.mubr.f32.mxu0 %v7229_v1 }
  0x3a   : > { %3106 = vmatmul.mubr.msk.f32.gmra.mxu0 %vm377_vm1, %v306_v18 }
  0x3b   : > { %658 = vmatprep.mubr.f32.mxu0 %v7229_v1 }
  0x3e   : > { %3107 = vmatmul.mubr.msk.f32.gmra.mxu0 %vm377_vm1, %v307_v19  ;;  %v356_v19 = vld [vmem:[%s7224_s1 + $0x1a8] sm:$0xff] }
  0x3f   : > { %664 = vmatprep.mubr.f32.mxu0 %v7229_v1 }
  0x42   : > { %3108 = vmatmul.mubr.msk.f32.gmra.mxu0 %vm377_vm1, %v308_v20 }
  0x43   : > { %670 = vmatprep.mubr.f32.mxu0 %v7229_v1 }
  0x46   : > { %3109 = vmatmul.mubr.msk.f32.gmra.mxu0 %vm377_vm1, %v309_v21 }
  0x47   : > { %676 = vmatprep.mubr.f32.mxu0 %v7229_v1 }
  0x4a   : > { %3110 = vmatmul.mubr.msk.f32.gmra.mxu0 %vm377_vm1, %v310_v22  ;;  %v357_v22 = vld [vmem:[%s7224_s1 + $0x1b0] sm:$0xff] }
  0x4b   : > { %682 = vmatprep.mubr.f32.mxu0 %v7229_v1 }
  0x4e   : > { %3111 = vmatmul.mubr.msk.f32.gmra.mxu0 %vm377_vm1, %v311_v23 }
  0x4f   : > { %688 = vmatprep.mubr.f32.mxu0 %v7229_v1 }
  0x52   : > { %3112 = vmatmul.mubr.msk.f32.gmra.mxu0 %vm377_vm1, %v312_v24 }
  0x53   : > { %694 = vmatprep.mubr.f32.mxu0 %v7229_v1 }
  0x56   : > { %3113 = vmatmul.mubr.msk.f32.gmra.mxu0 %vm377_vm1, %v313_v25  ;;  %v358_v25 = vld [vmem:[%s7224_s1 + $0x1b8] sm:$0xff] }
  0x57   : > { %700 = vmatprep.mubr.f32.mxu0 %v7229_v1 }
  0x5a   : > { %3114 = vmatmul.mubr.msk.f32.gmra.mxu0 %vm377_vm1, %v314_v26 }
  0x5b   : > { %706 = vmatprep.mubr.f32.mxu0 %v7229_v1 }
  0x5e   : > { %3115 = vmatmul.mubr.msk.f32.gmra.mxu0 %vm377_vm1, %v315_v27 }
  0x5f   : > { %712 = vmatprep.mubr.f32.mxu0 %v7229_v1 }
  0x62   : > { %3116 = vmatmul.mubr.msk.f32.gmra.mxu0 %vm377_vm1, %v316_v28  ;;  %v359_v28 = vld [vmem:[%s7224_s1 + $0x1c0] sm:$0xff] }
  0x63   : > { %718 = vmatprep.mubr.f32.mxu0 %v7229_v1 }
  0x66   : > { %3117 = vmatmul.mubr.msk.f32.gmra.mxu0 %vm377_vm1, %v317_v29 }
  0x67   : > { %724 = vmatprep.mubr.f32.mxu0 %v7229_v1 }
  0x6a   : > { %3118 = vmatmul.mubr.msk.f32.gmra.mxu0 %vm377_vm1, %v318_v30 }
  0x6b   : > { %730 = vmatprep.mubr.f32.mxu0 %v7229_v1 }
  0x6e   : > { %3119 = vmatmul.mubr.msk.f32.gmra.mxu0 %vm377_vm1, %v319_v31  ;;  %v360_v31 = vld [vmem:[%s7224_s1 + $0x1c8] sm:$0xff] }
  0x6f   : > { %736 = vmatprep.mubr.f32.mxu0 %v7229_v1 }
  0x72   : > { %3120 = vmatmul.mubr.msk.f32.gmra.mxu0 %vm377_vm1, %v320_v32 }
  0x73   : > { %742 = vmatprep.mubr.f32.mxu0 %v7229_v1 }
  0x76   : > { %3121 = vmatmul.mubr.msk.f32.gmra.mxu0 %vm377_vm1, %v321_v33 }
  0x77   : > { %748 = vmatprep.mubr.f32.mxu0 %v7229_v1 }
  0x7a   : > { %3122 = vmatmul.mubr.msk.f32.gmra.mxu0 %vm377_vm1, %v322_v34  ;;  %v361_v34 = vld [vmem:[%s7224_s1 + $0x1d0] sm:$0xff] }
  0x7b   : > { %754 = vmatprep.mubr.f32.mxu0 %v7229_v1 }
  0x7e   : > { %3123 = vmatmul.mubr.msk.f32.gmra.mxu0 %vm377_vm1, %v323_v35 }
  0x7f   : > { %760 = vmatprep.mubr.f32.mxu0 %v7229_v1 }
  0x82   : > { %3124 = vmatmul.mubr.msk.f32.gmra.mxu0 %vm377_vm1, %v324_v36 }
  0x83   : > { %766 = vmatprep.mubr.f32.mxu0 %v7229_v1 }
  0x86   : > { %3125 = vmatmul.mubr.msk.f32.gmra.mxu0 %vm377_vm1, %v325_v37  ;;  %v362_v37 = vld [vmem:[%s7224_s1 + $0x1d8] sm:$0xff] }
  0x87   : > { %772 = vmatprep.mubr.f32.mxu0 %v7229_v1 }
  0x8a   : > { %3126 = vmatmul.mubr.msk.f32.gmra.mxu0 %vm377_vm1, %v326_v38 }
  0x8b   : > { %778 = vmatprep.mubr.f32.mxu0 %v7229_v1 }
  0x8e   : > { %3127 = vmatmul.mubr.msk.f32.gmra.mxu0 %vm377_vm1, %v327_v39 }
  0x8f   : > { %784 = vmatprep.mubr.f32.mxu0 %v7229_v1 }
  0x92   : > { %3128 = vmatmul.mubr.msk.f32.gmra.mxu0 %vm377_vm1, %v328_v40  ;;  %v363_v40 = vld [vmem:[%s7224_s1 + $0x1e0] sm:$0xff] }
  0x93   : > { %790 = vmatprep.mubr.f32.mxu0 %v7229_v1 }
  0x96   : > { %3129 = vmatmul.mubr.msk.f32.gmra.mxu0 %vm377_vm1, %v329_v41 }
  0x97   : > { %796 = vmatprep.mubr.f32.mxu0 %v7229_v1 }
  0x9a   : > { %3130 = vmatmul.mubr.msk.f32.gmra.mxu0 %vm377_vm1, %v330_v42 }
  0x9b   : > { %802 = vmatprep.mubr.f32.mxu0 %v7229_v1 }
  0x9e   : > { %3131 = vmatmul.mubr.msk.f32.gmra.mxu0 %vm377_vm1, %v331_v43  ;;  %v364_v43 = vld [vmem:[%s7224_s1 + $0x1e8] sm:$0xff] }
  0x9f   : > { %808 = vmatprep.mubr.f32.mxu0 %v7229_v1 }
  0xa2   : > { %3132 = vmatmul.mubr.msk.f32.gmra.mxu0 %vm377_vm1, %v332_v44 }
  0xa3   : > { %814 = vmatprep.mubr.f32.mxu0 %v7229_v1 }
  0xa6   : > { %3133 = vmatmul.mubr.msk.f32.gmra.mxu0 %vm377_vm1, %v333_v45 }
  0xa7   : > { %820 = vmatprep.mubr.f32.mxu0 %v7229_v1 }
  0xaa   : > { %3134 = vmatmul.mubr.msk.f32.gmra.mxu0 %vm377_vm1, %v334_v46  ;;  %v365_v46 = vld [vmem:[%s7224_s1 + $0x1f0] sm:$0xff] }
  0xab   : > { %826 = vmatprep.mubr.f32.mxu0 %v7229_v1 }
  0xae   : > { %3135 = vmatmul.mubr.msk.f32.gmra.mxu0 %vm377_vm1, %v335_v47 }
  0xaf   : > { %832 = vmatprep.mubr.f32.mxu0 %v7229_v1 }
  0xb2   : > { %3136 = vmatmul.mubr.msk.f32.gmra.mxu0 %vm377_vm1, %v336_v48 }
  0xb3   : > { %838 = vmatprep.mubr.f32.mxu0 %v7229_v1 }
  0xb6   : > { %3137 = vmatmul.mubr.msk.f32.gmra.mxu0 %vm377_vm1, %v337_v49  ;;  %v366_v49 = vld [vmem:[%s7224_s1 + $0x1f8] sm:$0xff] }
  0xb7   : > { %844 = vmatprep.mubr.f32.mxu0 %v7229_v1 }
  0xba   : > { %3138 = vmatmul.mubr.msk.f32.gmra.mxu0 %vm377_vm1, %v338_v50 }
  0xbb   : > { %850 = vmatprep.mubr.f32.mxu0 %v7229_v1 }
  0xbe   : > { %3139 = vmatmul.mubr.msk.f32.gmra.mxu0 %vm377_vm1, %v339_v51 }
  0xbf   : > { %856 = vmatprep.mubr.f32.mxu0 %v7229_v1 }
  0xc2   : > { %3140 = vmatmul.mubr.msk.f32.gmra.mxu0 %vm377_vm1, %v340_v52 }
  0xc3   : > { %862 = vmatprep.mubr.f32.mxu0 %v7229_v1 }
  0xc6   : > { %3141 = vmatmul.mubr.msk.f32.gmra.mxu0 %vm377_vm1, %v341_v53 }
  0xc7   : > { %868 = vmatprep.mubr.f32.mxu0 %v7229_v1 }
  0xca   : > { %3142 = vmatmul.mubr.msk.f32.gmra.mxu0 %vm377_vm1, %v342_v54 }
  0xcb   : > { %874 = vmatprep.mubr.f32.mxu0 %v7229_v1 }
  0xce   : > { %3143 = vmatmul.mubr.msk.f32.gmra.mxu0 %vm377_vm1, %v343_v55 }
  0xcf   : > { %880 = vmatprep.mubr.f32.mxu0 %v7229_v1 }
  0xd2   : > { %3144 = vmatmul.mubr.msk.f32.gmra.mxu0 %vm377_vm1, %v344_v56 }
  0xd3   : > { %886 = vmatprep.mubr.f32.mxu0 %v7229_v1 }
  0xd6   : > { %3145 = vmatmul.mubr.msk.f32.gmra.mxu0 %vm377_vm1, %v345_v57 }
  0xd7   : > { %892 = vmatprep.mubr.f32.mxu0 %v7229_v1 }
  0xda   : > { %3146 = vmatmul.mubr.msk.f32.gmra.mxu0 %vm377_vm1, %v346_v58 }
  0xdb   : > { %898 = vmatprep.mubr.f32.mxu0 %v7229_v1 }
  0xde   : > { %3147 = vmatmul.mubr.msk.f32.gmra.mxu0 %vm377_vm1, %v347_v59 }
  0xdf   : > { %904 = vmatprep.mubr.f32.mxu0 %v7229_v1 }
  0xe2   : > { %3148 = vmatmul.mubr.msk.f32.gmra.mxu0 %vm377_vm1, %v348_v60 }
  0xe3   : > { %910 = vmatprep.mubr.f32.mxu0 %v7229_v1 }
  0xe6   : > { %3149 = vmatmul.mubr.msk.f32.gmra.mxu0 %vm377_vm1, %v349_v61 }
  0xe7   : > { %916 = vmatprep.mubr.f32.mxu0 %v7229_v1 }
  0xea   : > { %3150 = vmatmul.mubr.msk.f32.gmra.mxu0 %vm377_vm1, %v350_v62 }
  0xeb   : > { %922 = vmatprep.mubr.f32.mxu0 %v7229_v1 }
  0xee   : > { %v4143_v3 = vpop.f32.mrf.mxu0  ;;  %3151 = vmatmul.mubr.msk.f32.gmra.mxu0 %vm377_vm1, %v351_v63 }
  0xef   : > { %928 = vmatprep.mubr.f32.mxu0 %v7229_v1 }
  0xf0   : > { %v4150_v7 = vpop.f32.mrf.mxu0 }
  0xf1   : > { %7578 = vst [vmem:[#allocation14_spill] sm:$0xff] %v4150_v7 }
  0xf2   : > { %v4152_v8 = vpop.f32.mrf.mxu0  ;;  %3152 = vmatmul.mubr.msk.f32.gmra.mxu0 %vm377_vm1, %v352_v5 }
  0xf3   : > { %7579 = vst [vmem:[#allocation15_spill] sm:$0xff] %v4152_v8  ;;  %934 = vmatprep.mubr.f32.mxu0 %v7229_v1 }
  0xf4   : > { %v4159_v11 = vpop.f32.mrf.mxu0 }
  0xf5   : > { %7580 = vst [vmem:[#allocation16_spill] sm:$0xff] %v4159_v11 }
  0xf6   : > { %v4161_v12 = vpop.f32.mrf.mxu0  ;;  %3153 = vmatmul.mubr.msk.f32.gmra.mxu0 %vm377_vm1, %v353_v10 }
  0xf7   : > { %7581 = vst [vmem:[#allocation17_spill] sm:$0xff] %v4161_v12  ;;  %940 = vmatprep.mubr.f32.mxu0 %v7229_v1 }
  0xf8   : > { %v4168_v14 = vpop.f32.mrf.mxu0 }
  0xf9   : > { %7582 = vst [vmem:[#allocation18_spill] sm:$0xff] %v4168_v14 }
  0xfa   : > { %v4170_v15 = vpop.f32.mrf.mxu0  ;;  %3154 = vmatmul.mubr.msk.f32.gmra.mxu0 %vm377_vm1, %v354_v13 }
  0xfb   : > { %7583 = vst [vmem:[#allocation19_spill] sm:$0xff] %v4170_v15  ;;  %946 = vmatprep.mubr.f32.mxu0 %v7229_v1 }
  0xfc   : > { %v4177_v17 = vpop.f32.mrf.mxu0 }
  0xfd   : > { %7584 = vst [vmem:[#allocation20_spill] sm:$0xff] %v4177_v17 }
  0xfe   : > { %v4179_v18 = vpop.f32.mrf.mxu0  ;;  %3155 = vmatmul.mubr.msk.f32.gmra.mxu0 %vm377_vm1, %v355_v16 }
  0xff   : > { %952 = vmatprep.mubr.f32.mxu0 %v7229_v1 }
 0x100   : > { %v4186_v20 = vpop.f32.mrf.mxu0 }
 0x101   : > { %7585 = vst [vmem:[#allocation21_spill] sm:$0xff] %v4186_v20 }
 0x102   : > { %v4188_v21 = vpop.f32.mrf.mxu0  ;;  %3156 = vmatmul.mubr.msk.f32.gmra.mxu0 %vm377_vm1, %v356_v19 }
 0x103   : > { %958 = vmatprep.mubr.f32.mxu0 %v7229_v1 }
 0x104   : > { %v4195_v23 = vpop.f32.mrf.mxu0 }
 0x105   : > { %7586 = vst [vmem:[#allocation22_spill] sm:$0xff] %v4195_v23 }
 0x106   : > { %v4197_v24 = vpop.f32.mrf.mxu0  ;;  %3157 = vmatmul.mubr.msk.f32.gmra.mxu0 %vm377_vm1, %v357_v22 }
 0x107   : > { %964 = vmatprep.mubr.f32.mxu0 %v7229_v1 }
 0x108   : > { %v4204_v26 = vpop.f32.mrf.mxu0 }
 0x109   : > { %7587 = vst [vmem:[#allocation23_spill] sm:$0xff] %v4204_v26 }
 0x10a   : > { %v4206_v27 = vpop.f32.mrf.mxu0  ;;  %3158 = vmatmul.mubr.msk.f32.gmra.mxu0 %vm377_vm1, %v358_v25 }
 0x10b   : > { %7588 = vst [vmem:[#allocation24_spill] sm:$0xff] %v4206_v27  ;;  %970 = vmatprep.mubr.f32.mxu0 %v7229_v1 }
 0x10c   : > { %v4213_v29 = vpop.f32.mrf.mxu0 }
 0x10d   : > { %7589 = vst [vmem:[#allocation25_spill] sm:$0xff] %v4213_v29 }
 0x10e   : > { %v4215_v30 = vpop.f32.mrf.mxu0  ;;  %3159 = vmatmul.mubr.msk.f32.gmra.mxu0 %vm377_vm1, %v359_v28 }
 0x10f   : > { %7590 = vst [vmem:[#allocation26_spill] sm:$0xff] %v4215_v30  ;;  %976 = vmatprep.mubr.f32.mxu0 %v7229_v1 }
 0x110   : > { %v4222_v32 = vpop.f32.mrf.mxu0 }
 0x111   : > { %7591 = vst [vmem:[#allocation27_spill] sm:$0xff] %v4222_v32 }
 0x112   : > { %v4224_v33 = vpop.f32.mrf.mxu0  ;;  %3160 = vmatmul.mubr.msk.f32.gmra.mxu0 %vm377_vm1, %v360_v31 }
 0x113   : > { %7592 = vst [vmem:[#allocation28_spill] sm:$0xff] %v4224_v33  ;;  %982 = vmatprep.mubr.f32.mxu0 %v7229_v1 }
 0x114   : > { %v4231_v35 = vpop.f32.mrf.mxu0 }
 0x115   : > { %7593 = vst [vmem:[#allocation29_spill] sm:$0xff] %v4231_v35 }
 0x116   : > { %v4233_v36 = vpop.f32.mrf.mxu0  ;;  %3161 = vmatmul.mubr.msk.f32.gmra.mxu0 %vm377_vm1, %v361_v34 }
 0x117   : > { %988 = vmatprep.mubr.f32.mxu0 %v7229_v1 }
 0x118   : > { %v4240_v38 = vpop.f32.mrf.mxu0 }
 0x119   : > { %7594 = vst [vmem:[#allocation30_spill] sm:$0xff] %v4240_v38 }
 0x11a   : > { %v4242_v39 = vpop.f32.mrf.mxu0  ;;  %3162 = vmatmul.mubr.msk.f32.gmra.mxu0 %vm377_vm1, %v362_v37 }
 0x11b   : > { %7595 = vst [vmem:[#allocation31_spill] sm:$0xff] %v4242_v39  ;;  %994 = vmatprep.mubr.f32.mxu0 %v7229_v1 }
 0x11c   : > { %v4249_v41 = vpop.f32.mrf.mxu0 }
 0x11d   : > { %7596 = vst [vmem:[#allocation32_spill] sm:$0xff] %v4249_v41 }
 0x11e   : > { %v4251_v42 = vpop.f32.mrf.mxu0  ;;  %3163 = vmatmul.mubr.msk.f32.gmra.mxu0 %vm377_vm1, %v363_v40 }
 0x11f   : > { %1000 = vmatprep.mubr.f32.mxu0 %v7229_v1 }
 0x120   : > { %v4258_v44 = vpop.f32.mrf.mxu0 }
 0x121   : > { %7597 = vst [vmem:[#allocation33_spill] sm:$0xff] %v4258_v44 }
 0x122   : > { %v4260_v45 = vpop.f32.mrf.mxu0  ;;  %3164 = vmatmul.mubr.msk.f32.gmra.mxu0 %vm377_vm1, %v364_v43 }
 0x123   : > { %7598 = vst [vmem:[#allocation34_spill] sm:$0xff] %v4260_v45  ;;  %1006 = vmatprep.mubr.f32.mxu0 %v7229_v1 }
 0x124   : > { %v4267_v47 = vpop.f32.mrf.mxu0 }
 0x125   : > { %7599 = vst [vmem:[#allocation35_spill] sm:$0xff] %v4267_v47 }
 0x126   : > { %v4269_v48 = vpop.f32.mrf.mxu0  ;;  %3165 = vmatmul.mubr.msk.f32.gmra.mxu0 %vm377_vm1, %v365_v46 }
 0x127   : > { %1012 = vmatprep.mubr.f32.mxu0 %v7229_v1 }
 0x128   : > { %v4276_v50 = vpop.f32.mrf.mxu0 }
 0x129   : > { %7600 = vst [vmem:[#allocation36_spill] sm:$0xff] %v4276_v50 }
 0x12a   : > { %v4278_v51 = vpop.f32.mrf.mxu0  ;;  %3166 = vmatmul.mubr.msk.f32.gmra.mxu0 %vm377_vm1, %v366_v49 }
 0x12b   : > { %3552 = vmatprep.mubr.msk.f32.mxu0 %vm7443_vm0, %v3777_v0 }
 0x12c   : > { %v4283_v52 = vpop.f32.mrf.mxu0 }
 0x12d   : > { %7601 = vst [vmem:[#allocation37_spill] sm:$0xff] %v4283_v52 }
 0x12e   : > { %v4285_v53 = vpop.f32.mrf.mxu0 }
 0x130   : > { %v4287_v54 = vpop.f32.mrf.mxu0 }
 0x131   : > { %7602 = vst [vmem:[#allocation38_spill] sm:$0xff] %v4287_v54 }
 0x132   : > { %v4289_v55 = vpop.f32.mrf.mxu0 }
 0x134   : > { %v4291_v56 = vpop.f32.mrf.mxu0 }
 0x135   : > { %7603 = vst [vmem:[#allocation39_spill] sm:$0xff] %v4291_v56 }
 0x136   : > { %v4293_v57 = vpop.f32.mrf.mxu0 }
 0x138   : > { %v4295_v58 = vpop.f32.mrf.mxu0 }
 0x139   : > { %7604 = vst [vmem:[#allocation40_spill] sm:$0xff] %v4295_v58 }
 0x13a   : > { %v4297_v59 = vpop.f32.mrf.mxu0 }
 0x13c   : > { %v4299_v60 = vpop.f32.mrf.mxu0 }
 0x13d   : > { %7605 = vst [vmem:[#allocation41_spill] sm:$0xff] %v4299_v60 }
 0x13e   : > { %v4301_v61 = vpop.f32.mrf.mxu0 }
 0x140   : > { %v4303_v0 = vpop.f32.mrf.mxu0 }
 0x141   : > { %7606 = vst [vmem:[#allocation42_spill] sm:$0xff] %v4303_v0 }
 0x142   : > { %v4305_v62 = vpop.f32.mrf.mxu0 }
 0x144   : > { %v4307_v63 = vpop.f32.mrf.mxu0 }
 0x145   : > { %7607 = vst [vmem:[#allocation43_spill] sm:$0xff] %v4307_v63 }
 0x146   : > { %v4309_v5 = vpop.f32.mrf.mxu0 }
 0x148   : > { %v4311_v10 = vpop.f32.mrf.mxu0 }
 0x149   : > { %7608 = vst [vmem:[#allocation44_spill] sm:$0xff] %v4311_v10 }
 0x14a   : > { %v4313_v13 = vpop.f32.mrf.mxu0 }
 0x14c   : > { %v4315_v16 = vpop.f32.mrf.mxu0 }
 0x14d   : > { %7609 = vst [vmem:[#allocation45_spill] sm:$0xff] %v4315_v16 }
 0x14e   : > { %v4317_v19 = vpop.f32.mrf.mxu0 }
 0x150   : > { %v4319_v22 = vpop.f32.mrf.mxu0 }
 0x151   : > { %7610 = vst [vmem:[#allocation46_spill] sm:$0xff] %v4319_v22 }
 0x152   : > { %v4321_v25 = vpop.f32.mrf.mxu0 }
 0x154   : > { %v4323_v28 = vpop.f32.mrf.mxu0 }
 0x155   : > { %7611 = vst [vmem:[#allocation47_spill] sm:$0xff] %v4323_v28 }
 0x156   : > { %v4325_v31 = vpop.f32.mrf.mxu0 }
 0x157   : > { %7612 = vst [vmem:[#allocation48_spill] sm:$0xff] %v4325_v31 }
 0x158   : > { %v4327_v34 = vpop.f32.mrf.mxu0 }
 0x159   : > { %7613 = vst [vmem:[#allocation49_spill] sm:$0xff] %v4327_v34 }
 0x15a   : > { %v4329_v37 = vpop.f32.mrf.mxu0 }
 0x15b   : > { %7614 = vst [vmem:[#allocation50_spill] sm:$0xff] %v4329_v37 }
 0x15c   : > { %v4331_v40 = vpop.f32.mrf.mxu0 }
 0x15d   : > { %7615 = vst [vmem:[#allocation51_spill] sm:$0xff] %v4331_v40 }
 0x15e   : > { %v4333_v43 = vpop.f32.mrf.mxu0 }
 0x15f   : > { %7616 = vst [vmem:[#allocation52_spill] sm:$0xff] %v4333_v43 }
 0x160   : > { %v4335_v46 = vpop.f32.mrf.mxu0 }
 0x161   : > { %7617 = vst [vmem:[#allocation53_spill] sm:$0xff] %v4335_v46 }
 0x162   : > { %v4337_v49 = vpop.f32.mrf.mxu0 }
 0x163   : > { %7618 = vst [vmem:[#allocation54_spill] sm:$0xff] %v4337_v49 }
 0x164   : > { %v4339_v1 = vpop.f32.mrf.mxu0 }
 0x165   : > { %7619 = vst [vmem:[#allocation55_spill] sm:$0xff] %v4339_v1 }
 0x166   : > { %v4341_v2 = vpop.f32.mrf.mxu0 }
 0x167   : > { %7620 = vst [vmem:[#allocation56_spill] sm:$0xff] %v4341_v2 }
 0x168   : > { %v4343_v4 = vpop.f32.mrf.mxu0 }
 0x169   : > { %7621 = vst [vmem:[#allocation57_spill] sm:$0xff] %v4343_v4 }
 0x16a   : > { %v4345_v6 = vpop.f32.mrf.mxu0 }
 0x16b   : > { %7622 = vst [vmem:[#allocation58_spill] sm:$0xff] %v4345_v6 }
 0x16c   : > { %v4347_v9 = vpop.f32.mrf.mxu0 }
 0x16d   : > { %7623 = vst [vmem:[#allocation59_spill] sm:$0xff] %v4347_v9 }
 0x16e   : > { %v4349_v34 = vpop.f32.mrf.mxu0 }
 0x16f   : > { %7624 = vst [vmem:[#allocation60_spill] sm:$0xff] %v4349_v34 }
 0x170   : > { %v4351_v22 = vpop.f32.mrf.mxu0 }
 0x171   : > { %7625 = vst [vmem:[#allocation61_spill] sm:$0xff] %v4351_v22 }
 0x172   : > { %v4353_v40 = vpop.f32.mrf.mxu0 }
 0x173   : > { %7626 = vst [vmem:[#allocation62_spill] sm:$0xff] %v4353_v40 }
 0x174   : > { %v4355_v28 = vpop.f32.mrf.mxu0 }
 0x175   : > { %7627 = vst [vmem:[#allocation63_spill] sm:$0xff] %v4355_v28 }
 0x176   : > { %v4357_v46 = vpop.f32.mrf.mxu0 }
 0x177   : > { %7628 = vst [vmem:[#allocation64_spill] sm:$0xff] %v4357_v46 }
 0x178   : > { %v4359_v10 = vpop.f32.mrf.mxu0 }
 0x179   : > { %7629 = vst [vmem:[#allocation65_spill] sm:$0xff] %v4359_v10 }
 0x17a   : > { %v4361_v1 = vpop.f32.mrf.mxu0 }
 0x17b   : > { %7630 = vst [vmem:[#allocation66_spill] sm:$0xff] %v4361_v1 }
 0x17c   : > { %v4363_v2 = vpop.f32.mrf.mxu0 }
 0x17d   : > { %7631 = vst [vmem:[#allocation67_spill] sm:$0xff] %v4363_v2 }
 0x17e   : > { %v4365_v4 = vpop.f32.mrf.mxu0 }
 0x17f   : > { %7632 = vst [vmem:[#allocation68_spill] sm:$0xff] %v4365_v4 }
 0x180   : > { %v4367_v6 = vpop.f32.mrf.mxu0 }
 0x181   : > { %7633 = vst [vmem:[#allocation69_spill] sm:$0xff] %v4367_v6 }
 0x182   : > { %v4369_v9 = vpop.f32.mrf.mxu0 }
 0x183   : > { %7634 = vst [vmem:[#allocation70_spill] sm:$0xff] %v4369_v9 }
 0x184   : > { %v4371_v34 = vpop.f32.mrf.mxu0 }
 0x185   : > { %7635 = vst [vmem:[#allocation71_spill] sm:$0xff] %v4371_v34 }
 0x186   : > { %v4373_v22 = vpop.f32.mrf.mxu0 }
 0x187   : > { %7636 = vst [vmem:[#allocation72_spill] sm:$0xff] %v4373_v22 }
 0x188   : > { %v4375_v40 = vpop.f32.mrf.mxu0 }
 0x189   : > { %7637 = vst [vmem:[#allocation73_spill] sm:$0xff] %v4375_v40 }
 0x18a   : > { %v4377_v28 = vpop.f32.mrf.mxu0 }
 0x18b   : > { %7638 = vst [vmem:[#allocation74_spill] sm:$0xff] %v4377_v28 }
 0x18c   : > { %v4379_v46 = vpop.f32.mrf.mxu0 }
 0x18d   : > { %7639 = vst [vmem:[#allocation75_spill] sm:$0xff] %v4379_v46 }
 0x18e   : > { %v4381_v10 = vpop.f32.mrf.mxu0 }
 0x18f   : > { %7640 = vst [vmem:[#allocation76_spill] sm:$0xff] %v4381_v10 }
 0x190   : > { %v4383_v1 = vpop.f32.mrf.mxu0 }
 0x191   : > { %7641 = vst [vmem:[#allocation77_spill] sm:$0xff] %v4383_v1 }
 0x192   : > { %v4385_v2 = vpop.f32.mrf.mxu0 }
 0x193   : > { %7642 = vst [vmem:[#allocation78_spill] sm:$0xff] %v4385_v2 }
 0x194   : > { %v4387_v4 = vpop.f32.mrf.mxu0 }
 0x195   : > { %7643 = vst [vmem:[#allocation79_spill] sm:$0xff] %v4387_v4 }
 0x196   : > { %v4389_v6 = vpop.f32.mrf.mxu0 }
 0x197   : > { %7644 = vst [vmem:[#allocation80_spill] sm:$0xff] %v4389_v6 }
 0x198   : > { %v4391_v9 = vpop.f32.mrf.mxu0 }
 0x199   : > { %7645 = vst [vmem:[#allocation81_spill] sm:$0xff] %v4391_v9 }
 0x19a   : > { %v4393_v34 = vpop.f32.mrf.mxu0 }
 0x19b   : > { %7646 = vst [vmem:[#allocation82_spill] sm:$0xff] %v4393_v34 }
 0x19c   : > { %v4395_v22 = vpop.f32.mrf.mxu0 }
 0x19d   : > { %7647 = vst [vmem:[#allocation83_spill] sm:$0xff] %v4395_v22 }
 0x19e   : > { %v4397_v40 = vpop.f32.mrf.mxu0 }
 0x19f   : > { %7648 = vst [vmem:[#allocation84_spill] sm:$0xff] %v4397_v40 }
 0x1a0   : > { %v4399_v28 = vpop.f32.mrf.mxu0 }
 0x1a1   : > { %7649 = vst [vmem:[#allocation85_spill] sm:$0xff] %v4399_v28 }
 0x1a2   : > { %v4401_v46 = vpop.f32.mrf.mxu0 }
 0x1a3   : > { %7650 = vst [vmem:[#allocation86_spill] sm:$0xff] %v4401_v46 }
 0x1a4   : > { %v4403_v10 = vpop.f32.mrf.mxu0 }
 0x1a5   : > { %7651 = vst [vmem:[#allocation87_spill] sm:$0xff] %v4403_v10  ;;  %v1085_v10 = vmin.f32 %v4152_v8, %v4170_v15  ;;  %v1157_v15 = vsel %vm7443_vm0, %v4177_v17, inf }
 0x1a6   : > { %v4405_v1 = vpop.f32.mrf.mxu0 }
 0x1a7   : > { %7652 = vst [vmem:[#allocation88_spill] sm:$0xff] %v4405_v1 }
 0x1a8   : > { %v4407_v2 = vpop.f32.mrf.mxu0 }
 0x1a9   : > { %7653 = vst [vmem:[#allocation89_spill] sm:$0xff] %v4407_v2 }
 0x1aa   : > { %v4409_v4 = vpop.f32.mrf.mxu0 }
 0x1ab   : > { %7654 = vst [vmem:[#allocation90_spill] sm:$0xff] %v4409_v4 }
 0x1ac   : > { %v4411_v6 = vpop.f32.mrf.mxu0 }
 0x1ad   : > { %7655 = vst [vmem:[#allocation91_spill] sm:$0xff] %v4411_v6  ;;  %v1084_v6 = vmin.f32 %v4143_v3, %v4161_v12 }
 0x1ae   : > { %v4413_v9 = vpop.f32.mrf.mxu0 }
 0x1af   : > { %7656 = vst [vmem:[#allocation92_spill] sm:$0xff] %v4413_v9  ;;  %v1087_v9 = vmin.f32 %v1085_v10, %v4188_v21 }
 0x1b0   : > { %v4415_v34 = vpop.f32.mrf.mxu0 }
 0x1b1   : > { %7657 = vst [vmem:[#allocation93_spill] sm:$0xff] %v4415_v34  ;;  %v1086_v34 = vmin.f32 %v1084_v6, %v4179_v18  ;;  %v1154_v6 = vsel %vm7443_vm0, %v4159_v11, inf  ;;  %v1165_v11 = vsel %vm7443_vm0, %v4213_v29, inf }
 0x1b2   : > { %v4417_v22 = vpop.f32.mrf.mxu0 }
 0x1b3   : > { %7658 = vst [vmem:[#allocation94_spill] sm:$0xff] %v4417_v22 }
 0x1b4   : > { %v4419_v40 = vpop.f32.mrf.mxu0 }
 0x1b5   : > { %7659 = vst [vmem:[#allocation95_spill] sm:$0xff] %v4419_v40  ;;  %v1089_v40 = vmin.f32 %v1087_v9, %v4206_v27  ;;  %v1155_v9 = vsel %vm7443_vm0, %v4168_v14, inf }
 0x1b6   : > { %v4421_v28 = vpop.f32.mrf.mxu0 }
 0x1b7   : > { %7660 = vst [vmem:[#allocation96_spill] sm:$0xff] %v4421_v28  ;;  %v1091_v28 = vmin.f32 %v1089_v40, %v4224_v33  ;;  %v1158_v40 = vmin.f32 %v1154_v6, %v1157_v15 }
 0x1b8   : > { %v4423_v46 = vpop.f32.mrf.mxu0 }
 0x1b9   : > { %7661 = vst [vmem:[#allocation97_spill] sm:$0xff] %v4423_v46  ;;  %v1088_v46 = vmin.f32 %v1086_v34, %v4197_v24  ;;  %v1093_v10 = vmin.f32 %v1091_v28, %v4242_v39  ;;  %v1161_v34 = vsel %vm7443_vm0, %v4195_v23, inf  ;;  %v1159_v28 = vsel %vm7443_vm0, %v4186_v20, inf }
 0x1ba   : > { %v4427_v2 = vpop.f32.mrf.mxu0  ;;  %v1162_v23 = vmin.f32 %v1158_v40, %v1161_v34 }
 0x1bb   : > { %7662 = vst [vmem:[#allocation98_spill] sm:$0xff] %v4427_v2  ;;  %v1090_v12 = vmin.f32 %v1088_v46, %v4215_v30  ;;  %v1095_v33 = vmin.f32 %v1093_v10, %v4260_v45  ;;  %v1153_v46 = vsel %vm7443_vm0, %v4150_v7, inf  ;;  %v1169_v10 = vsel %vm7443_vm0, %v4231_v35, inf }
 0x1bc   : > { %v4432_v1 = vpop.f32.mrf.mxu0  ;;  %v1156_v39 = vmin.f32 %v1153_v46, %v1155_v9  ;;  %v1166_v7 = vmin.f32 %v1162_v23, %v1165_v11  ;;  %v1167_v9 = vsel %vm7443_vm0, %v4222_v32, inf  ;;  %v1171_v11 = vsel %vm7443_vm0, %v4240_v38, inf  ;;  %v7685_v38 = vld [vmem:[#allocation60_spill] sm:$0xff]  ;;  %v7686_v32 = vld [vmem:[#allocation66_spill] sm:$0xff] }
 0x1bd   : > { %7663 = vst [vmem:[#allocation99_spill] sm:$0xff] %v4432_v1  ;;  %v1092_v17 = vmin.f32 %v1090_v12, %v4233_v36  ;;  %v1097_v15 = vmin.f32 %v1095_v33, %v4278_v51  ;;  %v1163_v12 = vsel %vm7443_vm0, %v4204_v26, inf  ;;  %v1177_v23 = vsel %vm7443_vm0, %v4267_v47, inf }
 0x1be   : > { %v4436_v22 = vpop.f32.mrf.mxu0  ;;  %v1160_v20 = vmin.f32 %v1156_v39, %v1159_v28  ;;  %v1170_v40 = vmin.f32 %v1166_v7, %v1169_v10  ;;  %v1175_v7 = vsel %vm7443_vm0, %v4258_v44, inf }
 0x1bf   : > { %7664 = vst [vmem:[#allocation100_spill] sm:$0xff] %v4436_v22  ;;  %v1094_v30 = vmin.f32 %v1092_v17, %v4251_v42  ;;  %v1099_v45 = vmin.f32 %v1097_v15, %v4289_v55  ;;  %v1173_v17 = vsel %vm7443_vm0, %v4249_v41, inf }
 0x1c0   : > { %v4442_v8 = vpop.f32.mrf.mxu0  ;;  %v1164_v34 = vmin.f32 %v1160_v20, %v1163_v12  ;;  %v1174_v28 = vmin.f32 %v1170_v40, %v1173_v17  ;;  %v1181_v20 = vsel %vm7443_vm0, %v4283_v52, inf }
 0x1c1   : > { %7665 = vst [vmem:[#allocation101_spill] sm:$0xff] %v4442_v8  ;;  %v1096_v29 = vmin.f32 %v1094_v30, %v4269_v48  ;;  %v1101_v35 = vmin.f32 %v1099_v45, %v4297_v59 }
 0x1c2   : > { %v4452_v27 = vpop.f32.mrf.mxu0  ;;  %v1168_v39 = vmin.f32 %v1164_v34, %v1167_v9  ;;  %v1178_v12 = vmin.f32 %v1174_v28, %v1177_v23  ;;  %v1179_v9 = vsel %vm7443_vm0, %v4276_v50, inf  ;;  %v7681_v50 = vld [vmem:[#allocation62_spill] sm:$0xff] }
 0x1c3   : > { %7666 = vst [vmem:[#allocation102_spill] sm:$0xff] %v4452_v27  ;;  %v1098_v46 = vmin.f32 %v1096_v29, %v4285_v53  ;;  %v1103_v41 = vmin.f32 %v1101_v35, %v4305_v62  ;;  %v1185_v35 = vsel %vm7443_vm0, %v4291_v56, inf }
 0x1c4   : > { %v4462_v14 = vpop.f32.mrf.mxu0  ;;  %v1172_v45 = vmin.f32 %v1168_v39, %v1171_v11  ;;  %v1182_v40 = vmin.f32 %v1178_v12, %v1181_v20  ;;  %v1183_v11 = vsel %vm7443_vm0, %v4287_v54, inf  ;;  %v7680_v54 = vld [vmem:[#allocation56_spill] sm:$0xff] }
 0x1c5   : > { %7667 = vst [vmem:[#allocation103_spill] sm:$0xff] %v4462_v14  ;;  %v1100_v15 = vmin.f32 %v1098_v46, %v4293_v57  ;;  %v1105_v47 = vmin.f32 %v1103_v41, %v4313_v13  ;;  %v1189_v41 = vsel %vm7443_vm0, %v4299_v60, inf }
 0x1c6   : > { %v4470_v6 = vpop.f32.mrf.mxu0  ;;  %v1176_v34 = vmin.f32 %v1172_v45, %v1175_v7  ;;  %v1186_v28 = vmin.f32 %v1182_v40, %v1185_v35  ;;  %v1187_v7 = vsel %vm7443_vm0, %v4295_v58, inf }
 0x1c7   : > { %7668 = vst [vmem:[#allocation104_spill] sm:$0xff] %v4470_v6  ;;  %v1102_v10 = vmin.f32 %v1100_v15, %v4301_v61  ;;  %v1107_v52 = vmin.f32 %v1105_v47, %v4321_v25  ;;  %v1193_v47 = vsel %vm7443_vm0, %v4307_v63, inf  ;;  %v7676_v63 = vld [vmem:[#allocation58_spill] sm:$0xff] }
 0x1c8   : > { %v4478_v33 = vpop.f32.mrf.mxu0  ;;  %v1180_v39 = vmin.f32 %v1176_v34, %v1179_v9  ;;  %v1190_v12 = vmin.f32 %v1186_v28, %v1189_v41  ;;  %v1191_v9 = vsel %vm7443_vm0, %v4303_v0, inf }
 0x1c9   : > { %7669 = vst [vmem:[#allocation105_spill] sm:$0xff] %v4478_v33  ;;  %v1104_v46 = vmin.f32 %v1102_v10, %v4309_v5  ;;  %v1109_v56 = vmin.f32 %v1107_v52, %v4329_v37  ;;  %v1197_v52 = vsel %vm7443_vm0, %v4315_v16, inf }
 0x1ca   : > { %v4486_v30 = vpop.f32.mrf.mxu0  ;;  %v1184_v45 = vmin.f32 %v1180_v39, %v1183_v11  ;;  %v1194_v40 = vmin.f32 %v1190_v12, %v1193_v47  ;;  %v7677_v11 = vld [vmem:[#allocation44_spill] sm:$0xff]  ;;  %v7678_v39 = vld [vmem:[#allocation47_spill] sm:$0xff] }
 0x1cb   : > { %7670 = vst [vmem:[#allocation106_spill] sm:$0xff] %v4486_v30  ;;  %v1106_v15 = vmin.f32 %v1104_v46, %v4317_v19  ;;  %v1111_v60 = vmin.f32 %v1109_v56, %v4337_v49  ;;  %v1195_v41 = vsel %vm7443_vm0, %v7677_v11, inf  ;;  %v1201_v56 = vsel %vm7443_vm0, %v7678_v39, inf }
 0x1cc   : > { %v4494_v29 = vpop.f32.mrf.mxu0  ;;  %v1188_v34 = vmin.f32 %v1184_v45, %v1187_v7  ;;  %v1198_v0 = vmin.f32 %v1194_v40, %v1197_v52  ;;  %v7682_v7 = vld [vmem:[#allocation46_spill] sm:$0xff]  ;;  %v7683_v45 = vld [vmem:[#allocation51_spill] sm:$0xff] }
 0x1cd   : > { %7671 = vst [vmem:[#allocation107_spill] sm:$0xff] %v4494_v29  ;;  %v1108_v10 = vmin.f32 %v1106_v15, %v4325_v31  ;;  %v1113_v58 = vmin.f32 %v1111_v60, %v7676_v63  ;;  %v1199_v47 = vsel %vm7443_vm0, %v7682_v7, inf  ;;  %v1205_v60 = vsel %vm7443_vm0, %v7683_v45, inf  ;;  %v7691_v63 = vld [vmem:[#allocation70_spill] sm:$0xff] }
 0x1ce   : > { %v4502_v17 = vpop.f32.mrf.mxu0  ;;  %v1192_v15 = vmin.f32 %v1188_v34, %v1191_v9  ;;  %v1202_v11 = vmin.f32 %v1198_v0, %v1201_v56  ;;  %v7687_v9 = vld [vmem:[#allocation49_spill] sm:$0xff]  ;;  %v7688_v34 = vld [vmem:[#allocation55_spill] sm:$0xff] }
 0x1cf   : > { %7672 = vst [vmem:[#allocation108_spill] sm:$0xff] %v4502_v17  ;;  %v1110_v46 = vmin.f32 %v1108_v10, %v4333_v43  ;;  %v1115_v44 = vmin.f32 %v1113_v58, %v7681_v50  ;;  %v1203_v52 = vsel %vm7443_vm0, %v7687_v9, inf  ;;  %v1209_v58 = vsel %vm7443_vm0, %v7688_v34, inf  ;;  %v7690_v50 = vld [vmem:[#allocation64_spill] sm:$0xff] }
 0x1d0   : > { %v4510_v23 = vpop.f32.mrf.mxu0  ;;  %v1196_v10 = vmin.f32 %v1192_v15, %v1195_v41  ;;  %v1206_v7 = vmin.f32 %v1202_v11, %v1205_v60  ;;  %v7692_v41 = vld [vmem:[#allocation53_spill] sm:$0xff] }
 0x1d1   : > { %7673 = vst [vmem:[#allocation109_spill] sm:$0xff] %v4510_v23  ;;  %v1112_v16 = vmin.f32 %v1110_v46, %v7680_v54  ;;  %v1117_v26 = vmin.f32 %v1115_v44, %v7686_v32  ;;  %v1207_v0 = vsel %vm7443_vm0, %v7692_v41, inf  ;;  %v7695_v32 = vld [vmem:[#allocation68_spill] sm:$0xff] }
 0x1d2   : > { %v4518_v20 = vpop.f32.mrf.mxu0  ;;  %v1200_v46 = vmin.f32 %v1196_v10, %v1199_v47  ;;  %v1210_v9 = vmin.f32 %v1206_v7, %v1209_v58  ;;  %v7697_v47 = vld [vmem:[#allocation57_spill] sm:$0xff] }
 0x1d3   : > { %7674 = vst [vmem:[#allocation110_spill] sm:$0xff] %v4518_v20  ;;  %v1114_v39 = vmin.f32 %v1112_v16, %v7685_v38  ;;  %v1119_v54 = vmin.f32 %v1117_v26, %v7691_v63  ;;  %v7693_v16 = vld [vmem:[#allocation59_spill] sm:$0xff]  ;;  %v7696_v38 = vld [vmem:[#allocation74_spill] sm:$0xff]  ;;  %v1211_v11 = vsel %vm7443_vm0, %v7697_v47, inf  ;;  %v7700_v63 = vld [vmem:[#allocation72_spill] sm:$0xff] }
 0x1d4   : > { %v4526_v35 = vpop.f32.mrf.mxu0  ;;  %v1213_v44 = vsel %vm7443_vm0, %v7693_v16, inf  ;;  %v1204_v15 = vmin.f32 %v1200_v46, %v1203_v52  ;;  %v7702_v52 = vld [vmem:[#allocation61_spill] sm:$0xff] }
 0x1d5   : > { %7675 = vst [vmem:[#allocation111_spill] sm:$0xff] %v4526_v35  ;;  %v1116_v45 = vmin.f32 %v1114_v39, %v7690_v50  ;;  %v1121_v49 = vmin.f32 %v1119_v54, %v7696_v38  ;;  %v7698_v39 = vld [vmem:[#allocation63_spill] sm:$0xff]  ;;  %v1214_v41 = vmin.f32 %v1210_v9, %v1213_v44  ;;  %v7701_v50 = vld [vmem:[#allocation78_spill] sm:$0xff]  ;;  %v1215_v7 = vsel %vm7443_vm0, %v7702_v52, inf  ;;  %v7705_v38 = vld [vmem:[#allocation76_spill] sm:$0xff] }
 0x1d6   : > { %v4534_v28 = vpop.f32.mrf.mxu0  ;;  %v1217_v26 = vsel %vm7443_vm0, %v7698_v39, inf  ;;  %v1208_v10 = vmin.f32 %v1204_v15, %v1207_v0  ;;  %v7707_v0 = vld [vmem:[#allocation65_spill] sm:$0xff] }
 0x1d7   : > { %7679 = vst [vmem:[#allocation112_spill] sm:$0xff] %v4534_v28  ;;  %v1118_v34 = vmin.f32 %v1116_v45, %v7695_v32  ;;  %v1123_v43 = vmin.f32 %v1121_v49, %v7701_v50  ;;  %v7703_v45 = vld [vmem:[#allocation67_spill] sm:$0xff]  ;;  %v1218_v47 = vmin.f32 %v1214_v41, %v1217_v26  ;;  %v7706_v32 = vld [vmem:[#allocation82_spill] sm:$0xff]  ;;  %v1219_v9 = vsel %vm7443_vm0, %v7707_v0, inf  ;;  %v7710_v50 = vld [vmem:[#allocation80_spill] sm:$0xff] }
 0x1d8   : > { %v4542_v12 = vpop.f32.mrf.mxu0  ;;  %v1221_v54 = vsel %vm7443_vm0, %v7703_v45, inf  ;;  %v1212_v46 = vmin.f32 %v1208_v10, %v1211_v11  ;;  %v7712_v11 = vld [vmem:[#allocation69_spill] sm:$0xff]  ;;  %v7714_v0 = vld [vmem:[#allocation84_spill] sm:$0xff] }
 0x1d9   : > { %7684 = vst [vmem:[#allocation113_spill] sm:$0xff] %v4542_v12  ;;  %v1120_v16 = vmin.f32 %v1118_v34, %v7700_v63  ;;  %v1125_v37 = vmin.f32 %v1123_v43, %v7706_v32  ;;  %v7708_v34 = vld [vmem:[#allocation71_spill] sm:$0xff]  ;;  %v1222_v52 = vmin.f32 %v1218_v47, %v1221_v54  ;;  %v7711_v63 = vld [vmem:[#allocation86_spill] sm:$0xff]  ;;  %v1223_v41 = vsel %vm7443_vm0, %v7712_v11, inf  ;;  %v7718_v11 = vld [vmem:[#allocation88_spill] sm:$0xff] }
 0x1da   : > { %v4550_v40 = vpop.f32.mrf.mxu0  ;;  %v1225_v49 = vsel %vm7443_vm0, %v7708_v34, inf  ;;  %v1216_v15 = vmin.f32 %v1212_v46, %v1215_v7  ;;  %v7716_v47 = vld [vmem:[#allocation79_spill] sm:$0xff] }
 0x1db   : > { %7689 = vst [vmem:[#allocation114_spill] sm:$0xff] %v4550_v40  ;;  %v1122_v39 = vmin.f32 %v1120_v16, %v7705_v38  ;;  %v1127_v31 = vmin.f32 %v1125_v37, %v7711_v63  ;;  %v7713_v16 = vld [vmem:[#allocation75_spill] sm:$0xff]  ;;  %v1226_v10 = vmin.f32 %v1222_v52, %v1225_v49  ;;  %v7715_v38 = vld [vmem:[#allocation73_spill] sm:$0xff] }
 0x1dc   : > { %v4558_v56 = vpop.f32.mrf.mxu0  ;;  %v1229_v43 = vsel %vm7443_vm0, %v7713_v16, inf  ;;  %v1220_v26 = vmin.f32 %v1216_v15, %v1219_v9  ;;  %v1227_v7 = vsel %vm7443_vm0, %v7715_v38, inf  ;;  %v7720_v9 = vld [vmem:[#allocation77_spill] sm:$0xff]  ;;  %v7722_v38 = vld [vmem:[#allocation92_spill] sm:$0xff] }
 0x1dd   : > { %7694 = vst [vmem:[#allocation115_spill] sm:$0xff] %v4558_v56  ;;  %v1124_v45 = vmin.f32 %v1122_v39, %v7710_v50  ;;  %v1129_v34 = vmin.f32 %v1127_v31, %v4409_v4  ;;  %v1233_v39 = vsel %vm7443_vm0, %v7716_v47, inf  ;;  %v1230_v46 = vmin.f32 %v1226_v10, %v1229_v43  ;;  %v7719_v50 = vld [vmem:[#allocation94_spill] sm:$0xff]  ;;  %v7724_v43 = vld [vmem:[#allocation87_spill] sm:$0xff] }
 0x1de   : > { %v4566_v60 = vpop.f32.mrf.mxu0  ;;  %v1224_v37 = vmin.f32 %v1220_v26, %v1223_v41  ;;  %v1231_v52 = vsel %vm7443_vm0, %v7720_v9, inf  ;;  %v7726_v9 = vld [vmem:[#allocation96_spill] sm:$0xff] }
 0x1df   : > { %7699 = vst [vmem:[#allocation116_spill] sm:$0xff] %v4566_v60  ;;  %v1126_v32 = vmin.f32 %v1124_v45, %v7714_v0  ;;  %v1131_v16 = vmin.f32 %v1129_v34, %v7719_v50  ;;  %v7721_v45 = vld [vmem:[#allocation83_spill] sm:$0xff]  ;;  %v1234_v15 = vmin.f32 %v1230_v46, %v1233_v39  ;;  %v7723_v0 = vld [vmem:[#allocation81_spill] sm:$0xff] }
 0x1e0   : > { %v4574_v58 = vpop.f32.mrf.mxu0  ;;  %v1237_v31 = vsel %vm7443_vm0, %v7721_v45, inf  ;;  %v1228_v49 = vmin.f32 %v1224_v37, %v1227_v7  ;;  %v1235_v41 = vsel %vm7443_vm0, %v7723_v0, inf  ;;  %v7727_v7 = vld [vmem:[#allocation85_spill] sm:$0xff] }
 0x1e1   : > { %7704 = vst [vmem:[#allocation117_spill] sm:$0xff] %v4574_v58  ;;  %v1128_v63 = vmin.f32 %v1126_v32, %v7718_v11  ;;  %v1133_v47 = vmin.f32 %v1131_v16, %v4427_v2  ;;  %v1241_v32 = vsel %vm7443_vm0, %v7724_v43, inf  ;;  %v1238_v10 = vmin.f32 %v1234_v15, %v1237_v31  ;;  %v7729_v2 = vld [vmem:[#allocation89_spill] sm:$0xff]  ;;  %v7730_v31 = vld [vmem:[#allocation95_spill] sm:$0xff] }
 0x1e2   : > { %v4582_v44 = vpop.f32.mrf.mxu0  ;;  %v1232_v34 = vmin.f32 %v1228_v49, %v1231_v52  ;;  %v1239_v39 = vsel %vm7443_vm0, %v7727_v7, inf  ;;  %v1243_v52 = vsel %vm7443_vm0, %v7729_v2, inf  ;;  %v7733_v2 = vld [vmem:[#allocation97_spill] sm:$0xff] }
 0x1e3   : > { %7709 = vst [vmem:[#allocation118_spill] sm:$0xff] %v4582_v44  ;;  %v1130_v4 = vmin.f32 %v1128_v63, %v7722_v38  ;;  %v1135_v45 = vmin.f32 %v1133_v47, %v4452_v27  ;;  %v7728_v63 = vld [vmem:[#allocation91_spill] sm:$0xff]  ;;  %v1242_v46 = vmin.f32 %v1238_v10, %v1241_v32 }
 0x1e4   : > { %v4596_v54 = vpop.f32.mrf.mxu0  ;;  %v1245_v16 = vsel %vm7443_vm0, %v7728_v63, inf  ;;  %v1236_v37 = vmin.f32 %v1232_v34, %v1235_v41  ;;  %v7732_v41 = vld [vmem:[#allocation93_spill] sm:$0xff] }
 0x1e5   : > { %7717 = vst [vmem:[#allocation119_spill] sm:$0xff] %v4596_v54  ;;  %v1132_v50 = vmin.f32 %v1130_v4, %v7726_v9  ;;  %v1137_v43 = vmin.f32 %v1135_v45, %v4486_v30  ;;  %v1249_v4 = vsel %vm7443_vm0, %v7730_v31, inf  ;;  %v1246_v15 = vmin.f32 %v1242_v46, %v1245_v16 }
 0x1e6   : > { %v4610_v26 = vpop.f32.mrf.mxu0  ;;  %v1240_v47 = vmin.f32 %v1236_v37, %v1239_v39  ;;  %v1247_v32 = vsel %vm7443_vm0, %v7732_v41, inf  ;;  %v1251_v39 = vsel %vm7443_vm0, %v7733_v2, inf }
 0x1e7   : > { %7725 = vst [vmem:[#allocation120_spill] sm:$0xff] %v4610_v26  ;;  %v1134_v0 = vmin.f32 %v1132_v50, %v4436_v22  ;;  %v1139_v63 = vmin.f32 %v1137_v43, %v4518_v20  ;;  %v1253_v50 = vsel %vm7443_vm0, %v4432_v1, inf  ;;  %v1250_v34 = vmin.f32 %v1246_v15, %v1249_v4 }
 0x1e8   : > { %v4624_v49 = vpop.f32.mrf.mxu0  ;;  %v1244_v45 = vmin.f32 %v1240_v47, %v1243_v52  ;;  %v1255_v52 = vsel %vm7443_vm0, %v4442_v8, inf }
 0x1e9   : > { %7731 = vst [vmem:[#allocation121_spill] sm:$0xff] %v4624_v49  ;;  %v1136_v7 = vmin.f32 %v1134_v0, %v4470_v6  ;;  %v1141_v31 = vmin.f32 %v1139_v63, %v4550_v40  ;;  %v1257_v0 = vsel %vm7443_vm0, %v4462_v14, inf  ;;  %v1254_v37 = vmin.f32 %v1250_v34, %v1253_v50 }
 0x1ea   : > { %v4638_v16 = vpop.f32.mrf.mxu0  ;;  %v1248_v43 = vmin.f32 %v1244_v45, %v1247_v32  ;;  %v1259_v32 = vsel %vm7443_vm0, %v4478_v33, inf  ;;  %v1265_v50 = vsel %vm7443_vm0, %v4526_v35, inf }
 0x1eb   : > { %v1138_v10 = vmin.f32 %v1136_v7, %v4502_v17  ;;  %7734 = vst [vmem:[#allocation122_spill] sm:$0xff] %v4638_v16  ;;  %v1143_v1 = vmin.f32 %v1141_v31, %v4582_v44  ;;  %v1261_v7 = vsel %vm7443_vm0, %v4494_v29, inf  ;;  %v1258_v4 = vmin.f32 %v1254_v37, %v1257_v0 }
 0x1ec   : > { %v1252_v63 = vmin.f32 %v1248_v43, %v1251_v39  ;;  %v1269_v39 = vsel %vm7443_vm0, %v4558_v56, inf }
 0x1ed   : > { %v1140_v46 = vmin.f32 %v1138_v10, %v4534_v28  ;;  %v1145_v15 = vmin.f32 %v1143_v1, %v4638_v16  ;;  %v1262_v31 = vmin.f32 %v1258_v4, %v1261_v7  ;;  %v1263_v10 = vsel %vm7443_vm0, %v4510_v23, inf  ;;  %v4657_v1 = vpop.f32.mrf.mxu0 }
 0x1ee   : > { %v1256_v45 = vmin.f32 %v1252_v63, %v1255_v52  ;;  %7735 = vst [vmem:[#allocation123_spill] sm:$0xff] %v4657_v1  ;;  %v1273_v52 = vsel %vm7443_vm0, %v4596_v54, inf  ;;  %v7362_v4 = vlaneseq  ;;  %v1277_v56 = vsel %vm7443_vm0, %v4657_v1, inf }
 0x1ef   : > { %v1142_v47 = vmin.f32 %v1140_v46, %v4566_v60  ;;  %v1266_v43 = vmin.f32 %v1262_v31, %v1265_v50  ;;  %v1267_v46 = vsel %vm7443_vm0, %v4542_v12, inf }
 0x1f0   : > { %v1260_v0 = vmin.f32 %v1256_v45, %v1259_v32  ;;  %v1275_v45 = vsel %vm7443_vm0, %v4624_v49, inf  ;;  %v4670_v12 = vshrl.u32 %v7362_v4, 7 }
 0x1f1   : > { %v1144_v34 = vmin.f32 %v1142_v47, %v4610_v26  ;;  %v1270_v63 = vmin.f32 %v1266_v43, %v1269_v39  ;;  %v1271_v47 = vsel %vm7443_vm0, %v4574_v58, inf }
 0x1f2   : > { %v1264_v7 = vmin.f32 %v1260_v0, %v1263_v10  ;;  %7736 = vst [vmem:[#allocation124_spill] sm:$0xff] %v4670_v12  ;;  %v4673_v43 = vadd.s32 8, %v4670_v12  ;;  %v4676_v54 = vadd.s32 16, %v4670_v12  ;;  %v4715_v4 = vadd.s32 120, %v4670_v12 }
 0x1f3   : > { %v1146_v37 = vmin.f32 %v1144_v34, %v1145_v15  ;;  %v1274_v50 = vmin.f32 %v1270_v63, %v1273_v52  ;;  %v4682_v52 = vadd.s32 32, %v4670_v12  ;;  %v4688_v63 = vadd.s32 48, %v4670_v12 }
 0x1f4   : > { %v1268_v32 = vmin.f32 %v1264_v7, %v1267_v46  ;;  %7737 = vst [vmem:[#allocation125_spill] sm:$0xff] %v4673_v43  ;;  %7738 = vst [vmem:[#allocation126_spill] sm:$0xff] %v4676_v54  ;;  %v4679_v46 = vadd.s32 24, %v4670_v12  ;;  %v4718_v1 = vadd.s32 128, %v4670_v12  ;;  %v4721_v49 = vadd.s32 136, %v4670_v12 }
 0x1f5   : > { %v1147_v15 = vrot.slane %v1146_v37, 4  ;;  %v1278_v34 = vmin.f32 %v1274_v50, %v1277_v56  ;;  %7740 = vst [vmem:[#allocation128_spill] sm:$0xff] %v4682_v52  ;;  %v4685_v56 = vadd.s32 40, %v4670_v12  ;;  %7742 = vst [vmem:[#allocation130_spill] sm:$0xff] %v4688_v63  ;;  %v4700_v50 = vadd.s32 80, %v4670_v12 }
 0x1f6   : > { %v1272_v31 = vmin.f32 %v1268_v32, %v1271_v47  ;;  %7739 = vst [vmem:[#allocation127_spill] sm:$0xff] %v4679_v46  ;;  %v4694_v47 = vadd.s32 64, %v4670_v12  ;;  %v4697_v32 = vadd.s32 72, %v4670_v12  ;;  %7743 = vst [vmem:[#allocation131_spill] sm:$0xff] %v4718_v1  ;;  %v4724_v58 = vadd.s32 144, %v4670_v12 }
 0x1f7   : > { %v1148_v39 = vmin.f32 %v1146_v37, %v1147_v15  ;;  %7741 = vst [vmem:[#allocation129_spill] sm:$0xff] %v4685_v56  ;;  %v4691_v37 = vadd.s32 56, %v4670_v12  ;;  %v4703_v15 = vadd.s32 88, %v4670_v12  ;;  %7744 = vst [vmem:[#allocation132_spill] sm:$0xff] %v4721_v49  ;;  %v4727_v35 = vadd.s32 152, %v4670_v12 }
 0x1f8   : > { %v1276_v10 = vmin.f32 %v1272_v31, %v1275_v45  ;;  %v4706_v45 = vadd.s32 96, %v4670_v12  ;;  %7745 = vst [vmem:[#allocation133_spill] sm:$0xff] %v4724_v58  ;;  %v4730_v29 = vadd.s32 160, %v4670_v12  ;;  %v4733_v33 = vadd.s32 168, %v4670_v12 }
 0x1f9   : > { %v1149_v7 = vrot.slane %v1148_v39, 2  ;;  %7746 = vst [vmem:[#allocation134_spill] sm:$0xff] %v4727_v35  ;;  %v4736_v14 = vadd.s32 176, %v4670_v12  ;;  %v4739_v8 = vadd.s32 184, %v4670_v12  ;;  %v4742_v2 = vadd.s32 192, %v4670_v12 }
 0x1fa   : > { %v1279_v0 = vmin.f32 %v1276_v10, %v1278_v34  ;;  %v4709_v34 = vadd.s32 104, %v4670_v12  ;;  %v4712_v10 = vadd.s32 112, %v4670_v12  ;;  %7747 = vst [vmem:[#allocation135_spill] sm:$0xff] %v4730_v29  ;;  %7748 = vst [vmem:[#allocation136_spill] sm:$0xff] %v4733_v33  ;;  %v4745_v41 = vadd.s32 200, %v4670_v12 }
 0x1fb   : > { %v1150_v23 = vmin.f32 %v1148_v39, %v1149_v7  ;;  %7749 = vst [vmem:[#allocation137_spill] sm:$0xff] %v4736_v14  ;;  %7750 = vst [vmem:[#allocation138_spill] sm:$0xff] %v4739_v8  ;;  %v4748_v39 = vadd.s32 208, %v4670_v12  ;;  %v4751_v16 = vadd.s32 216, %v4670_v12  ;;  %v4754_v26 = vadd.s32 224, %v4670_v12 }
 0x1fc   : > { %v1280_v31 = vrot.slane %v1279_v0, 4  ;;  %7751 = vst [vmem:[#allocation139_spill] sm:$0xff] %v4742_v2  ;;  %v4757_v44 = vadd.s32 232, %v4670_v12  ;;  %v4760_v60 = vadd.s32 240, %v4670_v12  ;;  %v4763_v40 = vadd.s32 248, %v4670_v12 }
 0x1fd   : > { %v4766_v28 = vadd.s32 256, %v4670_v12  ;;  %v4772_v20 = vadd.s32 272, %v4670_v12  ;;  %v4775_v17 = vadd.s32 280, %v4670_v12  ;;  %v4778_v30 = vadd.s32 288, %v4670_v12 }
 0x1fe   : > { %v1281_v7 = vmin.f32 %v1279_v0, %v1280_v31  ;;  %v4769_v0 = vadd.s32 264, %v4670_v12  ;;  %v1151_v31 = vrot.slane %v1150_v23, 1  ;;  %v4781_v6 = vadd.s32 296, %v4670_v12 }
 0x1ff   : > { %7752 = vst [vmem:[#allocation140_spill] sm:$0xff] %v4766_v28  ;;  %7754 = vst [vmem:[#allocation142_spill] sm:$0xff] %v4772_v20  ;;  %v4784_v27 = vadd.s32 304, %v4670_v12  ;;  %v4787_v22 = vadd.s32 312, %v4670_v12  ;;  %v4790_v9 = vadd.s32 320, %v4670_v12  ;;  %v4793_v11 = vadd.s32 328, %v4670_v12 }
 0x200   : > { %7753 = vst [vmem:[#allocation141_spill] sm:$0xff] %v4769_v0  ;;  %7755 = vst [vmem:[#allocation143_spill] sm:$0xff] %v4775_v17  ;;  %v1282_v38 = vrot.slane %v1281_v7, 2  ;;  %v4796_v17 = vadd.s32 336, %v4670_v12  ;;  %v4813_v20 = vmin.f32 %v1150_v23, %v1151_v31  ;;  %v4834_v23 = vadd.s32 432, %v4670_v12 }
 0x201   : > { %7756 = vst [vmem:[#allocation144_spill] sm:$0xff] %v4778_v30  ;;  %7757 = vst [vmem:[#allocation145_spill] sm:$0xff] %v4781_v6  ;;  %v4799_v30 = vadd.s32 344, %v4670_v12  ;;  %v4802_v6 = vadd.s32 352, %v4670_v12 }
 0x202   : > { %7758 = vst [vmem:[#allocation146_spill] sm:$0xff] %v4784_v27  ;;  %7759 = vst [vmem:[#allocation147_spill] sm:$0xff] %v4787_v22  ;;  %v4805_v27 = vadd.s32 360, %v4670_v12  ;;  %v4808_v22 = vadd.s32 368, %v4670_v12  ;;  %v4836_v31 = vmin.f32 %v1281_v7, %v1282_v38  ;;  %vm1286_vm2 = vcmp.le.f32.partialorder %v4143_v3, %v4813_v20  ;;  %v7780_v38 = vld [vmem:[#allocation17_spill] sm:$0xff]  ;;  %v7781_v7 = vld [vmem:[#allocation19_spill] sm:$0xff] }
 0x203   : > { %7760 = vst [vmem:[#allocation148_spill] sm:$0xff] %v4790_v9  ;;  %7761 = vst [vmem:[#allocation149_spill] sm:$0xff] %v4793_v11  ;;  %v4811_v9 = vadd.s32 376, %v4670_v12  ;;  %v4816_v11 = vadd.s32 384, %v4670_v12  ;;  %vm1290_vm4 = vcmp.le.f32.partialorder %v7780_v38, %v4813_v20  ;;  %vm1292_vm5 = vcmp.le.f32.partialorder %v7781_v7, %v4813_v20  ;;  %v7790_v38 = vld [vmem:[#allocation31_spill] sm:$0xff] }
 0x204   : > { %7762 = vst [vmem:[#allocation150_spill] sm:$0xff] %v4796_v17  ;;  %7763 = vst [vmem:[#allocation151_spill] sm:$0xff] %v4799_v30  ;;  %v4819_v17 = vadd.s32 392, %v4670_v12  ;;  %v4822_v30 = vadd.s32 400, %v4670_v12  ;;  %v4868_v3 = vadd.s32 496, %v4670_v12  ;;  %vm1294_vm6 = vcmp.le.f32.partialorder %v4179_v18, %v4813_v20 }
 0x205   : > { %7764 = vst [vmem:[#allocation152_spill] sm:$0xff] %v4802_v6  ;;  %7765 = vst [vmem:[#allocation153_spill] sm:$0xff] %v4805_v27  ;;  %v4825_v6 = vadd.s32 408, %v4670_v12  ;;  %v4828_v27 = vadd.s32 416, %v4670_v12  ;;  %vm1296_vm7 = vcmp.le.f32.partialorder %v4188_v21, %v4813_v20  ;;  %v1414_v7 = vsel %vm1286_vm2, %v4670_v12, 512 }
 0x206   : > { %7766 = vst [vmem:[#allocation154_spill] sm:$0xff] %v4808_v22  ;;  %7767 = vst [vmem:[#allocation155_spill] sm:$0xff] %v4816_v11  ;;  %v4831_v22 = vadd.s32 424, %v4670_v12  ;;  %v4839_v11 = vadd.s32 440, %v4670_v12  ;;  %vm1298_vm8 = vcmp.le.f32.partialorder %v4197_v24, %v4813_v20  ;;  %vm1306_vm12 = vcmp.le.f32.partialorder %v4233_v36, %v4813_v20 }
 0x207   : > { %7768 = vst [vmem:[#allocation156_spill] sm:$0xff] %v4819_v17  ;;  %7769 = vst [vmem:[#allocation157_spill] sm:$0xff] %v4822_v30  ;;  %v4842_v17 = vadd.s32 448, %v4670_v12  ;;  %v4845_v30 = vadd.s32 456, %v4670_v12  ;;  %vm1308_vm13 = vcmp.le.f32.partialorder %v7790_v38, %v4813_v20  ;;  %vm1310_vm14 = vcmp.le.f32.partialorder %v4251_v42, %v4813_v20 }
 0x208   : > { %7770 = vst [vmem:[#allocation158_spill] sm:$0xff] %v4825_v6  ;;  %7771 = vst [vmem:[#allocation159_spill] sm:$0xff] %v4828_v27  ;;  %v4848_v6 = vadd.s32 464, %v4670_v12  ;;  %vm1320_vm0 = vcmp.le.f32.partialorder %v4289_v55, %v4813_v20  ;;  %v1426_v18 = vsel %vm1298_vm8, %v4688_v63, 512  ;;  %vm1326_vm8 = vcmp.le.f32.partialorder %v4301_v61, %v4813_v20 }
 0x209   : > { %7772 = vst [vmem:[#allocation160_spill] sm:$0xff] %v4831_v22  ;;  %7773 = vst [vmem:[#allocation161_spill] sm:$0xff] %v4834_v23  ;;  %v7779_v22 = vld [vmem:[#allocation15_spill] sm:$0xff]  ;;  %v1438_v36 = vsel %vm1310_vm14, %v4706_v45, 512  ;;  %vm7793_vm14 = vcmp.le.f32.partialorder %v4278_v51, %v4813_v20  ;;  %v1448_v51 = vsel %vm1320_vm0, %v4721_v49, 512 }
 0x20a   : > { %7774 = vst [vmem:[#allocation162_spill] sm:$0xff] %v4836_v31  ;;  %7775 = vst [vmem:[#allocation163_spill] sm:$0xff] %v4839_v11  ;;  %vm1288_vm3 = vcmp.le.f32.partialorder %v7779_v22, %v4813_v20  ;;  %v4871_v22 = vadd.s32 504, %v4670_v12  ;;  %v7789_v11 = vld [vmem:[#allocation28_spill] sm:$0xff] }
 0x20b   : > { %7776 = vst [vmem:[#allocation164_spill] sm:$0xff] %v4842_v17  ;;  %7777 = vst [vmem:[#allocation165_spill] sm:$0xff] %v4845_v30  ;;  %v4859_v17 = vadd.s32 472, %v4670_v12  ;;  %v4862_v30 = vadd.s32 480, %v4670_v12  ;;  %vm1304_vm11 = vcmp.le.f32.partialorder %v7789_v11, %v4813_v20  ;;  %v1436_v11 = vsel %vm1308_vm13, %v4703_v15, 512 }
 0x20c   : > { %7778 = vst [vmem:[#allocation166_spill] sm:$0xff] %v4848_v6  ;;  %v4865_v6 = vadd.s32 488, %v4670_v12  ;;  %7785 = vst [vmem:[#allocation167_spill] sm:$0xff] %v4868_v3  ;;  %v7788_v3 = vld [vmem:[#allocation26_spill] sm:$0xff] }
 0x20d   : > { %7782 = vst [vmem:[#allocation15_spill] sm:$0xff] %v4859_v17  ;;  %7783 = vst [vmem:[#allocation17_spill] sm:$0xff] %v4862_v30  ;;  %v1416_v30 = vsel %vm1288_vm3, %v4673_v43, 512  ;;  %v1420_v17 = vsel %vm1292_vm5, %v4679_v46, 512  ;;  %vm1302_vm10 = vcmp.le.f32.partialorder %v7788_v3, %v4813_v20  ;;  %v7791_v46 = vld [vmem:[#allocation34_spill] sm:$0xff]  ;;  %v1424_v43 = vsel %vm1296_vm7, %v4685_v56, 512 }
 0x20e   : > { %7784 = vst [vmem:[#allocation19_spill] sm:$0xff] %v4865_v6  ;;  %7786 = vst [vmem:[#allocation168_spill] sm:$0xff] %v4871_v22  ;;  %v1418_v6 = vsel %vm1290_vm4, %v4676_v54, 512  ;;  %v7787_v22 = vld [vmem:[#allocation24_spill] sm:$0xff]  ;;  %vm1312_vm15 = vcmp.le.f32.partialorder %v7791_v46, %v4813_v20  ;;  %vm1544_vm4 = vcmp.lt.s32.totalorder %v1416_v30, %v1420_v17  ;;  %v1422_v54 = vsel %vm1294_vm6, %v4682_v52, 512 }
 0x20f   : > { %vm1300_vm9 = vcmp.le.f32.partialorder %v7787_v22, %v4813_v20  ;;  %vm1542_vm3 = vcmp.lt.s32.totalorder %v1414_v7, %v1418_v6  ;;  %v1545_v31 = vsel %vm1544_vm4, %v1416_v30, %v1420_v17  ;;  %vm1318_vm5 = vcmp.le.f32.partialorder %v4285_v53, %v4813_v20 }
 0x210   : > { %v1543_v12 = vsel %vm1542_vm3, %v1414_v7, %v1418_v6  ;;  %vm1548_vm1 = vcmp.lt.s32.totalorder %v1545_v31, %v1424_v43  ;;  %v1428_v21 = vsel %vm1300_vm9, %v4691_v37, 512  ;;  %vm1322_vm6 = vcmp.le.f32.partialorder %v4293_v57, %v4813_v20 }
 0x211   : > { %vm1546_vm2 = vcmp.lt.s32.totalorder %v1543_v12, %v1422_v54  ;;  %v1549_v30 = vsel %vm1548_vm1, %v1545_v31, %v1424_v43  ;;  %vm1324_vm7 = vcmp.le.f32.partialorder %v4297_v59, %v4813_v20  ;;  %v1430_v24 = vsel %vm1302_vm10, %v4694_v47, 512 }
 0x212   : > { %v1547_v6 = vsel %vm1546_vm2, %v1543_v12, %v1422_v54  ;;  %vm1552_vm4 = vcmp.lt.s32.totalorder %v1549_v30, %v1428_v21  ;;  %v1432_v17 = vsel %vm1304_vm11, %v4697_v32, 512  ;;  %vm1328_vm9 = vcmp.le.f32.partialorder %v4305_v62, %v4813_v20 }
 0x213   : > { %vm1550_vm3 = vcmp.lt.s32.totalorder %v1547_v6, %v1426_v18  ;;  %v1553_v54 = vsel %vm1552_vm4, %v1549_v30, %v1428_v21  ;;  %v1434_v43 = vsel %vm1306_vm12, %v4700_v50, 512  ;;  %vm1330_vm10 = vcmp.le.f32.partialorder %v4309_v5, %v4813_v20  ;;  %v7795_v30 = vld [vmem:[#allocation50_spill] sm:$0xff] }
 0x214   : > { %v1551_v12 = vsel %vm1550_vm3, %v1547_v6, %v1426_v18  ;;  %vm1556_vm2 = vcmp.lt.s32.totalorder %v1553_v54, %v1432_v17  ;;  %v1440_v22 = vsel %vm1312_vm15, %v4709_v34, 512  ;;  %vm1334_vm12 = vcmp.le.f32.partialorder %v4317_v19, %v4813_v20  ;;  %v7794_v6 = vld [vmem:[#allocation48_spill] sm:$0xff] }
 0x215   : > { %vm1554_vm1 = vcmp.lt.s32.totalorder %v1551_v12, %v1430_v24  ;;  %v1557_v3 = vsel %vm1556_vm2, %v1553_v54, %v1432_v17  ;;  %vm7792_vm11 = vcmp.le.f32.partialorder %v4269_v48, %v4813_v20  ;;  %v1444_v46 = vsel %vm7793_vm14, %v4715_v4, 512  ;;  %v7797_v54 = vld [vmem:[#allocation54_spill] sm:$0xff] }
 0x216   : > { %v1555_v31 = vsel %vm1554_vm1, %v1551_v12, %v1430_v24  ;;  %vm1560_vm4 = vcmp.lt.s32.totalorder %v1557_v3, %v1436_v11  ;;  %v1442_v42 = vsel %vm7792_vm11, %v4712_v10, 512  ;;  %vm1338_vm15 = vcmp.le.f32.partialorder %v7794_v6, %v4813_v20  ;;  %v7796_v12 = vld [vmem:[#allocation52_spill] sm:$0xff] }
 0x217   : > { %vm1558_vm3 = vcmp.lt.s32.totalorder %v1555_v31, %v1434_v43  ;;  %v1561_v7 = vsel %vm1560_vm4, %v1557_v3, %v1436_v11  ;;  %v1446_v48 = vsel %vm1318_vm5, %v4718_v1, 512  ;;  %vm1342_vm11 = vcmp.le.f32.partialorder %v7796_v12, %v4813_v20  ;;  %v7799_v3 = vld [vmem:[#allocation58_spill] sm:$0xff] }
 0x218   : > { %v1559_v38 = vsel %vm1558_vm3, %v1555_v31, %v1434_v43  ;;  %vm1564_vm2 = vcmp.lt.s32.totalorder %v1561_v7, %v1440_v22  ;;  %vm1340_vm3 = vcmp.le.f32.partialorder %v7795_v30, %v4813_v20  ;;  %v1450_v53 = vsel %vm1322_vm6, %v4724_v58, 512  ;;  %v7798_v31 = vld [vmem:[#allocation56_spill] sm:$0xff] }
 0x219   : > { %vm1562_vm1 = vcmp.lt.s32.totalorder %v1559_v38, %v1438_v36  ;;  %v1565_v21 = vsel %vm1564_vm2, %v1561_v7, %v1440_v22  ;;  %v1452_v55 = vsel %vm1324_vm7, %v4727_v35, 512  ;;  %vm1346_vm0 = vcmp.le.f32.partialorder %v7798_v31, %v4813_v20  ;;  %v7801_v7 = vld [vmem:[#allocation62_spill] sm:$0xff] }
 0x21a   : > { %v1563_v18 = vsel %vm1562_vm1, %v1559_v38, %v1438_v36  ;;  %vm1568_vm13 = vcmp.lt.s32.totalorder %v1565_v21, %v1444_v46  ;;  %vm1344_vm1 = vcmp.le.f32.partialorder %v7797_v54, %v4813_v20  ;;  %vm1348_vm5 = vcmp.le.f32.partialorder %v7799_v3, %v4813_v20  ;;  %v7800_v38 = vld [vmem:[#allocation60_spill] sm:$0xff] }
 0x21b   : > { %vm1566_vm4 = vcmp.lt.s32.totalorder %v1563_v18, %v1442_v42  ;;  %v1569_v17 = vsel %vm1568_vm13, %v1565_v21, %v1444_v46  ;;  %v1454_v57 = vsel %vm1326_vm8, %v4730_v29, 512  ;;  %v1456_v59 = vsel %vm1328_vm9, %v4733_v33, 512  ;;  %v7804_v21 = vld [vmem:[#allocation66_spill] sm:$0xff] }
 0x21c   : > { %v1567_v24 = vsel %vm1566_vm4, %v1563_v18, %v1442_v42  ;;  %vm1572_vm14 = vcmp.lt.s32.totalorder %v1569_v17, %v1448_v51  ;;  %vm1350_vm6 = vcmp.le.f32.partialorder %v7800_v38, %v4813_v20  ;;  %v1458_v61 = vsel %vm1330_vm10, %v4736_v14, 512  ;;  %v7803_v18 = vld [vmem:[#allocation64_spill] sm:$0xff] }
 0x21d   : > { %vm1570_vm2 = vcmp.lt.s32.totalorder %v1567_v24, %v1446_v48  ;;  %v1573_v11 = vsel %vm1572_vm14, %v1569_v17, %v1448_v51  ;;  %vm7802_vm8 = vcmp.le.f32.partialorder %v4313_v13, %v4813_v20  ;;  %vm1354_vm9 = vcmp.le.f32.partialorder %v7803_v18, %v4813_v20  ;;  %v7807_v17 = vld [vmem:[#allocation70_spill] sm:$0xff]  ;;  %v7823_v18 = vld [vmem:[#allocation144_spill] sm:$0xff] }
 0x21e   : > { %v1571_v43 = vsel %vm1570_vm2, %v1567_v24, %v1446_v48  ;;  %vm1576_vm4 = vcmp.lt.s32.totalorder %v1573_v11, %v1452_v55  ;;  %v1460_v62 = vsel %vm7802_vm8, %v4739_v8, 512  ;;  %v1462_v5 = vsel %vm1334_vm12, %v4742_v2, 512  ;;  %v7806_v24 = vld [vmem:[#allocation68_spill] sm:$0xff] }
 0x21f   : > { %vm1574_vm13 = vcmp.lt.s32.totalorder %v1571_v43, %v1450_v53  ;;  %v1577_v22 = vsel %vm1576_vm4, %v1573_v11, %v1452_v55  ;;  %vm7805_vm10 = vcmp.le.f32.partialorder %v4321_v25, %v4813_v20  ;;  %v1466_v19 = vsel %vm1338_vm15, %v4748_v39, 512  ;;  %v7809_v11 = vld [vmem:[#allocation74_spill] sm:$0xff] }
 0x220   : > { %v1575_v36 = vsel %vm1574_vm13, %v1571_v43, %v1450_v53  ;;  %vm1580_vm14 = vcmp.lt.s32.totalorder %v1577_v22, %v1456_v59  ;;  %v1464_v13 = vsel %vm7805_vm10, %v4745_v41, 512  ;;  %v1468_v25 = vsel %vm1340_vm3, %v4751_v16, 512  ;;  %v7808_v43 = vld [vmem:[#allocation72_spill] sm:$0xff] }
 0x221   : > { %vm1578_vm2 = vcmp.lt.s32.totalorder %v1575_v36, %v1454_v57  ;;  %v1581_v46 = vsel %vm1580_vm14, %v1577_v22, %v1456_v59  ;;  %vm1360_vm14 = vcmp.le.f32.partialorder %v7807_v17, %v4813_v20  ;;  %vm1362_vm12 = vcmp.le.f32.partialorder %v7808_v43, %v4813_v20  ;;  %v7811_v22 = vld [vmem:[#allocation78_spill] sm:$0xff]  ;;  %v7834_v43 = vld [vmem:[#allocation148_spill] sm:$0xff] }
 0x222   : > { %v1579_v42 = vsel %vm1578_vm2, %v1575_v36, %v1454_v57  ;;  %vm1584_vm7 = vcmp.lt.s32.totalorder %v1581_v46, %v1460_v62  ;;  %vm1358_vm2 = vcmp.le.f32.partialorder %v7806_v24, %v4813_v20  ;;  %v1470_v6 = vsel %vm1342_vm11, %v4754_v26, 512  ;;  %v7810_v36 = vld [vmem:[#allocation76_spill] sm:$0xff] }
 0x223   : > { %vm1582_vm4 = vcmp.lt.s32.totalorder %v1579_v42, %v1458_v61  ;;  %v1585_v51 = vsel %vm1584_vm7, %v1581_v46, %v1460_v62  ;;  %vm1364_vm7 = vcmp.le.f32.partialorder %v7809_v11, %v4813_v20  ;;  %v1472_v30 = vsel %vm1344_vm1, %v4757_v44, 512  ;;  %v7813_v46 = vld [vmem:[#allocation82_spill] sm:$0xff]  ;;  %v7828_v24 = vld [vmem:[#allocation100_spill] sm:$0xff]  ;;  %v7835_v11 = vld [vmem:[#allocation149_spill] sm:$0xff] }
 0x224   : > { %v1583_v48 = vsel %vm1582_vm4, %v1579_v42, %v1458_v61  ;;  %vm1588_vm13 = vcmp.lt.s32.totalorder %v1585_v51, %v1464_v13  ;;  %vm1366_vm15 = vcmp.le.f32.partialorder %v7810_v36, %v4813_v20  ;;  %vm1368_vm3 = vcmp.le.f32.partialorder %v7811_v22, %v4813_v20  ;;  %v7812_v42 = vld [vmem:[#allocation80_spill] sm:$0xff]  ;;  %v7839_v36 = vld [vmem:[#allocation150_spill] sm:$0xff]  ;;  %v7840_v22 = vld [vmem:[#allocation151_spill] sm:$0xff] }
 0x225   : > { %vm1586_vm8 = vcmp.lt.s32.totalorder %v1583_v48, %v1462_v5  ;;  %v1589_v55 = vsel %vm1588_vm13, %v1585_v51, %v1464_v13  ;;  %v1474_v12 = vsel %vm1346_vm0, %v4760_v60, 512  ;;  %v1476_v54 = vsel %vm1348_vm5, %v4763_v40, 512  ;;  %v7816_v51 = vld [vmem:[#allocation86_spill] sm:$0xff] }
 0x226   : > { %v1587_v53 = vsel %vm1586_vm8, %v1583_v48, %v1462_v5  ;;  %vm1592_vm10 = vcmp.lt.s32.totalorder %v1589_v55, %v1468_v25  ;;  %vm1370_vm11 = vcmp.le.f32.partialorder %v7812_v42, %v4813_v20  ;;  %v1478_v31 = vsel %vm1350_vm6, %v4766_v28, 512  ;;  %v7815_v48 = vld [vmem:[#allocation84_spill] sm:$0xff] }
 0x227   : > { %vm1590_vm4 = vcmp.lt.s32.totalorder %v1587_v53, %v1466_v19  ;;  %v1593_v59 = vsel %vm1592_vm10, %v1589_v55, %v1468_v25  ;;  %vm7814_vm0 = vcmp.le.f32.partialorder %v7801_v7, %v4813_v20  ;;  %v7818_v25 = vld [vmem:[#allocation143_spill] sm:$0xff]  ;;  %vm7819_vm6 = vcmp.le.f32.partialorder %v7804_v21, %v4813_v20  ;;  %v7824_v21 = vld [vmem:[#allocation145_spill] sm:$0xff] }
 0x228   : > { %v1591_v57 = vsel %vm1590_vm4, %v1587_v53, %v1466_v19  ;;  %vm1596_vm8 = vcmp.lt.s32.totalorder %v1593_v59, %v1472_v30  ;;  %v1480_v3 = vsel %vm7814_vm0, %v4769_v0, 512  ;;  %v7817_v19 = vld [vmem:[#allocation142_spill] sm:$0xff]  ;;  %v1484_v7 = vsel %vm7819_vm6, %v7818_v25, 512  ;;  %v7838_v25 = vld [vmem:[#allocation112_spill] sm:$0xff] }
 0x229   : > { %vm1594_vm13 = vcmp.lt.s32.totalorder %v1591_v57, %v1470_v6  ;;  %v1597_v62 = vsel %vm1596_vm8, %v1593_v59, %v1472_v30  ;;  %v1482_v38 = vsel %vm1354_vm9, %v7817_v19, 512  ;;  %v7821_v30 = vld [vmem:[#allocation90_spill] sm:$0xff]  ;;  %v1486_v59 = vsel %vm1358_vm2, %v7823_v18, 512  ;;  %v7844_v19 = vld [vmem:[#allocation152_spill] sm:$0xff] }
 0x22a   : > { %v1595_v61 = vsel %vm1594_vm13, %v1591_v57, %v1470_v6  ;;  %vm1600_vm10 = vcmp.lt.s32.totalorder %v1597_v62, %v1476_v54  ;;  %v7820_v6 = vld [vmem:[#allocation88_spill] sm:$0xff]  ;;  %v7833_v18 = vld [vmem:[#allocation106_spill] sm:$0xff] }
 0x22b   : > { %vm1598_vm4 = vcmp.lt.s32.totalorder %v1595_v61, %v1474_v12  ;;  %v1601_v13 = vsel %vm1600_vm10, %v1597_v62, %v1476_v54  ;;  %vm1380_vm10 = vcmp.le.f32.partialorder %v7821_v30, %v4813_v20  ;;  %v7822_v57 = vld [vmem:[#allocation92_spill] sm:$0xff]  ;;  %v7825_v62 = vld [vmem:[#allocation94_spill] sm:$0xff] }
 0x22c   : > { %v1599_v5 = vsel %vm1598_vm4, %v1595_v61, %v1474_v12  ;;  %vm1604_vm1 = vcmp.lt.s32.totalorder %v1601_v13, %v1480_v3  ;;  %vm1378_vm4 = vcmp.le.f32.partialorder %v7820_v6, %v4813_v20  ;;  %v1488_v12 = vsel %vm1360_vm14, %v7824_v21, 512  ;;  %v7832_v21 = vld [vmem:[#allocation104_spill] sm:$0xff] }
 0x22d   : > { %vm1602_vm8 = vcmp.lt.s32.totalorder %v1599_v5, %v1478_v31  ;;  %v1605_v55 = vsel %vm1604_vm1, %v1601_v13, %v1480_v3  ;;  %vm1384_vm9 = vcmp.le.f32.partialorder %v7825_v62, %v4813_v20  ;;  %v7827_v3 = vld [vmem:[#allocation98_spill] sm:$0xff]  ;;  %v7830_v13 = vld [vmem:[#allocation147_spill] sm:$0xff]  ;;  %v7859_v62 = vld [vmem:[#allocation160_spill] sm:$0xff] }
 0x22e   : > { %v1603_v53 = vsel %vm1602_vm8, %v1599_v5, %v1478_v31  ;;  %vm1608_vm13 = vcmp.lt.s32.totalorder %v1605_v55, %v1484_v7  ;;  %v7826_v31 = vld [vmem:[#allocation96_spill] sm:$0xff]  ;;  %v7829_v5 = vld [vmem:[#allocation146_spill] sm:$0xff] }
 0x22f   : > { %vm1606_vm0 = vcmp.lt.s32.totalorder %v1603_v53, %v1482_v38  ;;  %v1609_v61 = vsel %vm1608_vm13, %v1605_v55, %v1484_v7  ;;  %vm1386_vm1 = vcmp.le.f32.partialorder %v7826_v31, %v4813_v20  ;;  %v1490_v17 = vsel %vm1362_vm12, %v7829_v5, 512  ;;  %v7831_v55 = vld [vmem:[#allocation102_spill] sm:$0xff] }
 0x230   : > { %v1607_v54 = vsel %vm1606_vm0, %v1603_v53, %v1482_v38  ;;  %vm1612_vm6 = vcmp.lt.s32.totalorder %v1609_v61, %v1488_v12  ;;  %v1492_v38 = vsel %vm1364_vm7, %v7830_v13, 512  ;;  %vm1392_vm14 = vcmp.le.f32.partialorder %v7831_v55, %v4813_v20  ;;  %v7837_v13 = vld [vmem:[#allocation110_spill] sm:$0xff]  ;;  %v7863_v55 = vld [vmem:[#allocation165_spill] sm:$0xff] }
 0x231   : > { %vm1610_vm8 = vcmp.lt.s32.totalorder %v1607_v54, %v1486_v59  ;;  %v1613_v53 = vsel %vm1612_vm6, %v1609_v61, %v1488_v12  ;;  %vm1394_vm13 = vcmp.le.f32.partialorder %v7832_v21, %v4813_v20  ;;  %v1494_v5 = vsel %vm1366_vm15, %v7834_v43, 512  ;;  %v7836_v61 = vld [vmem:[#allocation108_spill] sm:$0xff] }
 0x232   : > { %v1611_v7 = vsel %vm1610_vm8, %v1607_v54, %v1486_v59  ;;  %vm1616_vm2 = vcmp.lt.s32.totalorder %v1613_v53, %v1492_v38  ;;  %v1496_v59 = vsel %vm1368_vm3, %v7835_v11, 512  ;;  %vm1398_vm12 = vcmp.le.f32.partialorder %v7836_v61, %v4813_v20  ;;  %v7843_v11 = vld [vmem:[#allocation116_spill] sm:$0xff] }
 0x233   : > { %vm1614_vm0 = vcmp.lt.s32.totalorder %v1611_v7, %v1490_v17  ;;  %v1617_v54 = vsel %vm1616_vm2, %v1613_v53, %v1492_v38  ;;  %v1498_v43 = vsel %vm1370_vm11, %v7839_v36, 512  ;;  %vm7841_vm15 = vcmp.le.f32.partialorder %v7813_v46, %v4813_v20  ;;  %v7842_v53 = vld [vmem:[#allocation114_spill] sm:$0xff]  ;;  %v7846_v36 = vld [vmem:[#allocation153_spill] sm:$0xff] }
 0x234   : > { %v1615_v12 = vsel %vm1614_vm0, %v1611_v7, %v1490_v17  ;;  %vm1620_vm6 = vcmp.lt.s32.totalorder %v1617_v54, %v1496_v59  ;;  %v1500_v17 = vsel %vm7841_vm15, %v7840_v22, 512  ;;  %vm1404_vm3 = vcmp.le.f32.partialorder %v7842_v53, %v4813_v20  ;;  %v7850_v22 = vld [vmem:[#allocation154_spill] sm:$0xff] }
 0x235   : > { %vm1618_vm8 = vcmp.lt.s32.totalorder %v1615_v12, %v1494_v5  ;;  %v1621_v7 = vsel %vm1620_vm6, %v1617_v54, %v1496_v59  ;;  %vm7845_vm7 = vcmp.le.f32.partialorder %v7815_v48, %v4813_v20  ;;  %vm7847_vm11 = vcmp.le.f32.partialorder %v7816_v51, %v4813_v20  ;;  %v7849_v54 = vld [vmem:[#allocation120_spill] sm:$0xff] }
 0x236   : > { %v1619_v38 = vsel %vm1618_vm8, %v1615_v12, %v1494_v5  ;;  %vm1624_vm5 = vcmp.lt.s32.totalorder %v1621_v7, %v1500_v17  ;;  %v1502_v42 = vsel %vm7845_vm7, %v7844_v19, 512  ;;  %v1504_v46 = vsel %vm7847_vm11, %v7846_v36, 512  ;;  %v7848_v12 = vld [vmem:[#allocation118_spill] sm:$0xff]  ;;  %v7854_v19 = vld [vmem:[#allocation156_spill] sm:$0xff] }
 0x237   : > { %vm1622_vm0 = vcmp.lt.s32.totalorder %v1619_v38, %v1498_v43  ;;  %v1625_v59 = vsel %vm1624_vm5, %v1621_v7, %v1500_v17  ;;  %vm1408_vm8 = vcmp.le.f32.partialorder %v7848_v12, %v4813_v20  ;;  %vm1410_vm6 = vcmp.le.f32.partialorder %v7849_v54, %v4813_v20  ;;  %v7852_v7 = vld [vmem:[#allocation155_spill] sm:$0xff]  ;;  %v7877_v12 = vld [vmem:[#allocation18_spill] sm:$0xff]  ;;  %v7878_v54 = vld [vmem:[#allocation20_spill] sm:$0xff] }
 0x238   : > { %v1623_v5 = vsel %vm1622_vm0, %v1619_v38, %v1498_v43  ;;  %vm1628_vm2 = vcmp.lt.s32.totalorder %v1625_v59, %v1504_v46  ;;  %v1506_v48 = vsel %vm1378_vm4, %v7850_v22, 512  ;;  %v1508_v51 = vsel %vm1380_vm10, %v4811_v9, 512  ;;  %v7851_v38 = vld [vmem:[#allocation122_spill] sm:$0xff]  ;;  %v7855_v22 = vld [vmem:[#allocation157_spill] sm:$0xff] }
 0x239   : > { %vm1626_vm15 = vcmp.lt.s32.totalorder %v1623_v5, %v1502_v42  ;;  %v1629_v17 = vsel %vm1628_vm2, %v1625_v59, %v1504_v46  ;;  %vm1412_vm5 = vcmp.le.f32.partialorder %v7851_v38, %v4813_v20  ;;  %vm7853_vm7 = vcmp.le.f32.partialorder %v7822_v57, %v4813_v20 }
 0x23a   : > { %v1627_v43 = vsel %vm1626_vm15, %v1623_v5, %v1502_v42  ;;  %v1510_v36 = vsel %vm7853_vm7, %v7852_v7, 512  ;;  %vm1632_vm11 = vcmp.lt.s32.totalorder %v1629_v17, %v1508_v51  ;;  %v1512_v6 = vsel %vm1384_vm9, %v7854_v19, 512  ;;  %v7856_v5 = vld [vmem:[#allocation158_spill] sm:$0xff] }
 0x23b   : > { %vm1630_vm0 = vcmp.lt.s32.totalorder %v1627_v43, %v1506_v48  ;;  %v1514_v30 = vsel %vm1386_vm1, %v7855_v22, 512  ;;  %v1633_v46 = vsel %vm1632_vm11, %v1629_v17, %v1508_v51  ;;  %vm7857_vm4 = vcmp.le.f32.partialorder %v7827_v3, %v4813_v20  ;;  %v7862_v17 = vld [vmem:[#allocation164_spill] sm:$0xff] }
 0x23c   : > { %v1631_v42 = vsel %vm1630_vm0, %v1627_v43, %v1506_v48  ;;  %v1516_v57 = vsel %vm7857_vm4, %v7856_v5, 512  ;;  %vm7858_vm10 = vcmp.le.f32.partialorder %v7828_v24, %v4813_v20  ;;  %vm1636_vm15 = vcmp.lt.s32.totalorder %v1633_v46, %v1512_v6  ;;  %v7860_v43 = vld [vmem:[#allocation163_spill] sm:$0xff]  ;;  %v7895_v5 = vld [vmem:[#allocation126_spill] sm:$0xff] }
 0x23d   : > { %v1518_v59 = vsel %vm7858_vm10, %v4828_v27, 512  ;;  %vm1634_vm2 = vcmp.lt.s32.totalorder %v1631_v42, %v1510_v36  ;;  %v1520_v31 = vsel %vm1392_vm14, %v7859_v62, 512  ;;  %v1522_v48 = vsel %vm1394_vm13, %v4834_v23, 512 }
 0x23e   : > { %v1635_v51 = vsel %vm1634_vm2, %v1631_v42, %v1510_v36  ;;  %v1637_v3 = vsel %vm1636_vm15, %v1633_v46, %v1512_v6  ;;  %vm7861_vm9 = vcmp.le.f32.partialorder %v7833_v18, %v4813_v20  ;;  %v1526_v27 = vsel %vm1398_vm12, %v7862_v17, 512  ;;  %v7865_v6 = vld [vmem:[#allocation162_spill] sm:$0xff]  ;;  %v7869_v17 = vld [vmem:[#allocation15_spill] sm:$0xff] }
 0x23f   : > { %v1524_v24 = vsel %vm7861_vm9, %v7860_v43, 512  ;;  %vm1638_vm1 = vcmp.lt.s32.totalorder %v1635_v51, %v1514_v30  ;;  %vm1640_vm7 = vcmp.lt.s32.totalorder %v1637_v3, %v1516_v57  ;;  %vm7864_vm14 = vcmp.le.f32.partialorder %v7837_v13, %v4813_v20  ;;  %v7867_v18 = vld [vmem:[#allocation166_spill] sm:$0xff]  ;;  %v7870_v13 = vld [vmem:[#allocation17_spill] sm:$0xff] }
 0x240   : > { %v1528_v21 = vsel %vm7864_vm14, %v7863_v55, 512  ;;  %v1639_v23 = vsel %vm1638_vm1, %v1635_v51, %v1514_v30  ;;  %v1641_v36 = vsel %vm1640_vm7, %v1637_v3, %v1516_v57  ;;  %v7866_v42 = vrot.slane %v7865_v6, 1  ;;  %v7872_v57 = vld [vmem:[#allocation19_spill] sm:$0xff]  ;;  %v7891_v55 = vld [vmem:[#allocation38_spill] sm:$0xff] }
 0x241   : > { %vm7868_vm13 = vcmp.le.f32.partialorder %v7838_v25, %v4813_v20  ;;  %v1532_v43 = vsel %vm1404_vm3, %v7869_v17, 512  ;;  %vm1642_vm12 = vcmp.lt.s32.totalorder %v1639_v23, %v1518_v59  ;;  %vm1644_vm0 = vcmp.lt.s32.totalorder %v1641_v36, %v1520_v31 }
 0x242   : > { %v5217_v46 = vmin.f32 %v7865_v6, %v7866_v42  ;;  %v1530_v61 = vsel %vm7868_vm13, %v7867_v18, 512  ;;  %vm7871_vm11 = vcmp.le.f32.partialorder %v7843_v11, %v4813_v20  ;;  %v1536_v51 = vsel %vm1408_vm8, %v7872_v57, 512  ;;  %v7873_v6 = vld [vmem:[#allocation167_spill] sm:$0xff]  ;;  %v7874_v42 = vld [vmem:[#allocation168_spill] sm:$0xff]  ;;  %v7875_v18 = vld [vmem:[#allocation14_spill] sm:$0xff] }
 0x243   : > { %v1534_v30 = vsel %vm7871_vm11, %v7870_v13, 512  ;;  %v1643_v3 = vsel %vm1642_vm12, %v1639_v23, %v1518_v59  ;;  %v1645_v25 = vsel %vm1644_vm0, %v1641_v36, %v1520_v31  ;;  %v1538_v53 = vsel %vm1410_vm6, %v7873_v6, 512  ;;  %v7876_v23 = vld [vmem:[#allocation16_spill] sm:$0xff]  ;;  %v7879_v59 = vld [vmem:[#allocation21_spill] sm:$0xff]  ;;  %v7880_v31 = vld [vmem:[#allocation22_spill] sm:$0xff] }
 0x244   : > { %v1540_v17 = vsel %vm1412_vm5, %v7874_v42, 512  ;;  %vm1646_vm3 = vcmp.lt.s32.totalorder %v1643_v3, %v1522_v48  ;;  %vm1648_vm4 = vcmp.lt.s32.totalorder %v1645_v25, %v1524_v24  ;;  %vm1287_vm10 = vcmp.le.f32.partialorder %v7875_v18, %v5217_v46  ;;  %v7887_v6 = vld [vmem:[#allocation33_spill] sm:$0xff]  ;;  %v7897_v18 = vld [vmem:[#allocation40_spill] sm:$0xff] }
 0x245   : > { %v1647_v11 = vsel %vm1646_vm3, %v1643_v3, %v1522_v48  ;;  %v1649_v13 = vsel %vm1648_vm4, %v1645_v25, %v1524_v24  ;;  %vm1289_vm8 = vcmp.le.f32.partialorder %v7876_v23, %v5217_v46  ;;  %vm1291_vm6 = vcmp.le.f32.partialorder %v7877_v12, %v5217_v46  ;;  %v7881_v48 = vld [vmem:[#allocation23_spill] sm:$0xff]  ;;  %v7882_v24 = vld [vmem:[#allocation25_spill] sm:$0xff] }
 0x246   : > { %vm1650_vm2 = vcmp.lt.s32.totalorder %v1647_v11, %v1526_v27  ;;  %vm1652_vm15 = vcmp.lt.s32.totalorder %v1649_v13, %v1528_v21  ;;  %vm1293_vm9 = vcmp.le.f32.partialorder %v7878_v54, %v5217_v46  ;;  %vm1295_vm5 = vcmp.le.f32.partialorder %v7879_v59, %v5217_v46  ;;  %v7883_v25 = vld [vmem:[#allocation27_spill] sm:$0xff] }
 0x247   : > { %v1651_v20 = vsel %vm1650_vm2, %v1647_v11, %v1526_v27  ;;  %v1653_v38 = vsel %vm1652_vm15, %v1649_v13, %v1528_v21  ;;  %vm1297_vm1 = vcmp.le.f32.partialorder %v7880_v31, %v5217_v46  ;;  %v7884_v27 = vld [vmem:[#allocation29_spill] sm:$0xff]  ;;  %v7885_v21 = vld [vmem:[#allocation30_spill] sm:$0xff]  ;;  %v7886_v13 = vld [vmem:[#allocation32_spill] sm:$0xff]  ;;  %v1423_v23 = vsel %vm1295_vm5, %v4682_v52, 512 }
 0x248   : > { %vm1654_vm7 = vcmp.lt.s32.totalorder %v1651_v20, %v1530_v61  ;;  %vm1656_vm14 = vcmp.lt.s32.totalorder %v1653_v38, %v1532_v43  ;;  %vm1307_vm2 = vcmp.le.f32.partialorder %v7885_v21, %v5217_v46  ;;  %vm1309_vm15 = vcmp.le.f32.partialorder %v7886_v13, %v5217_v46 }
 0x249   : > { %v1655_v36 = vsel %vm1654_vm7, %v1651_v20, %v1530_v61  ;;  %v1657_v3 = vsel %vm1656_vm14, %v1653_v38, %v1532_v43  ;;  %vm1311_vm7 = vcmp.le.f32.partialorder %v7887_v6, %v5217_v46  ;;  %v7888_v43 = vld [vmem:[#allocation35_spill] sm:$0xff]  ;;  %v7889_v61 = vld [vmem:[#allocation36_spill] sm:$0xff]  ;;  %v7890_v20 = vld [vmem:[#allocation37_spill] sm:$0xff]  ;;  %v1425_v12 = vsel %vm1297_vm1, %v4685_v56, 512 }
 0x24a   : > { %vm1658_vm3 = vcmp.lt.s32.totalorder %v1655_v36, %v1534_v30  ;;  %vm1660_vm4 = vcmp.lt.s32.totalorder %v1657_v3, %v1536_v51  ;;  %vm1315_vm11 = vcmp.le.f32.partialorder %v7889_v61, %v5217_v46  ;;  %vm1317_vm13 = vcmp.le.f32.partialorder %v7890_v20, %v5217_v46 }
 0x24b   : > { %v1659_v11 = vsel %vm1658_vm3, %v1655_v36, %v1534_v30  ;;  %v1661_v42 = vsel %vm1660_vm4, %v1657_v3, %v1536_v51  ;;  %vm1319_vm3 = vcmp.le.f32.partialorder %v7891_v55, %v5217_v46  ;;  %v7892_v30 = vld [vmem:[#allocation39_spill] sm:$0xff]  ;;  %v7893_v51 = vld [vmem:[#allocation124_spill] sm:$0xff]  ;;  %v7894_v3 = vld [vmem:[#allocation125_spill] sm:$0xff]  ;;  %vm7902_vm5 = vcmp.le.f32.partialorder %v7884_v27, %v5217_v46 }
 0x24c   : > { %vm1662_vm0 = vcmp.lt.s32.totalorder %v1659_v11, %v1538_v53  ;;  %vm1664_vm12 = vcmp.lt.s32.totalorder %v1661_v42, %v1540_v17  ;;  %vm1321_vm4 = vcmp.le.f32.partialorder %v7892_v30, %v5217_v46  ;;  %v1415_v36 = vsel %vm1287_vm10, %v7893_v51, 512  ;;  %v7898_v51 = vld [vmem:[#allocation41_spill] sm:$0xff] }
 0x24d   : > { %v1663_v38 = vsel %vm1662_vm0, %v1659_v11, %v1538_v53  ;;  %v1665_v57 = vsel %vm1664_vm12, %v1661_v42, %v1540_v17  ;;  %v1417_v62 = vsel %vm1289_vm8, %v7894_v3, 512  ;;  %v1419_v17 = vsel %vm1291_vm6, %v7895_v5, 512  ;;  %v7896_v53 = vld [vmem:[#allocation127_spill] sm:$0xff] }
 0x24e   : > { %vm1666_vm14 = vcmp.lt.s32.totalorder %v1663_v38, %v1665_v57  ;;  %v1421_v42 = vsel %vm1293_vm9, %v7896_v53, 512  ;;  %vm1323_vm10 = vcmp.le.f32.partialorder %v7897_v18, %v5217_v46  ;;  %vm7899_vm8 = vcmp.le.f32.partialorder %v7881_v48, %v5217_v46  ;;  %v7904_v48 = vld [vmem:[#allocation42_spill] sm:$0xff]  ;;  %v7905_v3 = vld [vmem:[#allocation43_spill] sm:$0xff]  ;;  %v7909_v53 = vld [vmem:[#allocation44_spill] sm:$0xff] }
 0x24f   : > { %v5295_v11 = vsel %vm1666_vm14, %v1663_v38, %v1665_v57  ;;  %v1427_v57 = vsel %vm7899_vm8, %v4688_v63, 512  ;;  %vm7900_vm6 = vcmp.le.f32.partialorder %v7882_v24, %v5217_v46  ;;  %vm7901_vm9 = vcmp.le.f32.partialorder %v7883_v25, %v5217_v46  ;;  %v7914_v63 = vld [vmem:[#allocation46_spill] sm:$0xff] }
 0x250   : > { %v1429_v54 = vsel %vm7900_vm6, %v4691_v37, 512  ;;  %v1431_v59 = vsel %vm7901_vm9, %v4694_v47, 512  ;;  %v1433_v31 = vsel %vm7902_vm5, %v4697_v32, 512  ;;  %vm7903_vm1 = vcmask 588800  }
 0x251   : > { %v1677_v38 = vsel %vm7903_vm1, %v1415_v36, 2147483647  ;;  %vm1327_vm0 = vcmp.le.f32.partialorder %v7904_v48, %v5217_v46  ;;  %vm1329_vm14 = vcmp.le.f32.partialorder %v7905_v3, %v5217_v46  ;;  %vm7906_vm8 = vmmov %vm7903_vm1  ;;  %v1435_v27 = vsel %vm1307_vm2, %v4700_v50, 512 }
 0x252   : > { %v1678_v24 = vsel %vm7906_vm8, %v1417_v62, 2147483647  ;;  %vm7907_vm6 = vmmov %vm7903_vm1  ;;  %v1437_v36 = vsel %vm1309_vm15, %v4703_v15, 512  ;;  %v7910_v62 = vld [vmem:[#allocation45_spill] sm:$0xff]  ;;  %v1439_v13 = vsel %vm1311_vm7, %v4706_v45, 512  ;;  %vm7913_vm2 = vcmp.le.f32.partialorder %v7888_v43, %v5217_v46 }
 0x253   : > { %v1679_v5 = vsel %vm7907_vm6, %v1419_v17, 2147483647  ;;  %vm7908_vm12 = vmmov %vm7903_vm1  ;;  %vm1333_vm8 = vcmp.le.f32.partialorder %v7910_v62, %v5217_v46  ;;  %v1441_v56 = vsel %vm7913_vm2, %v4709_v34, 512  ;;  %v1443_v43 = vsel %vm1315_vm11, %v4712_v10, 512 }
 0x254   : > { %v1682_v25 = vsel %vm7908_vm12, %v1421_v42, 2147483647  ;;  %vm1680_vm9 = vcmp.lt.s32.totalorder %v1677_v38, %v1679_v5  ;;  %vm7911_vm12 = vmmov %vm7903_vm1  ;;  %v1447_v20 = vsel %vm1319_vm3, %v4718_v1, 512  ;;  %v1451_v30 = vsel %vm1323_vm10, %v4724_v58, 512 }
 0x255   : > { %vm1683_vm5 = vcmp.lt.s32.totalorder %v1678_v24, %v1682_v25  ;;  %v1681_v17 = vsel %vm1680_vm9, %v1677_v38, %v1679_v5  ;;  %v1685_v52 = vsel %vm7911_vm12, %v1423_v23, 2147483647  ;;  %vm7912_vm6 = vmmov %vm7903_vm1  ;;  %vm1335_vm9 = vcmp.le.f32.partialorder %v7914_v63, %v5217_v46  ;;  %v7915_v5 = vld [vmem:[#allocation47_spill] sm:$0xff] }
 0x256   : > { %v1684_v42 = vsel %vm1683_vm5, %v1678_v24, %v1682_v25  ;;  %v1688_v21 = vsel %vm7912_vm6, %v1425_v12, 2147483647  ;;  %vm1686_vm15 = vcmp.lt.s32.totalorder %v1681_v17, %v1685_v52  ;;  %vm1337_vm5 = vcmp.le.f32.partialorder %v7915_v5, %v5217_v46  ;;  %vm7916_vm12 = vmmov %vm7912_vm6  ;;  %v7917_v25 = vld [vmem:[#allocation49_spill] sm:$0xff] }
 0x257   : > { %vm1689_vm1 = vcmp.lt.s32.totalorder %v1684_v42, %v1688_v21  ;;  %v1687_v23 = vsel %vm1686_vm15, %v1681_v17, %v1685_v52  ;;  %v1691_v38 = vsel %vm7916_vm12, %v1427_v57, 2147483647  ;;  %v1694_v6 = vsel %vm7912_vm6, %v1429_v54, 2147483647  ;;  %v7918_v52 = vld [vmem:[#allocation51_spill] sm:$0xff]  ;;  %vm7919_vm12 = vmmov %vm7912_vm6 }
 0x258   : > { %v1690_v12 = vsel %vm1689_vm1, %v1684_v42, %v1688_v21  ;;  %v1445_v24 = vsel %vm1317_vm13, %v4715_v4, 512  ;;  %vm1692_vm7 = vcmp.lt.s32.totalorder %v1687_v23, %v1691_v38  ;;  %vm1339_vm15 = vcmp.le.f32.partialorder %v7917_v25, %v5217_v46  ;;  %v7920_v21 = vld [vmem:[#allocation53_spill] sm:$0xff] }
 0x259   : > { %vm1695_vm2 = vcmp.lt.s32.totalorder %v1690_v12, %v1694_v6  ;;  %vm1341_vm1 = vcmp.le.f32.partialorder %v7918_v52, %v5217_v46  ;;  %v1693_v57 = vsel %vm1692_vm7, %v1687_v23, %v1691_v38  ;;  %v1697_v17 = vsel %vm7919_vm12, %v1431_v59, 2147483647  ;;  %v7921_v23 = vld [vmem:[#allocation55_spill] sm:$0xff]  ;;  %vm7922_vm12 = vmmov %vm7912_vm6 }
 0x25a   : > { %v1696_v54 = vsel %vm1695_vm2, %v1690_v12, %v1694_v6  ;;  %v1700_v61 = vsel %vm7912_vm6, %v1433_v31, 2147483647  ;;  %v1449_v42 = vsel %vm1321_vm4, %v4721_v49, 512  ;;  %vm1698_vm13 = vcmp.lt.s32.totalorder %v1693_v57, %v1697_v17  ;;  %v7924_v6 = vld [vmem:[#allocation57_spill] sm:$0xff] }
 0x25b   : > { %vm1701_vm11 = vcmp.lt.s32.totalorder %v1696_v54, %v1700_v61  ;;  %vm1345_vm2 = vcmp.le.f32.partialorder %v7921_v23, %v5217_v46  ;;  %v1699_v59 = vsel %vm1698_vm13, %v1693_v57, %v1697_v17  ;;  %v1703_v12 = vsel %vm7922_vm12, %v1435_v27, 2147483647  ;;  %v7925_v57 = vld [vmem:[#allocation59_spill] sm:$0xff]  ;;  %vm7926_vm12 = vmmov %vm7912_vm6  ;;  %v7953_v49 = vld [vmem:[#allocation89_spill] sm:$0xff] }
 0x25c   : > { %v1702_v31 = vsel %vm1701_vm11, %v1696_v54, %v1700_v61  ;;  %v1706_v55 = vsel %vm7912_vm6, %v1437_v36, 2147483647  ;;  %vm7923_vm3 = vcmp.le.f32.partialorder %v7898_v51, %v5217_v46  ;;  %vm1704_vm4 = vcmp.lt.s32.totalorder %v1699_v59, %v1703_v12  ;;  %v7927_v61 = vld [vmem:[#allocation61_spill] sm:$0xff] }
 0x25d   : > { %v1453_v38 = vsel %vm7923_vm3, %v4727_v35, 512  ;;  %vm1707_vm7 = vcmp.lt.s32.totalorder %v1702_v31, %v1706_v55  ;;  %vm1347_vm13 = vcmp.le.f32.partialorder %v7924_v6, %v5217_v46  ;;  %vm1349_vm11 = vcmp.le.f32.partialorder %v7925_v57, %v5217_v46 }
 0x25e   : > { %v1705_v27 = vsel %vm1704_vm4, %v1699_v59, %v1703_v12  ;;  %v1708_v36 = vsel %vm1707_vm7, %v1702_v31, %v1706_v55  ;;  %v1709_v54 = vsel %vm7926_vm12, %v1439_v13, 2147483647  ;;  %v1712_v18 = vsel %vm7912_vm6, %v1441_v56, 2147483647  ;;  %v7928_v59 = vld [vmem:[#allocation63_spill] sm:$0xff]  ;;  %vm7929_vm12 = vmmov %vm7912_vm6 }
 0x25f   : > { %v1455_v51 = vsel %vm1327_vm0, %v4730_v29, 512  ;;  %v1457_v17 = vsel %vm1329_vm14, %v4733_v33, 512  ;;  %vm1710_vm10 = vcmp.lt.s32.totalorder %v1705_v27, %v1709_v54  ;;  %vm1713_vm3 = vcmp.lt.s32.totalorder %v1708_v36, %v1712_v18  ;;  %v2261_v55 = vld [vmem:[%s7225_s2 + $0x8] sm:$0xff]  ;;  %v7964_v29 = vld [vmem:[#allocation97_spill] sm:$0xff] }
 0x260   : > { %vm1353_vm7 = vcmp.le.f32.partialorder %v7928_v59, %v5217_v46  ;;  %v1711_v13 = vsel %vm1710_vm10, %v1705_v27, %v1709_v54  ;;  %v1714_v56 = vsel %vm1713_vm3, %v1708_v36, %v1712_v18  ;;  %v1715_v31 = vsel %vm7929_vm12, %v1443_v43, 2147483647  ;;  %v7931_v43 = vld [vmem:[#allocation65_spill] sm:$0xff]  ;;  %vm7933_vm12 = vmmov %vm7912_vm6  ;;  %2340 = vmatprep.mubr.f32.mxu1 %v2261_v55 }
 0x261   : > { %v1718_v48 = vsel %vm7912_vm6, %v1445_v24, 2147483647  ;;  %vm7930_vm0 = vcmp.le.f32.partialorder %v7909_v53, %v5217_v46  ;;  %v1461_v12 = vsel %vm1333_vm8, %v4739_v8, 512  ;;  %vm1716_vm14 = vcmp.lt.s32.totalorder %v1711_v13, %v1715_v31  ;;  %v7932_v24 = vld [vmem:[#allocation67_spill] sm:$0xff]  ;;  %v7937_v55 = vld [vmem:[#allocation73_spill] sm:$0xff] }
 0x262   : > { %v1459_v3 = vsel %vm7930_vm0, %v4736_v14, 512  ;;  %vm1719_vm4 = vcmp.lt.s32.totalorder %v1714_v56, %v1718_v48  ;;  %vm1355_vm10 = vcmp.le.f32.partialorder %v7931_v43, %v5217_v46  ;;  %vm1357_vm3 = vcmp.le.f32.partialorder %v7932_v24, %v5217_v46  ;;  %v7969_v33 = vld [vmem:[#allocation101_spill] sm:$0xff]  ;;  %v7980_v8 = vld [vmem:[#allocation107_spill] sm:$0xff] }
 0x263   : > { %v1717_v27 = vsel %vm1716_vm14, %v1711_v13, %v1715_v31  ;;  %v1720_v53 = vsel %vm1719_vm4, %v1714_v56, %v1718_v48  ;;  %v1721_v36 = vsel %vm7933_vm12, %v1447_v20, 2147483647  ;;  %v1724_v54 = vsel %vm7912_vm6, %v1449_v42, 2147483647  ;;  %v7934_v13 = vld [vmem:[#allocation69_spill] sm:$0xff]  ;;  %v7935_v20 = vld [vmem:[#allocation71_spill] sm:$0xff]  ;;  %vm7936_vm12 = vmmov %vm7912_vm6 }
 0x264   : > { %v1463_v62 = vsel %vm1335_vm9, %v4742_v2, 512  ;;  %v1465_v18 = vsel %vm1337_vm5, %v4745_v41, 512  ;;  %vm1722_vm8 = vcmp.lt.s32.totalorder %v1717_v27, %v1721_v36  ;;  %vm1725_vm0 = vcmp.lt.s32.totalorder %v1720_v53, %v1724_v54  ;;  %v7984_v2 = vld [vmem:[#allocation111_spill] sm:$0xff] }
 0x265   : > { %vm1359_vm4 = vcmp.le.f32.partialorder %v7934_v13, %v5217_v46  ;;  %vm1361_vm14 = vcmp.le.f32.partialorder %v7935_v20, %v5217_v46  ;;  %v1723_v42 = vsel %vm1722_vm8, %v1717_v27, %v1721_v36  ;;  %v1726_v56 = vsel %vm1725_vm0, %v1720_v53, %v1724_v54  ;;  %v7938_v27 = vld [vmem:[#allocation75_spill] sm:$0xff]  ;;  %v7941_v54 = vld [vmem:[#allocation77_spill] sm:$0xff] }
 0x266   : > { %v1727_v31 = vsel %vm7936_vm12, %v1451_v30, 2147483647  ;;  %v1730_v63 = vsel %vm7912_vm6, %v1453_v38, 2147483647  ;;  %v1467_v5 = vsel %vm1339_vm15, %v4748_v39, 512  ;;  %v1469_v48 = vsel %vm1341_vm1, %v4751_v16, 512  ;;  %vm7939_vm12 = vmmov %vm7912_vm6 }
 0x267   : > { %vm1728_vm9 = vcmp.lt.s32.totalorder %v1723_v42, %v1727_v31  ;;  %vm1731_vm5 = vcmp.lt.s32.totalorder %v1726_v56, %v1730_v63  ;;  %vm1365_vm0 = vcmp.le.f32.partialorder %v7938_v27, %v5217_v46  ;;  %v1733_v53 = vsel %vm7939_vm12, %v1455_v51, 2147483647  ;;  %vm7943_vm12 = vmmov %vm7912_vm6 }
 0x268   : > { %v1729_v30 = vsel %vm1728_vm9, %v1723_v42, %v1727_v31  ;;  %v1732_v38 = vsel %vm1731_vm5, %v1726_v56, %v1730_v63  ;;  %v1736_v25 = vsel %vm7912_vm6, %v1457_v17, 2147483647  ;;  %vm7940_vm15 = vcmp.le.f32.partialorder %v7920_v21, %v5217_v46  ;;  %v7942_v42 = vld [vmem:[#allocation79_spill] sm:$0xff]  ;;  %v7944_v63 = vld [vmem:[#allocation81_spill] sm:$0xff] }
 0x269   : > { %v1471_v52 = vsel %vm7940_vm15, %v4754_v26, 512  ;;  %v1473_v36 = vsel %vm1345_vm2, %v4757_v44, 512  ;;  %vm1734_vm1 = vcmp.lt.s32.totalorder %v1729_v30, %v1733_v53  ;;  %vm1737_vm8 = vcmp.lt.s32.totalorder %v1732_v38, %v1736_v25 }
 0x26a   : > { %vm1367_vm9 = vcmp.le.f32.partialorder %v7941_v54, %v5217_v46  ;;  %vm1369_vm5 = vcmp.le.f32.partialorder %v7942_v42, %v5217_v46  ;;  %v1735_v51 = vsel %vm1734_vm1, %v1729_v30, %v1733_v53  ;;  %v1738_v17 = vsel %vm1737_vm8, %v1732_v38, %v1736_v25  ;;  %v7945_v30 = vld [vmem:[#allocation83_spill] sm:$0xff]  ;;  %v7948_v25 = vld [vmem:[#allocation85_spill] sm:$0xff] }
 0x26b   : > { %v1739_v56 = vsel %vm7943_vm12, %v1459_v3, 2147483647  ;;  %v1742_v21 = vsel %vm7912_vm6, %v1461_v12, 2147483647  ;;  %v1475_v23 = vsel %vm1347_vm13, %v4760_v60, 512  ;;  %v1477_v31 = vsel %vm1349_vm11, %v4763_v40, 512  ;;  %vm7946_vm12 = vmmov %vm7912_vm6 }
 0x26c   : > { %vm1740_vm2 = vcmp.lt.s32.totalorder %v1735_v51, %v1739_v56  ;;  %vm1743_vm15 = vcmp.lt.s32.totalorder %v1738_v17, %v1742_v21  ;;  %vm1373_vm8 = vcmp.le.f32.partialorder %v7945_v30, %v5217_v46  ;;  %v1745_v38 = vsel %vm7946_vm12, %v1463_v62, 2147483647  ;;  %vm7950_vm12 = vmmov %vm7912_vm6 }
 0x26d   : > { %v1741_v3 = vsel %vm1740_vm2, %v1735_v51, %v1739_v56  ;;  %v1744_v12 = vsel %vm1743_vm15, %v1738_v17, %v1742_v21  ;;  %v1748_v6 = vsel %vm7912_vm6, %v1465_v18, 2147483647  ;;  %vm7947_vm13 = vcmp.le.f32.partialorder %v7927_v61, %v5217_v46  ;;  %v7949_v51 = vld [vmem:[#allocation87_spill] sm:$0xff]  ;;  %v7951_v56 = vld [vmem:[#allocation142_spill] sm:$0xff] }
 0x26e   : > { %v1479_v57 = vsel %vm7947_vm13, %v4766_v28, 512  ;;  %v1481_v53 = vsel %vm1353_vm7, %v4769_v0, 512  ;;  %vm1746_vm11 = vcmp.lt.s32.totalorder %v1741_v3, %v1745_v38  ;;  %vm1749_vm1 = vcmp.lt.s32.totalorder %v1744_v12, %v1748_v6  ;;  %v7952_v21 = vld [vmem:[#allocation143_spill] sm:$0xff]  ;;  %v7958_v28 = vld [vmem:[#allocation93_spill] sm:$0xff] }
 0x26f   : > { %vm1375_vm2 = vcmp.le.f32.partialorder %v7948_v25, %v5217_v46  ;;  %vm1377_vm15 = vcmp.le.f32.partialorder %v7949_v51, %v5217_v46  ;;  %v1747_v62 = vsel %vm1746_vm11, %v1741_v3, %v1745_v38  ;;  %v1750_v18 = vsel %vm1749_vm1, %v1744_v12, %v1748_v6  ;;  %v7954_v3 = vld [vmem:[#allocation91_spill] sm:$0xff]  ;;  %v7956_v38 = vld [vmem:[#allocation144_spill] sm:$0xff]  ;;  %v7957_v6 = vld [vmem:[#allocation145_spill] sm:$0xff] }
 0x270   : > { %v1751_v17 = vsel %vm7950_vm12, %v1467_v5, 2147483647  ;;  %v1754_v61 = vsel %vm7912_vm6, %v1469_v48, 2147483647  ;;  %v1483_v59 = vsel %vm1355_vm10, %v7951_v56, 512  ;;  %v1485_v1 = vsel %vm1357_vm3, %v7952_v21, 512  ;;  %vm7955_vm12 = vmmov %vm7912_vm6 }
 0x271   : > { %vm1752_vm7 = vcmp.lt.s32.totalorder %v1747_v62, %v1751_v17  ;;  %vm1755_vm13 = vcmp.lt.s32.totalorder %v1750_v18, %v1754_v61  ;;  %vm1379_vm11 = vcmp.le.f32.partialorder %v7953_v49, %v5217_v46  ;;  %vm1381_vm1 = vcmp.le.f32.partialorder %v7954_v3, %v5217_v46  ;;  %v7975_v56 = vld [vmem:[#allocation105_spill] sm:$0xff] }
 0x272   : > { %v1753_v5 = vsel %vm1752_vm7, %v1747_v62, %v1751_v17  ;;  %v1756_v48 = vsel %vm1755_vm13, %v1750_v18, %v1754_v61  ;;  %v1757_v12 = vsel %vm7955_vm12, %v1471_v52, 2147483647  ;;  %v1760_v43 = vsel %vm7912_vm6, %v1473_v36, 2147483647  ;;  %v7959_v62 = vld [vmem:[#allocation95_spill] sm:$0xff]  ;;  %vm7960_vm12 = vmmov %vm7912_vm6  ;;  %v7961_v17 = vld [vmem:[#allocation146_spill] sm:$0xff] }
 0x273   : > { %v1487_v24 = vsel %vm1359_vm4, %v7956_v38, 512  ;;  %v1489_v58 = vsel %vm1361_vm14, %v7957_v6, 512  ;;  %vm1758_vm10 = vcmp.lt.s32.totalorder %v1753_v5, %v1757_v12  ;;  %vm1761_vm3 = vcmp.lt.s32.totalorder %v1756_v48, %v1760_v43  ;;  %v7963_v61 = vld [vmem:[#allocation147_spill] sm:$0xff] }
 0x274   : > { %vm1385_vm13 = vcmp.le.f32.partialorder %v7959_v62, %v5217_v46  ;;  %v1759_v52 = vsel %vm1758_vm10, %v1753_v5, %v1757_v12  ;;  %v1762_v36 = vsel %vm1761_vm3, %v1756_v48, %v1760_v43  ;;  %v1763_v18 = vsel %vm7960_vm12, %v1475_v23, 2147483647  ;;  %v7965_v5 = vld [vmem:[#allocation99_spill] sm:$0xff]  ;;  %vm7966_vm12 = vmmov %vm7912_vm6  ;;  %v7967_v12 = vld [vmem:[#allocation148_spill] sm:$0xff] }
 0x275   : > { %v1766_v13 = vsel %vm7912_vm6, %v1477_v31, 2147483647  ;;  %vm7962_vm4 = vcmp.le.f32.partialorder %v7937_v55, %v5217_v46  ;;  %v1493_v35 = vsel %vm1365_vm0, %v7963_v61, 512  ;;  %vm1764_vm14 = vcmp.lt.s32.totalorder %v1759_v52, %v1763_v18  ;;  %v7968_v43 = vld [vmem:[#allocation149_spill] sm:$0xff] }
 0x276   : > { %v1491_v20 = vsel %vm7962_vm4, %v7961_v17, 512  ;;  %vm1767_vm7 = vcmp.lt.s32.totalorder %v1762_v36, %v1766_v13  ;;  %vm1387_vm10 = vcmp.le.f32.partialorder %v7964_v29, %v5217_v46  ;;  %vm1389_vm3 = vcmp.le.f32.partialorder %v7965_v5, %v5217_v46 }
 0x277   : > { %v1765_v23 = vsel %vm1764_vm14, %v1759_v52, %v1763_v18  ;;  %v1768_v31 = vsel %vm1767_vm7, %v1762_v36, %v1766_v13  ;;  %v1769_v48 = vsel %vm7966_vm12, %v1479_v57, 2147483647  ;;  %v1772_v55 = vsel %vm7912_vm6, %v1481_v53, 2147483647  ;;  %v7970_v52 = vld [vmem:[#allocation103_spill] sm:$0xff]  ;;  %vm7971_vm12 = vmmov %vm7912_vm6  ;;  %v7972_v18 = vld [vmem:[#allocation150_spill] sm:$0xff] }
 0x278   : > { %v1495_v27 = vsel %vm1367_vm9, %v7967_v12, 512  ;;  %v1497_v0 = vsel %vm1369_vm5, %v7968_v43, 512  ;;  %vm1770_vm0 = vcmp.lt.s32.totalorder %v1765_v23, %v1769_v48  ;;  %vm1773_vm4 = vcmp.lt.s32.totalorder %v1768_v31, %v1772_v55  ;;  %v7974_v13 = vld [vmem:[#allocation151_spill] sm:$0xff] }
 0x279   : > { %vm1393_vm7 = vcmp.le.f32.partialorder %v7970_v52, %v5217_v46  ;;  %v1771_v57 = vsel %vm1770_vm0, %v1765_v23, %v1769_v48  ;;  %v1774_v53 = vsel %vm1773_vm4, %v1768_v31, %v1772_v55  ;;  %v1775_v36 = vsel %vm7971_vm12, %v1483_v59, 2147483647  ;;  %vm7976_vm4 = vmmov %vm7912_vm6  ;;  %v7978_v48 = vld [vmem:[#allocation152_spill] sm:$0xff]  ;;  %v7979_v55 = vld [vmem:[#allocation153_spill] sm:$0xff] }
 0x27a   : > { %v1778_v54 = vsel %vm7912_vm6, %v1485_v1, 2147483647  ;;  %vm7973_vm9 = vcmp.le.f32.partialorder %v7944_v63, %v5217_v46  ;;  %v1501_v14 = vsel %vm1373_vm8, %v7974_v13, 512  ;;  %vm1776_vm5 = vcmp.lt.s32.totalorder %v1771_v57, %v1775_v36  ;;  %vm7977_vm12 = vmmov %vm7976_vm4 }
 0x27b   : > { %v1499_v42 = vsel %vm7973_vm9, %v7972_v18, 512  ;;  %vm1779_vm14 = vcmp.lt.s32.totalorder %v1774_v53, %v1778_v54  ;;  %vm1395_vm0 = vcmp.le.f32.partialorder %v7975_v56, %v5217_v46  ;;  %v1777_v23 = vsel %vm1776_vm5, %v1771_v57, %v1775_v36  ;;  %v7981_v57 = vld [vmem:[#allocation109_spill] sm:$0xff]  ;;  %vm7982_vm5 = vmmov %vm7976_vm4  ;;  %v7983_v36 = vld [vmem:[#allocation154_spill] sm:$0xff] }
 0x27c   : > { %v1780_v31 = vsel %vm1779_vm14, %v1774_v53, %v1778_v54  ;;  %v1781_v59 = vsel %vm7976_vm4, %v1487_v24, 2147483647  ;;  %v1784_v1 = vsel %vm7977_vm12, %v1489_v58, 2147483647  ;;  %v1503_v63 = vsel %vm1375_vm2, %v7978_v48, 512 }
 0x27d   : > { %v1505_v30 = vsel %vm1377_vm15, %v7979_v55, 512  ;;  %vm1782_vm8 = vcmp.lt.s32.totalorder %v1777_v23, %v1781_v59  ;;  %vm1785_vm6 = vcmp.lt.s32.totalorder %v1780_v31, %v1784_v1  ;;  %vm1397_vm9 = vcmp.le.f32.partialorder %v7980_v8, %v5217_v46  ;;  %v8011_v8 = vld [vmem:[#allocation165_spill] sm:$0xff] }
 0x27e   : > { %vm1399_vm14 = vcmp.le.f32.partialorder %v7981_v57, %v5217_v46  ;;  %v1783_v24 = vsel %vm1782_vm8, %v1777_v23, %v1781_v59  ;;  %v1786_v58 = vsel %vm1785_vm6, %v1780_v31, %v1784_v1  ;;  %v1787_v53 = vsel %vm7982_vm5, %v1491_v20, 2147483647  ;;  %vm7985_vm8 = vmmov %vm7976_vm4  ;;  %v7988_v59 = vld [vmem:[#allocation113_spill] sm:$0xff]  ;;  %v7989_v1 = vld [vmem:[#allocation115_spill] sm:$0xff] }
 0x27f   : > { %v1790_v25 = vsel %vm7976_vm4, %v1493_v35, 2147483647  ;;  %v1507_v51 = vsel %vm1379_vm11, %v7983_v36, 512  ;;  %v1509_v54 = vsel %vm1381_vm1, %v4811_v9, 512  ;;  %vm1788_vm2 = vcmp.lt.s32.totalorder %v1783_v24, %v1787_v53  ;;  %vm7986_vm6 = vmmov %vm7976_vm4 }
 0x280   : > { %vm1791_vm15 = vcmp.lt.s32.totalorder %v1786_v58, %v1790_v25  ;;  %vm1401_vm12 = vcmp.le.f32.partialorder %v7984_v2, %v5217_v46  ;;  %v1789_v23 = vsel %vm1788_vm2, %v1783_v24, %v1787_v53  ;;  %v1793_v20 = vsel %vm7985_vm8, %v1495_v27, 2147483647  ;;  %vm7991_vm8 = vmmov %vm7986_vm6 }
 0x281   : > { %v1792_v31 = vsel %vm1791_vm15, %v1786_v58, %v1790_v25  ;;  %v1796_v35 = vsel %vm7986_vm6, %v1497_v0, 2147483647  ;;  %vm7987_vm11 = vcmp.le.f32.partialorder %v7958_v28, %v5217_v46  ;;  %v1513_v3 = vsel %vm1385_vm13, %v7854_v19, 512  ;;  %vm7990_vm15 = vmmov %vm7986_vm6  ;;  %v7992_v58 = vld [vmem:[#allocation158_spill] sm:$0xff]  ;;  %v7993_v25 = vld [vmem:[#allocation117_spill] sm:$0xff] }
 0x282   : > { %v1511_v49 = vsel %vm7987_vm11, %v7852_v7, 512  ;;  %vm1794_vm1 = vcmp.lt.s32.totalorder %v1789_v23, %v1793_v20  ;;  %vm1797_vm5 = vcmp.lt.s32.totalorder %v1792_v31, %v1796_v35  ;;  %vm1403_vm4 = vcmp.le.f32.partialorder %v7988_v59, %v5217_v46  ;;  %v7999_v7 = vld [vmem:[#allocation119_spill] sm:$0xff] }
 0x283   : > { %vm1405_vm2 = vcmp.le.f32.partialorder %v7989_v1, %v5217_v46  ;;  %v1795_v27 = vsel %vm1794_vm1, %v1789_v23, %v1793_v20  ;;  %v1798_v0 = vsel %vm1797_vm5, %v1792_v31, %v1796_v35  ;;  %v1799_v24 = vsel %vm7990_vm15, %v1499_v42, 2147483647  ;;  %vm7994_vm1 = vmmov %vm7991_vm8  ;;  %v7996_v20 = vld [vmem:[#allocation159_spill] sm:$0xff]  ;;  %v7998_v35 = vld [vmem:[#allocation160_spill] sm:$0xff] }
 0x284   : > { %v1802_v28 = vsel %vm7991_vm8, %v1501_v14, 2147483647  ;;  %v1515_v62 = vsel %vm1387_vm10, %v7855_v22, 512  ;;  %v1517_v53 = vsel %vm1389_vm3, %v7992_v58, 512  ;;  %vm1800_vm13 = vcmp.lt.s32.totalorder %v1795_v27, %v1799_v24  ;;  %vm7995_vm5 = vmmov %vm7994_vm1  ;;  %v8003_v19 = vld [vmem:[#allocation123_spill] sm:$0xff] }
 0x285   : > { %vm1803_vm6 = vcmp.lt.s32.totalorder %v1798_v0, %v1802_v28  ;;  %vm1407_vm11 = vcmp.le.f32.partialorder %v7993_v25, %v5217_v46  ;;  %v1801_v23 = vsel %vm1800_vm13, %v1795_v27, %v1799_v24  ;;  %v1805_v42 = vsel %vm7994_vm1, %v1503_v63, 2147483647  ;;  %v8000_v27 = vld [vmem:[#allocation121_spill] sm:$0xff] }
 0x286   : > { %v1804_v31 = vsel %vm1803_vm6, %v1798_v0, %v1802_v28  ;;  %v1808_v14 = vsel %vm7995_vm5, %v1505_v30, 2147483647  ;;  %vm7997_vm10 = vcmp.le.f32.partialorder %v7969_v33, %v5217_v46  ;;  %v1521_v5 = vsel %vm1393_vm7, %v7998_v35, 512  ;;  %vm8001_vm6 = vmmov %vm7994_vm1  ;;  %v8002_v28 = vld [vmem:[#allocation161_spill] sm:$0xff] }
 0x287   : > { %v1519_v29 = vsel %vm7997_vm10, %v7996_v20, 512  ;;  %vm1806_vm3 = vcmp.lt.s32.totalorder %v1801_v23, %v1805_v42  ;;  %vm1809_vm15 = vcmp.lt.s32.totalorder %v1804_v31, %v1808_v14  ;;  %vm1409_vm8 = vcmp.le.f32.partialorder %v7999_v7, %v5217_v46 }
 0x288   : > { %vm1411_vm13 = vcmp.le.f32.partialorder %v8000_v27, %v5217_v46  ;;  %v1807_v63 = vsel %vm1806_vm3, %v1801_v23, %v1805_v42  ;;  %v1810_v30 = vsel %vm1809_vm15, %v1804_v31, %v1808_v14  ;;  %v1811_v0 = vsel %vm8001_vm6, %v1507_v51, 2147483647  ;;  %vm8004_vm3 = vmmov %vm7994_vm1  ;;  %v8006_v31 = vld [vmem:[#allocation163_spill] sm:$0xff]  ;;  %v8007_v42 = vld [vmem:[#allocation164_spill] sm:$0xff] }
 0x289   : > { %v1814_v33 = vsel %vm7994_vm1, %v1509_v54, 2147483647  ;;  %v1668_v24 = vrot.slane %v5295_v11, 4  ;;  %v1523_v52 = vsel %vm1395_vm0, %v8002_v28, 512  ;;  %vm1812_vm7 = vcmp.lt.s32.totalorder %v1807_v63, %v1811_v0  ;;  %vm8005_vm15 = vmmov %vm7994_vm1 }
 0x28a   : > { %vm1815_vm5 = vcmp.lt.s32.totalorder %v1810_v30, %v1814_v33  ;;  %vm1413_vm10 = vcmp.le.f32.partialorder %v8003_v19, %v5217_v46  ;;  %v1813_v22 = vsel %vm1812_vm7, %v1807_v63, %v1811_v0  ;;  %v1817_v23 = vsel %vm8004_vm3, %v1511_v49, 2147483647  ;;  %vm8008_vm7 = vmmov %vm7994_vm1 }
 0x28b   : > { %v1816_v58 = vsel %vm1815_vm5, %v1810_v30, %v1814_v33  ;;  %v1820_v51 = vsel %vm8005_vm15, %v1513_v3, 2147483647  ;;  %v1525_v54 = vsel %vm1397_vm9, %v8006_v31, 512  ;;  %v1527_v56 = vsel %vm1399_vm14, %v8007_v42, 512  ;;  %vm8012_vm3 = vmmov %vm7994_vm1  ;;  %v8015_v33 = vld [vmem:[#allocation15_spill] sm:$0xff] }
 0x28c   : > { %vm1818_vm0 = vcmp.lt.s32.totalorder %v1813_v22, %v1817_v23  ;;  %vm1821_vm6 = vcmp.lt.s32.totalorder %v1816_v58, %v1820_v51  ;;  %v1823_v63 = vsel %vm7994_vm1, %v1515_v62, 2147483647  ;;  %v1826_v49 = vsel %vm8008_vm7, %v1517_v53, 2147483647  ;;  %vm8013_vm15 = vmmov %vm7994_vm1  ;;  %v8021_v3 = vld [vmem:[#allocation167_spill] sm:$0xff] }
 0x28d   : > { %v1819_v14 = vsel %vm1818_vm0, %v1813_v22, %v1817_v23  ;;  %v1822_v20 = vsel %vm1821_vm6, %v1816_v58, %v1820_v51  ;;  %vm5658_vm5 = vcmp.lt.s32.totalorder %v5295_v11, %v1668_v24  ;;  %v1529_v30 = vsel %vm1401_vm12, %v8011_v8, 512  ;;  %v8014_v58 = vld [vmem:[#allocation166_spill] sm:$0xff]  ;;  %vm8016_vm6 = vmmov %vm7994_vm1 }
 0x28e   : > { %vm1824_vm9 = vcmp.lt.s32.totalorder %v1819_v14, %v1823_v63  ;;  %vm1827_vm14 = vcmp.lt.s32.totalorder %v1822_v20, %v1826_v49  ;;  %v1829_v22 = vsel %vm8012_vm3, %v1519_v29, 2147483647  ;;  %v1832_v62 = vsel %vm8013_vm15, %v1521_v5, 2147483647  ;;  %vm8023_vm3 = vmmov %vm7994_vm1 }
 0x28f   : > { %v1825_v57 = vsel %vm1824_vm9, %v1819_v14, %v1823_v63  ;;  %v1828_v0 = vsel %vm1827_vm14, %v1822_v20, %v1826_v49  ;;  %v1531_v53 = vsel %vm1403_vm4, %v8014_v58, 512  ;;  %v1533_v23 = vsel %vm1405_vm2, %v8015_v33, 512  ;;  %v8017_v14 = vld [vmem:[#allocation17_spill] sm:$0xff]  ;;  %vm8018_vm2 = vmmov %vm7994_vm1 }
 0x290   : > { %vm1830_vm0 = vcmp.lt.s32.totalorder %v1825_v57, %v1829_v22  ;;  %vm1833_vm12 = vcmp.lt.s32.totalorder %v1828_v0, %v1832_v62  ;;  %v1835_v20 = vsel %vm8016_vm6, %v1523_v52, 2147483647  ;;  %v1838_v29 = vsel %vm7994_vm1, %v1525_v54, 2147483647  ;;  %vm8019_vm9 = vmmov %vm7994_vm1  ;;  %v8020_v52 = vld [vmem:[#allocation19_spill] sm:$0xff] }
 0x291   : > { %v1831_v2 = vsel %vm1830_vm0, %v1825_v57, %v1829_v22  ;;  %v1834_v51 = vsel %vm1833_vm12, %v1828_v0, %v1832_v62  ;;  %v1670_v5 = vsel %vm5658_vm5, %v5295_v11, %v1668_v24  ;;  %v1535_v59 = vsel %vm1407_vm11, %v8017_v14, 512  ;;  %vm8022_vm14 = vmmov %vm7994_vm1 }
 0x292   : > { %vm1836_vm4 = vcmp.lt.s32.totalorder %v1831_v2, %v1835_v20  ;;  %vm1839_vm7 = vcmp.lt.s32.totalorder %v1834_v51, %v1838_v29  ;;  %v1841_v49 = vsel %vm8018_vm2, %v1527_v56, 2147483647  ;;  %v1844_v57 = vsel %vm8019_vm9, %v1529_v30, 2147483647  ;;  %v8024_v30 = vld [vmem:[#allocation168_spill] sm:$0xff]  ;;  %vm8025_vm0 = vmmov %vm7994_vm1 }
 0x293   : > { %v1837_v1 = vsel %vm1836_vm4, %v1831_v2, %v1835_v20  ;;  %v1840_v63 = vsel %vm1839_vm7, %v1834_v51, %v1838_v29  ;;  %v1537_v54 = vsel %vm1409_vm8, %v8020_v52, 512  ;;  %v1539_v11 = vsel %vm1411_vm13, %v8021_v3, 512  ;;  %vm8026_vm13 = vmmov %vm8025_vm0 }
 0x294   : > { %vm1842_vm5 = vcmp.lt.s32.totalorder %v1837_v1, %v1841_v49  ;;  %vm1845_vm11 = vcmp.lt.s32.totalorder %v1840_v63, %v1844_v57  ;;  %v1847_v0 = vsel %vm8022_vm14, %v1531_v53, 2147483647  ;;  %v1850_v56 = vsel %vm8023_vm3, %v1533_v23, 2147483647  ;;  %vm8027_vm1 = vmmov %vm8025_vm0 }
 0x295   : > { %v1843_v25 = vsel %vm1842_vm5, %v1837_v1, %v1841_v49  ;;  %v1846_v24 = vsel %vm1845_vm11, %v1840_v63, %v1844_v57  ;;  %v1671_v22 = vrot.slane %v1670_v5, 2  ;;  %v1541_v7 = vsel %vm1413_vm10, %v8024_v30, 512  ;;  %vm8028_vm4 = vmmov %vm8025_vm0 }
 0x296   : > { %vm1848_vm8 = vcmp.lt.s32.totalorder %v1843_v25, %v1847_v0  ;;  %vm1851_vm15 = vcmp.lt.s32.totalorder %v1846_v24, %v1850_v56  ;;  %v1853_v27 = vsel %vm8025_vm0, %v1535_v59, 2147483647  ;;  %v1856_v51 = vsel %vm8026_vm13, %v1537_v54, 2147483647 }
 0x297   : > { %v1849_v62 = vsel %vm1848_vm8, %v1843_v25, %v1847_v0  ;;  %v1852_v2 = vsel %vm1851_vm15, %v1846_v24, %v1850_v56  ;;  %v1859_v23 = vsel %vm8027_vm1, %v1539_v11, 2147483647  ;;  %v1862_v29 = vsel %vm8028_vm4, %v1541_v7, 2147483647 }
 0x298   : > { %vm1854_vm12 = vcmp.lt.s32.totalorder %v1849_v62, %v1853_v27  ;;  %vm1857_vm6 = vcmp.lt.s32.totalorder %v1852_v2, %v1856_v51  ;;  %vm1672_vm9 = vcmp.lt.s32.totalorder %v1670_v5, %v1671_v22  ;;  %v8029_v56 = vmov 0.0  }
 0x299   : > { %v1855_v20 = vsel %vm1854_vm12, %v1849_v62, %v1853_v27  ;;  %v1858_v53 = vsel %vm1857_vm6, %v1852_v2, %v1856_v51  ;;  %v1673_v63 = vsel %vm1672_vm9, %v1670_v5, %v1671_v22  ;;  %v5715_v5 = vld [vmem:[#allocation2 + $0x40] sm:$0xff]  ;;  %vm8030_vm12 = vmmov %vm8027_vm1 }
 0x29a   : > { %vm1860_vm7 = vcmp.lt.s32.totalorder %v1855_v20, %v1859_v23  ;;  %vm1863_vm2 = vcmp.lt.s32.totalorder %v1858_v53, %v1862_v29  ;;  %v1674_v59 = vrot.slane %v1673_v63, 1  ;;  %v8035_v51 = vld [vmem:[#allocation130_spill] sm:$0xff] }
 0x29b   : > { %v1861_v19 = vsel %vm1860_vm7, %v1855_v20, %v1859_v23  ;;  %v1864_v46 = vsel %vm1863_vm2, %v1858_v53, %v1862_v29  ;;  %vm8031_vm7 = vmmov %vm8030_vm12  ;;  %v8037_v53 = vld [vmem:[#allocation129_spill] sm:$0xff]  ;;  %v8038_v23 = vld [vmem:[#allocation128_spill] sm:$0xff] }
 0x29c   : > { %vm1865_vm10 = vcmp.lt.s32.totalorder %v1861_v19, %v1864_v46  ;;  %vm1675_vm14 = vcmp.lt.s32.totalorder %v1673_v63, %v1674_v59 }
 0x29d   : > { %v1866_v1 = vsel %vm1865_vm10, %v1861_v19, %v1864_v46  ;;  %v5705_v11 = vsel %vm1675_vm14, %v1673_v63, %v1674_v59  ;;  %v8040_v19 = vld [vmem:[#allocation127_spill] sm:$0xff]  ;;  %v8041_v46 = vld [vmem:[#allocation126_spill] sm:$0xff]  ;;  %v8043_v63 = vld [vmem:[#allocation125_spill] sm:$0xff] }
 0x29e   : > { %v1867_v49 = vrot.slane %v1866_v1, 4  ;;  %vm7496_vm13 = vcmp.eq.s32.totalorder %v4715_v4, %v5705_v11  ;;  %vm1970_vm1 = vcmp.eq.s32.totalorder %v4811_v9, %v5705_v11  ;;  %vm7490_vm4 = vcmp.eq.s32.totalorder %v4712_v10, %v5705_v11 }
 0x29f   : > { %vm7484_vm10 = vcmp.eq.s32.totalorder %v4709_v34, %v5705_v11  ;;  %vm7480_vm14 = vcmp.eq.s32.totalorder %v4706_v45, %v5705_v11 }
 0x2a0   : > { %vm1868_vm5 = vcmp.lt.s32.totalorder %v1866_v1, %v1867_v49 }
 0x2a1   : > { %v1869_v57 = vsel %vm1868_vm5, %v1866_v1, %v1867_v49  ;;  %v8044_v49 = vld [vmem:[#allocation124_spill] sm:$0xff] }
 0x2a2   : > { %v1870_v54 = vrot.slane %v1869_v57, 2 }
 0x2a4   : > { %vm1871_vm11 = vcmp.lt.s32.totalorder %v1869_v57, %v1870_v54 }
 0x2a5   : > { %v1872_v25 = vsel %vm1871_vm11, %v1869_v57, %v1870_v54  ;;  %vm1968_vm11 = vcmp.eq.s32.totalorder %v7983_v36, %v5705_v11 }
 0x2a6   : > { %v1873_v24 = vrot.slane %v1872_v25, 1 }
 0x2a8   : > { %vm1874_vm3 = vcmp.lt.s32.totalorder %v1872_v25, %v1873_v24 }
 0x2a9   : > { %v5707_v0 = vsel %vm1874_vm3, %v1872_v25, %v1873_v24  ;;  %vm8032_vm3 = vmmov %vm8031_vm7  ;;  %v8049_v24 = vld [vmem:[#allocation139_spill] sm:$0xff] }
 0x2aa   : > { %vm7497_vm8 = vcmp.eq.s32.totalorder %v4715_v4, %v5707_v0  ;;  %vm1971_vm15 = vcmp.eq.s32.totalorder %v4811_v9, %v5707_v0  ;;  %vm1969_vm0 = vcmp.eq.s32.totalorder %v7983_v36, %v5707_v0  ;;  %vm7491_vm6 = vcmp.eq.s32.totalorder %v4712_v10, %v5707_v0  ;;  %v2268_v36 = vld [vmem:[%s7225_s2 + $0x40] sm:$0xff] }
 0x2ab   : > { %3295 = vmatprep.subr.msk.mxu1 %vm7497_vm8, %v5715_v5  ;;  %v3262_v22 = vsel %vm1971_vm15, 1.0, %v8029_v56  ;;  %v3260_v7 = vsel %vm1969_vm0, 1.0, %v8029_v56  ;;  %vm7485_vm2 = vcmp.eq.s32.totalorder %v4709_v34, %v5707_v0  ;;  %vm1967_vm9 = vcmp.eq.s32.totalorder %v7979_v55, %v5707_v0 }
 0x2ac   : > { %3296 = vmatpush1.msk.msra.mxu1 %vm7496_vm13, %v5715_v5  ;;  %3488 = vmatprep.subr.msk.mxu0 %vm8030_vm12, %v3262_v22  ;;  %vm7479_vm5 = vcmp.eq.s32.totalorder %v4706_v45, %v5707_v0  ;;  %v3258_v62 = vsel %vm1967_vm9, 1.0, %v8029_v56  ;;  %vm7481_vm12 = vcmp.eq.s32.totalorder %v4703_v15, %v5707_v0  ;;  %vm7503_vm13 = vcmp.eq.s32.totalorder %v7968_v43, %v5707_v0 }
 0x2ad   : > { %3297 = vmatprep.subr.msk.mxu1 %vm7491_vm6, %v5715_v5  ;;  %3489 = vmatpush1.xpose.msk.msra.mxu0 %vm1970_vm1, %v5715_v5  ;;  %vm7494_vm6 = vcmp.eq.s32.totalorder %v4691_v37, %v5705_v11  ;;  %vm7500_vm8 = vcmp.eq.s32.totalorder %v8037_v53, %v5705_v11  ;;  %v3250_v29 = vsel %vm7503_vm13, 1.0, %v8029_v56  ;;  %vm7506_vm13 = vcmp.eq.s32.totalorder %v8040_v19, %v5705_v11 }
 0x2ae   : > { %3298 = vmatpush1.msk.msra.mxu1 %vm7490_vm4, %v5715_v5  ;;  %3490 = vmatprep.subr.msk.mxu0 %vm8031_vm7, %v3260_v7  ;;  %vm1965_vm7 = vcmp.eq.s32.totalorder %v7978_v48, %v5707_v0  ;;  %vm1961_vm4 = vcmp.eq.s32.totalorder %v7972_v18, %v5707_v0  ;;  %v8051_v7 = vld [vmem:[#allocation138_spill] sm:$0xff] }
 0x2af   : > { %3299 = vmatprep.subr.msk.mxu1 %vm7485_vm2, %v5715_v5  ;;  %v3256_v2 = vsel %vm1965_vm7, 1.0, %v8029_v56  ;;  %vm7488_vm2 = vcmp.eq.s32.totalorder %v4697_v32, %v5705_v11  ;;  %v3252_v20 = vsel %vm1961_vm4, 1.0, %v8029_v56 }
 0x2b0   : > { %3300 = vmatpush1.msk.msra.mxu1 %vm7484_vm10, %v5715_v5  ;;  %vm1963_vm10 = vcmp.eq.s32.totalorder %v7974_v13, %v5707_v0 }
 0x2b1   : > { %3301 = vmatprep.subr.msk.mxu1 %vm7479_vm5, %v5715_v5  ;;  %3491 = vmatpush1.xpose.msk.msra.mxu0 %vm1968_vm11, %v5715_v5  ;;  %vm7482_vm5 = vcmp.eq.s32.totalorder %v4703_v15, %v5705_v11  ;;  %v3254_v27 = vsel %vm1963_vm10, 1.0, %v8029_v56 }
 0x2b2   : > { %3302 = vmatpush1.msk.msra.mxu1 %vm7480_vm14, %v5715_v5  ;;  %3492 = vmatprep.subr.msk.mxu0 %vm8032_vm3, %v3258_v62  ;;  %vm7483_vm3 = vcmp.eq.s32.totalorder %v4700_v50, %v5707_v0  ;;  %vm1966_vm14 = vcmp.eq.s32.totalorder %v7979_v55, %v5705_v11  ;;  %v8052_v62 = vld [vmem:[#allocation142_spill] sm:$0xff] }
 0x2b3   : > { %3303 = vmatprep.subr.msk.mxu1 %vm7481_vm12, %v5715_v5  ;;  %vm7486_vm12 = vcmp.eq.s32.totalorder %v4700_v50, %v5705_v11 }
 0x2b4   : > { %3304 = vmatpush1.msk.msra.mxu1 %vm7482_vm5, %v5715_v5  ;;  %vm8033_vm5 = vcmask 588800  }
 0x2b5   : > { %3305 = vmatprep.subr.msk.mxu1 %vm7483_vm3, %v5715_v5  ;;  %3493 = vmatpush1.xpose.msk.msra.mxu0 %vm1966_vm14, %v5715_v5  ;;  %vm7487_vm3 = vcmp.eq.s32.totalorder %v4697_v32, %v5707_v0 }
 0x2b6   : > { %3306 = vmatpush1.msk.msra.mxu1 %vm7486_vm12, %v5715_v5  ;;  %3494 = vmatprep.subr.msk.mxu0 %vm8033_vm5, %v3256_v2  ;;  %vm7489_vm5 = vcmp.eq.s32.totalorder %v4694_v47, %v5707_v0  ;;  %vm1964_vm12 = vcmp.eq.s32.totalorder %v7978_v48, %v5705_v11  ;;  %v8053_v2 = vld [vmem:[#allocation137_spill] sm:$0xff]  ;;  %v2272_v48 = vld [vmem:[%s7225_s2 + $0x60] sm:$0xff] }
 0x2b7   : > { %3307 = vmatprep.subr.msk.mxu1 %vm7487_vm3, %v5715_v5  ;;  %vm7492_vm3 = vcmp.eq.s32.totalorder %v4694_v47, %v5705_v11 }
 0x2b8   : > { %3308 = vmatpush1.msk.msra.mxu1 %vm7488_vm2, %v5715_v5  ;;  %vm8034_vm2 = vcmask 588800  }
 0x2b9   : > { %3309 = vmatprep.subr.msk.mxu1 %vm7489_vm5, %v5715_v5  ;;  %3495 = vmatpush1.xpose.msk.msra.mxu0 %vm1964_vm12, %v5715_v5  ;;  %vm7493_vm5 = vcmp.eq.s32.totalorder %v4691_v37, %v5707_v0 }
 0x2ba   : > { %3310 = vmatpush1.msk.msra.mxu1 %vm7492_vm3, %v5715_v5  ;;  %3496 = vmatprep.subr.msk.mxu0 %vm8034_vm2, %v3254_v27  ;;  %vm7495_vm2 = vcmp.eq.s32.totalorder %v8035_v51, %v5707_v0  ;;  %vm1962_vm3 = vcmp.eq.s32.totalorder %v7974_v13, %v5705_v11 }
 0x2bb   : > { %3311 = vmatprep.subr.msk.mxu1 %vm7493_vm5, %v5715_v5  ;;  %vm7498_vm5 = vcmp.eq.s32.totalorder %v8035_v51, %v5705_v11 }
 0x2bc   : > { %3312 = vmatpush1.msk.msra.mxu1 %vm7494_vm6, %v5715_v5  ;;  %vm8036_vm6 = vcmask 588800  }
 0x2bd   : > { %3313 = vmatprep.subr.msk.mxu1 %vm7495_vm2, %v5715_v5  ;;  %3497 = vmatpush1.xpose.msk.msra.mxu0 %vm1962_vm3, %v5715_v5  ;;  %vm7499_vm2 = vcmp.eq.s32.totalorder %v8037_v53, %v5707_v0 }
 0x2be   : > { %3314 = vmatpush1.msk.msra.mxu1 %vm7498_vm5, %v5715_v5  ;;  %3498 = vmatprep.subr.msk.mxu0 %vm8036_vm6, %v3252_v20  ;;  %vm7501_vm6 = vcmp.eq.s32.totalorder %v8038_v23, %v5707_v0  ;;  %vm7502_vm5 = vcmp.eq.s32.totalorder %v7972_v18, %v5705_v11  ;;  %v8055_v20 = vld [vmem:[#allocation136_spill] sm:$0xff] }
 0x2bf   : > { %3315 = vmatprep.subr.msk.mxu1 %vm7499_vm2, %v5715_v5  ;;  %vm7504_vm2 = vcmp.eq.s32.totalorder %v8038_v23, %v5705_v11 }
 0x2c0   : > { %3316 = vmatpush1.msk.msra.mxu1 %vm7500_vm8, %v5715_v5  ;;  %vm8039_vm8 = vcmask 588800  }
 0x2c1   : > { %3317 = vmatprep.subr.msk.mxu1 %vm7501_vm6, %v5715_v5  ;;  %3499 = vmatpush1.xpose.msk.msra.mxu0 %vm7502_vm5, %v5715_v5  ;;  %vm7505_vm6 = vcmp.eq.s32.totalorder %v8040_v19, %v5707_v0  ;;  %vm7509_vm5 = vcmp.eq.s32.totalorder %v7967_v12, %v5707_v0 }
 0x2c2   : > { %3318 = vmatpush1.msk.msra.mxu1 %vm7504_vm2, %v5715_v5  ;;  %3500 = vmatprep.subr.msk.mxu0 %vm8039_vm8, %v3250_v29  ;;  %vm7507_vm8 = vcmp.eq.s32.totalorder %v8041_v46, %v5707_v0  ;;  %vm7508_vm2 = vcmp.eq.s32.totalorder %v7968_v43, %v5705_v11  ;;  %v3248_v1 = vsel %vm7509_vm5, 1.0, %v8029_v56  ;;  %vm7512_vm5 = vcmp.eq.s32.totalorder %v8043_v63, %v5705_v11  ;;  %v8056_v29 = vld [vmem:[#allocation141_spill] sm:$0xff] }
 0x2c3   : > { %3319 = vmatprep.subr.msk.mxu1 %vm7505_vm6, %v5715_v5  ;;  %vm7510_vm6 = vcmp.eq.s32.totalorder %v8041_v46, %v5705_v11 }
 0x2c4   : > { %3320 = vmatpush1.msk.msra.mxu1 %vm7506_vm13, %v5715_v5  ;;  %vm8042_vm13 = vcmask 588800  }
 0x2c5   : > { %3321 = vmatprep.subr.msk.mxu1 %vm7507_vm8, %v5715_v5  ;;  %3501 = vmatpush1.xpose.msk.msra.mxu0 %vm7508_vm2, %v5715_v5  ;;  %vm7511_vm8 = vcmp.eq.s32.totalorder %v8043_v63, %v5707_v0  ;;  %vm7515_vm2 = vcmp.eq.s32.totalorder %v7963_v61, %v5707_v0 }
 0x2c6   : > { %3322 = vmatpush1.msk.msra.mxu1 %vm7510_vm6, %v5715_v5  ;;  %3502 = vmatprep.subr.msk.mxu0 %vm8042_vm13, %v3248_v1  ;;  %vm7513_vm13 = vcmp.eq.s32.totalorder %v8044_v49, %v5707_v0  ;;  %vm7514_vm6 = vcmp.eq.s32.totalorder %v7967_v12, %v5705_v11  ;;  %v3246_v59 = vsel %vm7515_vm2, 1.0, %v8029_v56  ;;  %vm7518_vm2 = vcmp.eq.s32.totalorder %v4763_v40, %v5705_v11  ;;  %v8057_v1 = vld [vmem:[#allocation135_spill] sm:$0xff] }
 0x2c7   : > { %3323 = vmatprep.subr.msk.mxu1 %vm7511_vm8, %v5715_v5  ;;  %vm7516_vm8 = vcmp.eq.s32.totalorder %v8044_v49, %v5705_v11 }
 0x2c8   : > { %3324 = vmatpush1.msk.msra.mxu1 %vm7512_vm5, %v5715_v5  ;;  %vm8045_vm5 = vcmask 588800  }
 0x2c9   : > { %3325 = vmatprep.subr.msk.mxu1 %vm7513_vm13, %v5715_v5  ;;  %3503 = vmatpush1.xpose.msk.msra.mxu0 %vm7514_vm6, %v5715_v5  ;;  %vm7517_vm13 = vcmp.eq.s32.totalorder %v4763_v40, %v5707_v0  ;;  %vm7521_vm6 = vcmp.eq.s32.totalorder %v7961_v17, %v5707_v0 }
 0x2ca   : > { %3326 = vmatpush1.msk.msra.mxu1 %vm7516_vm8, %v5715_v5  ;;  %3504 = vmatprep.subr.msk.mxu0 %vm8045_vm5, %v3246_v59  ;;  %vm7519_vm5 = vcmp.eq.s32.totalorder %v4760_v60, %v5707_v0  ;;  %vm7520_vm8 = vcmp.eq.s32.totalorder %v7963_v61, %v5705_v11  ;;  %v3244_v57 = vsel %vm7521_vm6, 1.0, %v8029_v56  ;;  %vm7524_vm6 = vcmp.eq.s32.totalorder %v4757_v44, %v5705_v11 }
 0x2cb   : > { %3327 = vmatprep.subr.msk.mxu1 %vm7517_vm13, %v5715_v5  ;;  %vm7522_vm13 = vcmp.eq.s32.totalorder %v4760_v60, %v5705_v11 }
 0x2cc   : > { %3328 = vmatpush2.msk.msra.mxu1 %vm7518_vm2, %v5715_v5  ;;  %vm8046_vm2 = vcmask 588800  }
 0x2cd   : > { %3329 = vmatprep.subr.msk.mxu1 %vm7519_vm5, %v5715_v5  ;;  %3505 = vmatpush1.xpose.msk.msra.mxu0 %vm7520_vm8, %v5715_v5  ;;  %vm7523_vm5 = vcmp.eq.s32.totalorder %v4757_v44, %v5707_v0  ;;  %vm7527_vm8 = vcmp.eq.s32.totalorder %v7957_v6, %v5707_v0 }
 0x2ce   : > { %3330 = vmatpush2.msk.msra.mxu1 %vm7522_vm13, %v5715_v5  ;;  %3506 = vmatprep.subr.msk.mxu0 %vm8046_vm2, %v3244_v57  ;;  %vm7525_vm2 = vcmp.eq.s32.totalorder %v4754_v26, %v5707_v0  ;;  %vm7526_vm13 = vcmp.eq.s32.totalorder %v7961_v17, %v5705_v11  ;;  %v3242_v54 = vsel %vm7527_vm8, 1.0, %v8029_v56  ;;  %vm7530_vm8 = vcmp.eq.s32.totalorder %v4751_v16, %v5705_v11  ;;  %v8059_v57 = vld [vmem:[#allocation134_spill] sm:$0xff] }
 0x2cf   : > { %3331 = vmatprep.subr.msk.mxu1 %vm7523_vm5, %v5715_v5  ;;  %vm7528_vm5 = vcmp.eq.s32.totalorder %v4754_v26, %v5705_v11 }
 0x2d0   : > { %3332 = vmatpush2.msk.msra.mxu1 %vm7524_vm6, %v5715_v5  ;;  %vm8047_vm6 = vcmask 588800  }
 0x2d1   : > { %3333 = vmatprep.subr.msk.mxu1 %vm7525_vm2, %v5715_v5  ;;  %3507 = vmatpush1.xpose.msk.msra.mxu0 %vm7526_vm13, %v5715_v5  ;;  %vm7529_vm2 = vcmp.eq.s32.totalorder %v4751_v16, %v5707_v0  ;;  %vm7533_vm13 = vcmp.eq.s32.totalorder %v7956_v38, %v5707_v0 }
 0x2d2   : > { %3334 = vmatpush2.msk.msra.mxu1 %vm7528_vm5, %v5715_v5  ;;  %3508 = vmatprep.subr.msk.mxu0 %vm8047_vm6, %v3242_v54  ;;  %vm7531_vm6 = vcmp.eq.s32.totalorder %v4748_v39, %v5707_v0  ;;  %vm7532_vm5 = vcmp.eq.s32.totalorder %v7957_v6, %v5705_v11  ;;  %v3240_v25 = vsel %vm7533_vm13, 1.0, %v8029_v56  ;;  %vm7536_vm13 = vcmp.eq.s32.totalorder %v4745_v41, %v5705_v11  ;;  %v8060_v54 = vld [vmem:[#allocation140_spill] sm:$0xff] }
 0x2d3   : > { %3335 = vmatprep.subr.msk.mxu1 %vm7529_vm2, %v5715_v5  ;;  %vm7534_vm2 = vcmp.eq.s32.totalorder %v4748_v39, %v5705_v11 }
 0x2d4   : > { %3336 = vmatpush2.msk.msra.mxu1 %vm7530_vm8, %v5715_v5  ;;  %vm8048_vm8 = vcmask 588800  }
 0x2d5   : > { %3337 = vmatprep.subr.msk.mxu1 %vm7531_vm6, %v5715_v5  ;;  %3509 = vmatpush1.xpose.msk.msra.mxu0 %vm7532_vm5, %v5715_v5  ;;  %vm7535_vm6 = vcmp.eq.s32.totalorder %v4745_v41, %v5707_v0  ;;  %vm7539_vm5 = vcmp.eq.s32.totalorder %v7952_v21, %v5707_v0 }
 0x2d6   : > { %3338 = vmatpush2.msk.msra.mxu1 %vm7534_vm2, %v5715_v5  ;;  %3510 = vmatprep.subr.msk.mxu0 %vm8048_vm8, %v3240_v25  ;;  %vm7537_vm8 = vcmp.eq.s32.totalorder %v8049_v24, %v5707_v0  ;;  %vm7538_vm2 = vcmp.eq.s32.totalorder %v7956_v38, %v5705_v11  ;;  %v3238_v22 = vsel %vm7539_vm5, 1.0, %v8029_v56  ;;  %vm7542_vm5 = vcmp.eq.s32.totalorder %v8051_v7, %v5705_v11  ;;  %v8061_v25 = vld [vmem:[#allocation133_spill] sm:$0xff] }
 0x2d7   : > { %3339 = vmatprep.subr.msk.mxu1 %vm7535_vm6, %v5715_v5  ;;  %vm7540_vm6 = vcmp.eq.s32.totalorder %v8049_v24, %v5705_v11 }
 0x2d8   : > { %3340 = vmatpush2.msk.msra.mxu1 %vm7536_vm13, %v5715_v5  ;;  %vm8050_vm13 = vcmask 588800  }
 0x2d9   : > { %3341 = vmatprep.subr.msk.mxu1 %vm7537_vm8, %v5715_v5  ;;  %3511 = vmatpush1.xpose.msk.msra.mxu0 %vm7538_vm2, %v5715_v5  ;;  %vm7541_vm8 = vcmp.eq.s32.totalorder %v8051_v7, %v5707_v0  ;;  %vm7545_vm2 = vcmp.eq.s32.totalorder %v8052_v62, %v5707_v0 }
 0x2da   : > { %3342 = vmatpush2.msk.msra.mxu1 %vm7540_vm6, %v5715_v5  ;;  %3512 = vmatprep.subr.msk.mxu0 %vm8050_vm13, %v3238_v22  ;;  %vm7543_vm13 = vcmp.eq.s32.totalorder %v8053_v2, %v5707_v0  ;;  %vm7544_vm6 = vcmp.eq.s32.totalorder %v7952_v21, %v5705_v11  ;;  %v3236_v27 = vsel %vm7545_vm2, 1.0, %v8029_v56  ;;  %vm7548_vm2 = vcmp.eq.s32.totalorder %v8055_v20, %v5705_v11 }
 0x2db   : > { %3343 = vmatprep.subr.msk.mxu1 %vm7541_vm8, %v5715_v5  ;;  %vm7546_vm8 = vcmp.eq.s32.totalorder %v8053_v2, %v5705_v11 }
 0x2dc   : > { %3344 = vmatpush2.msk.msra.mxu1 %vm7542_vm5, %v5715_v5  ;;  %vm8054_vm5 = vcmask 588800  }
 0x2dd   : > { %3345 = vmatprep.subr.msk.mxu1 %vm7543_vm13, %v5715_v5  ;;  %3513 = vmatpush1.xpose.msk.msra.mxu0 %vm7544_vm6, %v5715_v5  ;;  %vm7547_vm13 = vcmp.eq.s32.totalorder %v8055_v20, %v5707_v0  ;;  %vm7551_vm6 = vcmp.eq.s32.totalorder %v8056_v29, %v5707_v0 }
 0x2de   : > { %3346 = vmatpush2.msk.msra.mxu1 %vm7546_vm8, %v5715_v5  ;;  %3514 = vmatprep.subr.msk.mxu0 %vm8054_vm5, %v3236_v27  ;;  %vm7549_vm5 = vcmp.eq.s32.totalorder %v8057_v1, %v5707_v0  ;;  %vm7550_vm8 = vcmp.eq.s32.totalorder %v8052_v62, %v5705_v11  ;;  %v3234_v59 = vsel %vm7551_vm6, 1.0, %v8029_v56  ;;  %vm7554_vm6 = vcmp.eq.s32.totalorder %v8059_v57, %v5705_v11  ;;  %v8063_v27 = vld [vmem:[#allocation132_spill] sm:$0xff] }
 0x2df   : > { %3347 = vmatprep.subr.msk.mxu1 %vm7547_vm13, %v5715_v5  ;;  %vm7552_vm13 = vcmp.eq.s32.totalorder %v8057_v1, %v5705_v11 }
 0x2e0   : > { %3348 = vmatpush2.msk.msra.mxu1 %vm7548_vm2, %v5715_v5  ;;  %vm8058_vm2 = vcmask 588800  }
 0x2e1   : > { %3349 = vmatprep.subr.msk.mxu1 %vm7549_vm5, %v5715_v5  ;;  %3515 = vmatpush1.xpose.msk.msra.mxu0 %vm7550_vm8, %v5715_v5  ;;  %vm7553_vm5 = vcmp.eq.s32.totalorder %v8059_v57, %v5707_v0  ;;  %vm7557_vm8 = vcmp.eq.s32.totalorder %v8060_v54, %v5707_v0 }
 0x2e2   : > { %3350 = vmatpush2.msk.msra.mxu1 %vm7552_vm13, %v5715_v5  ;;  %3516 = vmatprep.subr.msk.mxu0 %vm8058_vm2, %v3234_v59  ;;  %vm7555_vm2 = vcmp.eq.s32.totalorder %v8061_v25, %v5707_v0  ;;  %vm7556_vm13 = vcmp.eq.s32.totalorder %v8056_v29, %v5705_v11  ;;  %v3232_v22 = vsel %vm7557_vm8, 1.0, %v8029_v56  ;;  %vm7559_vm8 = vcmp.eq.s32.totalorder %v8063_v27, %v5705_v11  ;;  %v8064_v59 = vld [vmem:[#allocation131_spill] sm:$0xff] }
 0x2e3   : > { %3351 = vmatprep.subr.msk.mxu1 %vm7553_vm5, %v5715_v5  ;;  %vm7558_vm5 = vcmp.eq.s32.totalorder %v8061_v25, %v5705_v11  ;;  %v2265_v25 = vld [vmem:[%s7225_s2 + $0x28] sm:$0xff] }
 0x2e4   : > { %3352 = vmatpush2.msk.msra.mxu1 %vm7554_vm6, %v5715_v5  ;;  %vm8062_vm6 = vcmask 588800  }
 0x2e5   : > { %3353 = vmatprep.subr.msk.mxu1 %vm7555_vm2, %v5715_v5  ;;  %3517 = vmatpush1.xpose.msk.msra.mxu0 %vm7556_vm13, %v5715_v5  ;;  %vm7563_vm2 = vcmp.eq.s32.totalorder %v8063_v27, %v5707_v0  ;;  %vm7564_vm13 = vcmp.eq.s32.totalorder %v8024_v30, %v5707_v0 }
 0x2e6   : > { %3354 = vmatpush2.msk.msra.mxu1 %vm7558_vm5, %v5715_v5  ;;  %3518 = vmatprep.subr.msk.mxu0 %vm8062_vm6, %v3232_v22  ;;  %vm7562_vm6 = vcmp.eq.s32.totalorder %v8064_v59, %v5707_v0  ;;  %vm1940_vm5 = vcmp.eq.s32.totalorder %v8060_v54, %v5705_v11  ;;  %v2260_v22 = vld [vmem:[%s7225_s2] sm:$0xff]  ;;  %v3294_v27 = vsel %vm7564_vm13, 1.0, %v8029_v56  ;;  %vm2002_vm13 = vcmp.eq.s32.totalorder %v8024_v30, %v5705_v11 }
 0x2e7   : > { %3355 = vmatprep.subr.msk.mxu1 %vm7563_vm2, %v5715_v5  ;;  %vm2001_vm2 = vcmp.eq.s32.totalorder %v8021_v3, %v5707_v0 }
 0x2e8   : > { %3356 = vmatpush2.msk.msra.mxu1 %vm7559_vm8, %v5715_v5  ;;  %vm7565_vm8 = vcmp.eq.s32.totalorder %v8064_v59, %v5705_v11  ;;  %v3292_v9 = vsel %vm2001_vm2, 1.0, %v8029_v56 }
 0x2e9   : > { %3357 = vmatprep.subr.msk.mxu1 %vm7562_vm6, %v5715_v5  ;;  %3519 = vmatpush1.xpose.msk.msra.mxu0 %vm1940_vm5, %v5715_v5  ;;  %vm8065_vm6 = vcmask 588800  }
 0x2ea   : > { %3358 = vmatpush2.msk.msra.mxu1 %vm7565_vm8, %v5715_v5  ;;  %3520 = vmatprep.subr.msk.mxu0 %vm8065_vm6, %v3294_v27  ;;  %v2264_v27 = vld [vmem:[%s7225_s2 + $0x20] sm:$0xff]  ;;  %vm8081_vm8 = vcmp.eq.s32.totalorder %v7957_v6, %v5705_v11 }
 0x2eb   : > { %3359 = vmatprep.subr.msk.mxu1 %vm1971_vm15, %v5715_v5  ;;  %2341 = vmatmul.mubr.f32.vlgmr.msra.gmra.mxu1 %v2260_v22  ;;  %vm8066_vm15 = vmmov %vm8065_vm6  ;;  %v2273_v22 = vld [vmem:[%s7225_s2 + $0x68] sm:$0xff] }
 0x2ec   : > { %3360 = vmatpush1.msk.msra.mxu1 %vm1970_vm1, %v5715_v5  ;;  %2346 = vmatprep.mubr.f32.mxu1 %v2265_v25  ;;  %v2269_v25 = vld [vmem:[%s7225_s2 + $0x48] sm:$0xff]  ;;  %vm2000_vm1 = vcmp.eq.s32.totalorder %v8021_v3, %v5705_v11  ;;  %v2262_v3 = vld [vmem:[%s7225_s2 + $0x10] sm:$0xff] }
 0x2ed   : > { %3361 = vmatprep.subr.msk.mxu1 %vm1969_vm0, %v5715_v5  ;;  %3521 = vmatpush2.xpose.msk.msra.mxu0 %vm2002_vm13, %v5715_v5  ;;  %vm1999_vm0 = vcmp.eq.s32.totalorder %v8020_v52, %v5707_v0 }
 0x2ee   : > { %3362 = vmatpush1.msk.msra.mxu1 %vm1968_vm11, %v5715_v5  ;;  %3522 = vmatprep.subr.msk.mxu0 %vm8066_vm15, %v3292_v9  ;;  %v3290_v55 = vsel %vm1999_vm0, 1.0, %v8029_v56  ;;  %vm1997_vm11 = vcmp.eq.s32.totalorder %v8017_v14, %v5707_v0  ;;  %vm8072_vm15 = vcmp.eq.s32.totalorder %v7967_v12, %v5707_v0  ;;  %v2271_v9 = vld [vmem:[%s7225_s2 + $0x58] sm:$0xff] }
 0x2ef   : > { %3363 = vmatprep.subr.msk.mxu1 %vm1967_vm9, %v5715_v5  ;;  %2347 = vmatmul.mubr.f32.gmra.mxu1 %v2264_v27  ;;  %vm8067_vm9 = vmmov %vm8065_vm6  ;;  %v3288_v13 = vsel %vm1997_vm11, 1.0, %v8029_v56  ;;  %v2263_v27 = vld [vmem:[%s7225_s2 + $0x18] sm:$0xff] }
 0x2f0   : > { %3364 = vmatpush1.msk.msra.mxu1 %vm1966_vm14, %v5715_v5  ;;  %2352 = vmatprep.mubr.f32.mxu1 %v2269_v25  ;;  %vm1998_vm14 = vcmp.eq.s32.totalorder %v8020_v52, %v5705_v11  ;;  %v2270_v25 = vld [vmem:[%s7225_s2 + $0x50] sm:$0xff] }
 0x2f1   : > { %3365 = vmatprep.subr.msk.mxu1 %vm1965_vm7, %v5715_v5  ;;  %3523 = vmatpush2.xpose.msk.msra.mxu0 %vm2000_vm1, %v5715_v5  ;;  %vm8070_vm7 = vcmp.eq.s32.totalorder %v7968_v43, %v5707_v0 }
 0x2f2   : > { %3366 = vmatpush1.msk.msra.mxu1 %vm1964_vm12, %v5715_v5  ;;  %3524 = vmatprep.subr.msk.mxu0 %vm8067_vm9, %v3290_v55  ;;  %vm1995_vm12 = vcmp.eq.s32.totalorder %v8015_v33, %v5707_v0  ;;  %vm8073_vm9 = vcmp.eq.s32.totalorder %v7967_v12, %v5705_v11  ;;  %v2274_v55 = vld [vmem:[%s7225_s2 + $0x70] sm:$0xff] }
 0x2f3   : > { %3367 = vmatprep.subr.msk.mxu1 %vm1963_vm10, %v5715_v5  ;;  %2353 = vmatmul.mubr.f32.gmra.mxu1 %v2268_v36  ;;  %vm8068_vm10 = vcmp.eq.s32.totalorder %v7972_v18, %v5705_v11  ;;  %v8095_v18 = vld [vmem:[#allocation159_spill] sm:$0xff]  ;;  %v2275_v36 = vld [vmem:[%s7225_s2 + $0x78] sm:$0xff] }
 0x2f4   : > { %3368 = vmatpush1.msk.msra.mxu1 %vm1962_vm3, %v5715_v5  ;;  %2358 = vmatprep.mubr.f32.mxu1 %v2273_v22  ;;  %vm8071_vm3 = vcmp.eq.s32.totalorder %v7968_v43, %v5705_v11  ;;  %v3286_v43 = vsel %vm1995_vm12, 1.0, %v8029_v56 }
 0x2f5   : > { %3369 = vmatprep.subr.msk.mxu1 %vm1961_vm4, %v5715_v5  ;;  %3525 = vmatpush2.xpose.msk.msra.mxu0 %vm1998_vm14, %v5715_v5  ;;  %vm8069_vm4 = vmmov %vm8065_vm6  ;;  %vm1996_vm6 = vcmp.eq.s32.totalorder %v8017_v14, %v5705_v11 }
 0x2f6   : > { %3370 = vmatpush1.msk.msra.mxu1 %vm8068_vm10, %v5715_v5  ;;  %3526 = vmatprep.subr.msk.mxu0 %vm8069_vm4, %v3288_v13  ;;  %vm8074_vm10 = vmmov %vm8069_vm4  ;;  %vm7566_vm4 = vcmp.eq.s32.totalorder %v8014_v58, %v5707_v0 }
 0x2f7   : > { %3371 = vmatprep.subr.msk.mxu1 %vm8070_vm7, %v5715_v5  ;;  %2359 = vmatmul.mubr.f32.gmra.mxu1 %v2272_v48  ;;  %vm8075_vm7 = vcmp.eq.s32.totalorder %v7963_v61, %v5707_v0  ;;  %v3284_v12 = vsel %vm7566_vm4, 1.0, %v8029_v56  ;;  %vm7567_vm4 = vcmp.eq.s32.totalorder %v8014_v58, %v5705_v11 }
 0x2f8   : > { %3372 = vmatpush1.msk.msra.mxu1 %vm8071_vm3, %v5715_v5  ;;  %2429 = vmatprep.mubr.f32.mxu1 %v2263_v27  ;;  %vm8076_vm3 = vcmp.eq.s32.totalorder %v7963_v61, %v5705_v11 }
 0x2f9   : > { %3373 = vmatprep.subr.msk.mxu1 %vm8072_vm15, %v5715_v5  ;;  %3527 = vmatpush2.xpose.msk.msra.mxu0 %vm1996_vm6, %v5715_v5  ;;  %vm1994_vm15 = vcmp.eq.s32.totalorder %v8015_v33, %v5705_v11  ;;  %v8099_v33 = vld [vmem:[#allocation158_spill] sm:$0xff] }
 0x2fa   : > { %3374 = vmatpush1.msk.msra.mxu1 %vm8073_vm9, %v5715_v5  ;;  %3528 = vmatprep.subr.msk.mxu0 %vm8074_vm10, %v3286_v43  ;;  %vm8077_vm9 = vcmp.eq.s32.totalorder %v7961_v17, %v5707_v0  ;;  %vm8078_vm10 = vcmp.eq.s32.totalorder %v7961_v17, %v5705_v11 }
 0x2fb   : > { %3375 = vmatprep.subr.msk.mxu1 %vm8075_vm7, %v5715_v5  ;;  %vm8079_vm7 = vcmask 588800  }
 0x2fc   : > { %3376 = vmatpush1.msk.msra.mxu1 %vm8076_vm3, %v5715_v5  ;;  %vm7568_vm3 = vcmp.eq.s32.totalorder %v8011_v8, %v5707_v0 }
 0x2fd   : > { %3377 = vmatprep.subr.msk.mxu1 %vm8077_vm9, %v5715_v5  ;;  %3529 = vmatpush2.xpose.msk.msra.mxu0 %vm1994_vm15, %v5715_v5  ;;  %vm8080_vm9 = vcmp.eq.s32.totalorder %v7957_v6, %v5707_v0  ;;  %v3282_v17 = vsel %vm7568_vm3, 1.0, %v8029_v56  ;;  %vm7569_vm3 = vcmp.eq.s32.totalorder %v8011_v8, %v5705_v11 }
 0x2fe   : > { %3378 = vmatpush1.msk.msra.mxu1 %vm8078_vm10, %v5715_v5  ;;  %3530 = vmatprep.subr.msk.mxu0 %vm8079_vm7, %v3284_v12  ;;  %vm8082_vm10 = vcmp.eq.s32.totalorder %v7956_v38, %v5707_v0 }
 0x2ff   : > { %3379 = vmatprep.subr.msk.mxu1 %vm8080_vm9, %v5715_v5  ;;  %vm7570_vm9 = vcmp.eq.s32.totalorder %v8007_v42, %v5707_v0 }
 0x300   : > { %3380 = vmatpush1.msk.msra.mxu1 %vm8081_vm8, %v5715_v5  ;;  %vm8083_vm8 = vcmp.eq.s32.totalorder %v7956_v38, %v5705_v11  ;;  %v3280_v38 = vsel %vm7570_vm9, 1.0, %v8029_v56  ;;  %vm1988_vm9 = vcmp.eq.s32.totalorder %v8007_v42, %v5705_v11 }
 0x301   : > { %3381 = vmatprep.subr.msk.mxu1 %vm8082_vm10, %v5715_v5  ;;  %3531 = vmatpush2.xpose.msk.msra.mxu0 %vm7567_vm4, %v5715_v5  ;;  %vm8084_vm10 = vcmp.eq.s32.totalorder %v7952_v21, %v5707_v0  ;;  %vm8085_vm4 = vcmp.eq.s32.totalorder %v7952_v21, %v5705_v11 }
 0x302   : > { %3382 = vmatpush1.msk.msra.mxu1 %vm8083_vm8, %v5715_v5  ;;  %3532 = vmatprep.subr.msk.mxu0 %vm8079_vm7, %v3282_v17  ;;  %vm8086_vm8 = vcmp.eq.s32.totalorder %v8052_v62, %v5707_v0 }
 0x303   : > { %3383 = vmatprep.subr.msk.mxu1 %vm8084_vm10, %v5715_v5  ;;  %vm1987_vm10 = vcmp.eq.s32.totalorder %v8006_v31, %v5707_v0 }
 0x304   : > { %3384 = vmatpush1.msk.msra.mxu1 %vm8085_vm4, %v5715_v5  ;;  %vm8087_vm4 = vcmp.eq.s32.totalorder %v8052_v62, %v5705_v11  ;;  %v3278_v21 = vsel %vm1987_vm10, 1.0, %v8029_v56 }
 0x305   : > { %3385 = vmatprep.subr.msk.mxu1 %vm8086_vm8, %v5715_v5  ;;  %3533 = vmatpush2.xpose.msk.msra.mxu0 %vm7569_vm3, %v5715_v5  ;;  %vm8088_vm8 = vcmp.eq.s32.totalorder %v8056_v29, %v5707_v0  ;;  %vm8089_vm3 = vcmp.eq.s32.totalorder %v8056_v29, %v5705_v11 }
 0x306   : > { %3386 = vmatpush1.msk.msra.mxu1 %vm8087_vm4, %v5715_v5  ;;  %3534 = vmatprep.subr.msk.mxu0 %vm8079_vm7, %v3280_v38  ;;  %vm8090_vm4 = vcmp.eq.s32.totalorder %v8060_v54, %v5707_v0  ;;  %v2266_v54 = vld [vmem:[%s7225_s2 + $0x30] sm:$0xff] }
 0x307   : > { %3387 = vmatprep.subr.msk.mxu1 %vm8088_vm8, %v5715_v5  ;;  %vm8092_vm8 = vcmp.eq.s32.totalorder %v8024_v30, %v5707_v0  ;;  %v2267_v30 = vld [vmem:[%s7225_s2 + $0x38] sm:$0xff] }
 0x308   : > { %3388 = vmatpush1.msk.msra.mxu1 %vm8089_vm3, %v5715_v5  ;;  %vm8091_vm3 = vmmov %vm8079_vm7  ;;  %vm1985_vm7 = vcmp.eq.s32.totalorder %v8002_v28, %v5707_v0 }
 0x309   : > { %3389 = vmatprep.subr.msk.mxu1 %vm8090_vm4, %v5715_v5  ;;  %3535 = vmatpush2.xpose.msk.msra.mxu0 %vm1988_vm9, %v5715_v5  ;;  %vm1986_vm4 = vcmp.eq.s32.totalorder %v8006_v31, %v5705_v11  ;;  %v3276_v6 = vsel %vm1985_vm7, 1.0, %v8029_v56  ;;  %v8106_v31 = vld [vmem:[#allocation156_spill] sm:$0xff] }
 0x30a   : > { %3390 = vmatpush1.msk.msra.mxu1 %vm1940_vm5, %v5715_v5  ;;  %3536 = vmatprep.subr.msk.mxu0 %vm8091_vm3, %v3278_v21  ;;  %vm1983_vm5 = vcmp.eq.s32.totalorder %v7998_v35, %v5707_v0 }
 0x30b   : > { %3391 = vmatprep.subr.msk.mxu1 %vm8092_vm8, %v5715_v5  ;;  %v3274_v61 = vsel %vm1983_vm5, 1.0, %v8029_v56  ;;  %vm8101_vm8 = vcmp.eq.s32.totalorder %v8011_v8, %v5705_v11 }
 0x30c   : > { %3392 = vmatpush2.msk.msra.mxu1 %vm2002_vm13, %v5715_v5  ;;  %vm8093_vm13 = vmmov %vm8091_vm3 }
 0x30d   : > { %3393 = vmatprep.subr.msk.mxu1 %vm2001_vm2, %v5715_v5  ;;  %3537 = vmatpush2.xpose.msk.msra.mxu0 %vm1986_vm4, %v5715_v5  ;;  %vm1984_vm2 = vcmp.eq.s32.totalorder %v8002_v28, %v5705_v11 }
 0x30e   : > { %3394 = vmatpush2.msk.msra.mxu1 %vm2000_vm1, %v5715_v5  ;;  %3538 = vmatprep.subr.msk.mxu0 %vm8093_vm13, %v3276_v6  ;;  %vm1981_vm1 = vcmp.eq.s32.totalorder %v8095_v18, %v5707_v0  ;;  %vm1980_vm13 = vcmp.eq.s32.totalorder %v8095_v18, %v5705_v11 }
 0x30f   : > { %3395 = vmatprep.subr.msk.mxu1 %vm1999_vm0, %v5715_v5  ;;  %vm8094_vm0 = vmmov %vm8091_vm3  ;;  %v3272_v14 = vsel %vm1981_vm1, 1.0, %v8029_v56  ;;  %vm8100_vm3 = vcmp.eq.s32.totalorder %v8011_v8, %v5707_v0  ;;  %v8104_v8 = vld [vmem:[#allocation157_spill] sm:$0xff] }
 0x310   : > { %3396 = vmatpush2.msk.msra.mxu1 %vm1998_vm14, %v5715_v5  ;;  %vm8096_vm14 = vcmp.eq.s32.totalorder %v8014_v58, %v5707_v0 }
 0x311   : > { %3397 = vmatprep.subr.msk.mxu1 %vm1997_vm11, %v5715_v5  ;;  %3539 = vmatpush2.xpose.msk.msra.mxu0 %vm1984_vm2, %v5715_v5  ;;  %vm1982_vm11 = vcmp.eq.s32.totalorder %v7998_v35, %v5705_v11  ;;  %v8108_v35 = vld [vmem:[#allocation155_spill] sm:$0xff] }
 0x312   : > { %3398 = vmatpush2.msk.msra.mxu1 %vm1996_vm6, %v5715_v5  ;;  %3540 = vmatprep.subr.msk.mxu0 %vm8094_vm0, %v3274_v61  ;;  %vm8098_vm6 = vmmov %vm8094_vm0  ;;  %vm8102_vm0 = vcmp.eq.s32.totalorder %v8007_v42, %v5707_v0 }
 0x313   : > { %3399 = vmatprep.subr.msk.mxu1 %vm1995_vm12, %v5715_v5  ;;  %vm8097_vm12 = vcmp.eq.s32.totalorder %v8014_v58, %v5705_v11 }
 0x314   : > { %3400 = vmatpush2.msk.msra.mxu1 %vm1994_vm15, %v5715_v5  ;;  %vm1979_vm15 = vcmp.eq.s32.totalorder %v8099_v33, %v5707_v0 }
 0x315   : > { %3401 = vmatprep.subr.msk.mxu1 %vm8096_vm14, %v5715_v5  ;;  %3541 = vmatpush2.xpose.msk.msra.mxu0 %vm1982_vm11, %v5715_v5  ;;  %v3270_v58 = vsel %vm1979_vm15, 1.0, %v8029_v56  ;;  %vm8103_vm14 = vmmov %vm8098_vm6 }
 0x316   : > { %3402 = vmatpush2.msk.msra.mxu1 %vm8097_vm12, %v5715_v5  ;;  %3542 = vmatprep.subr.msk.mxu0 %vm8098_vm6, %v3272_v14  ;;  %vm1977_vm12 = vcmp.eq.s32.totalorder %v8104_v8, %v5707_v0  ;;  %vm1978_vm6 = vcmp.eq.s32.totalorder %v8099_v33, %v5705_v11 }
 0x317   : > { %3403 = vmatprep.subr.msk.mxu1 %vm8100_vm3, %v5715_v5  ;;  %v3268_v42 = vsel %vm1977_vm12, 1.0, %v8029_v56 }
 0x318   : > { %3404 = vmatpush2.msk.msra.mxu1 %vm8101_vm8, %v5715_v5  ;;  %vm8112_vm8 = vcmp.eq.s32.totalorder %v4715_v4, %v5705_v11 }
 0x319   : > { %3405 = vmatprep.subr.msk.mxu1 %vm8102_vm0, %v5715_v5  ;;  %3543 = vmatpush2.xpose.msk.msra.mxu0 %vm1980_vm13, %v5715_v5 }
 0x31a   : > { %3406 = vmatpush2.msk.msra.mxu1 %vm1988_vm9, %v5715_v5  ;;  %3544 = vmatprep.subr.msk.mxu0 %vm8103_vm14, %v3270_v58  ;;  %vm8105_vm9 = vmmov %vm8103_vm14  ;;  %vm8115_vm14 = vcmp.eq.s32.totalorder %v4712_v10, %v5705_v11  ;;  %v8209_v58 = vlaneseq }
 0x31b   : > { %3407 = vmatprep.subr.msk.mxu1 %vm1987_vm10, %v5715_v5  ;;  %vm1975_vm10 = vcmp.eq.s32.totalorder %v8106_v31, %v5707_v0 }
 0x31c   : > { %3408 = vmatpush2.msk.msra.mxu1 %vm1986_vm4, %v5715_v5  ;;  %v3266_v28 = vsel %vm1975_vm10, 1.0, %v8029_v56  ;;  %vm8107_vm4 = vmmov %vm8105_vm9 }
 0x31d   : > { %3409 = vmatprep.subr.msk.mxu1 %vm1985_vm7, %v5715_v5  ;;  %3545 = vmatpush2.xpose.msk.msra.mxu0 %vm1978_vm6, %v5715_v5  ;;  %vm1976_vm7 = vcmp.eq.s32.totalorder %v8104_v8, %v5705_v11 }
 0x31e   : > { %3410 = vmatpush2.msk.msra.mxu1 %vm1984_vm2, %v5715_v5  ;;  %3546 = vmatprep.subr.msk.mxu0 %vm8105_vm9, %v3268_v42  ;;  %vm1974_vm2 = vcmp.eq.s32.totalorder %v8106_v31, %v5705_v11  ;;  %vm8118_vm9 = vcmp.eq.s32.totalorder %v4709_v34, %v5705_v11  ;;  %v3639_v31 = vld [vmem:[#allocation2 + $0x10] sm:$0xff] }
 0x31f   : > { %3411 = vmatprep.subr.msk.mxu1 %vm1983_vm5, %v5715_v5  ;;  %vm1973_vm5 = vcmp.eq.s32.totalorder %v8108_v35, %v5707_v0 }
 0x320   : > { %3412 = vmatpush2.msk.msra.mxu1 %vm1982_vm11, %v5715_v5  ;;  %v3264_v52 = vsel %vm1973_vm5, 1.0, %v8029_v56  ;;  %vm1972_vm11 = vcmp.eq.s32.totalorder %v8108_v35, %v5705_v11 }
 0x321   : > { %3413 = vmatprep.subr.msk.mxu1 %vm1981_vm1, %v5715_v5  ;;  %3547 = vmatpush2.xpose.msk.msra.mxu0 %vm1976_vm7, %v5715_v5  ;;  %vm8109_vm1 = vmmov %vm8107_vm4 }
 0x322   : > { %3414 = vmatpush2.msk.msra.mxu1 %vm1980_vm13, %v5715_v5  ;;  %3548 = vmatprep.subr.msk.mxu0 %vm8107_vm4, %v3266_v28  ;;  %vm8111_vm3 = vmmov %vm8109_vm1  ;;  %vm8113_vm13 = vcmp.eq.s32.totalorder %v4712_v10, %v5707_v0  ;;  %vm8121_vm4 = vcmp.eq.s32.totalorder %v4706_v45, %v5705_v11 }
 0x323   : > { %3415 = vmatprep.subr.msk.mxu1 %vm1979_vm15, %v5715_v5  ;;  %vm8110_vm15 = vcmp.eq.s32.totalorder %v4715_v4, %v5707_v0  ;;  %v3196_v29 = vsel %vm8113_vm13, 1.0, %v8029_v56  ;;  %vm8114_vm0 = vmmov %vm8109_vm1  ;;  %vm8129_vm13 = vcmp.eq.s32.totalorder %v4697_v32, %v5707_v0 }
 0x324   : > { %3416 = vmatpush2.msk.msra.mxu1 %vm1978_vm6, %v5715_v5  ;;  %v3198_v62 = vsel %vm8110_vm15, 1.0, %v8029_v56  ;;  %vm8117_vm6 = vmmov %vm8114_vm0  ;;  %vm8126_vm15 = vcmp.eq.s32.totalorder %v4700_v50, %v5707_v0  ;;  %v3186_v22 = vsel %vm8129_vm13, 1.0, %v8029_v56 }
 0x325   : > { %3417 = vmatprep.subr.msk.mxu1 %vm1977_vm12, %v5715_v5  ;;  %3549 = vmatpush2.xpose.msk.msra.mxu0 %vm1974_vm2, %v5715_v5  ;;  %vm8116_vm12 = vcmp.eq.s32.totalorder %v4709_v34, %v5707_v0  ;;  %vm8144_vm13 = vmmov %vm8114_vm0 }
 0x326   : > { %3418 = vmatpush2.msk.msra.mxu1 %vm1976_vm7, %v5715_v5  ;;  %3550 = vmatprep.subr.msk.mxu0 %vm8109_vm1, %v3264_v52  ;;  %v3194_v4 = vsel %vm8116_vm12, 1.0, %v8029_v56  ;;  %vm8120_vm7 = vmmov %vm8114_vm0  ;;  %vm8131_vm12 = vcmp.eq.s32.totalorder %v4694_v47, %v5707_v0  ;;  %v3640_v52 = vld [vmem:[#allocation2] sm:$0xff] }
 0x327   : > { %3419 = vmatprep.subr.msk.mxu1 %vm1975_vm10, %v5715_v5  ;;  %vm8119_vm10 = vcmp.eq.s32.totalorder %v4706_v45, %v5707_v0  ;;  %vm8124_vm1 = vmmov %vm8114_vm0  ;;  %v3188_v45 = vsel %vm8126_vm15, 1.0, %v8029_v56 }
 0x328   : > { %3420 = vmatpush2.msk.msra.mxu1 %vm1974_vm2, %v5715_v5  ;;  %v3192_v10 = vsel %vm8119_vm10, 1.0, %v8029_v56  ;;  %vm8123_vm2 = vmmov %vm8114_vm0  ;;  %vm8134_vm10 = vcmp.eq.s32.totalorder %v4691_v37, %v5707_v0 }
 0x329   : > { %3421 = vmatprep.subr.msk.mxu1 %vm1973_vm5, %v5715_v5  ;;  %3551 = vmatpush2.xpose.msk.msra.mxu0 %vm1972_vm11, %v5715_v5  ;;  %vm8122_vm5 = vcmp.eq.s32.totalorder %v4703_v15, %v5707_v0  ;;  %vm8141_vm15 = vmmov %vm8114_vm0 }
 0x32a   : > { %3422 = vmatpush2.msk.msra.mxu1 %vm1972_vm11, %v5715_v5  ;;  %v3190_v34 = vsel %vm8122_vm5, 1.0, %v8029_v56  ;;  %vm8125_vm11 = vcmp.eq.s32.totalorder %v4703_v15, %v5705_v11  ;;  %v3184_v15 = vsel %vm8131_vm12, 1.0, %v8029_v56  ;;  %vm8137_vm5 = vcmp.eq.s32.totalorder %v8035_v51, %v5707_v0 }
 0x32b   : > { %2430 = vmatmul.mubr.f32.vlgmr.msra.gmra.mxu1 %v2262_v3  ;;  %3423 = vmatprep.subr.msk.mxu1 %vm8111_vm3, %v3198_v62  ;;  %vm8127_vm3 = vmmov %vm8114_vm0 }
 0x32c   : > { %3424 = vmatpush1.xpose.msk.msra.mxu1 %vm8112_vm8, %v5715_v5  ;;  %2435 = vmatprep.mubr.f32.mxu1 %v2267_v30  ;;  %vm8128_vm8 = vcmp.eq.s32.totalorder %v4700_v50, %v5705_v11  ;;  %v3182_v50 = vsel %vm8134_vm10, 1.0, %v8029_v56  ;;  %v8212_v30 = vld [vmem:[#allocation13_spill] sm:$0xff] }
 0x32d   : > { %3425 = vmatprep.subr.msk.mxu1 %vm8114_vm0, %v3196_v29  ;;  %2855 = vmatmul.mubr.f32.vlgmr.msra.gmra.mxu0 %v5715_v5 }
 0x32f   : > { %2436 = vmatmul.mubr.f32.gmra.mxu1 %v2266_v54  ;;  %v8214_v54 = vld [vmem:[#allocation12_spill] sm:$0xff] }
 0x330   : > { %3426 = vmatpush1.xpose.msk.msra.mxu1 %vm8115_vm14, %v5715_v5  ;;  %2441 = vmatprep.mubr.f32.mxu1 %v2271_v9  ;;  %vm8130_vm14 = vcmp.eq.s32.totalorder %v4697_v32, %v5705_v11  ;;  %v3180_v32 = vsel %vm8137_vm5, 1.0, %v8029_v56 }
 0x331   : > { %3427 = vmatprep.subr.msk.mxu1 %vm8117_vm6, %v3194_v4  ;;  %vm8132_vm6 = vmmov %vm8114_vm0 }
 0x333   : > { %2442 = vmatmul.mubr.f32.gmra.mxu1 %v2270_v25 }
 0x334   : > { %3428 = vmatpush1.xpose.msk.msra.mxu1 %vm8118_vm9, %v5715_v5  ;;  %2447 = vmatprep.mubr.f32.mxu1 %v2275_v36  ;;  %vm8133_vm9 = vcmp.eq.s32.totalorder %v4694_v47, %v5705_v11 }
 0x335   : > { %3429 = vmatprep.subr.msk.mxu1 %vm8120_vm7, %v3192_v10  ;;  %vm8135_vm7 = vmmov %vm8114_vm0 }
 0x337   : > { %2448 = vmatmul.mubr.f32.gmra.mxu1 %v2274_v55  ;;  %v3641_v55 = vld [vmem:[#allocation2 + $0x20] sm:$0xff] }
 0x338   : > { %3430 = vmatpush1.xpose.msk.msra.mxu1 %vm8121_vm4, %v5715_v5  ;;  %3487 = vmatprep.mubr.msk.f32.mxu1 %vm8123_vm2, %v5715_v5  ;;  %vm8136_vm4 = vcmp.eq.s32.totalorder %v4691_v37, %v5705_v11  ;;  %vm8138_vm2 = vmmov %vm8114_vm0 }
 0x339   : > { %3431 = vmatprep.subr.msk.mxu1 %vm8124_vm1, %v3190_v34  ;;  %vm8139_vm1 = vcmp.eq.s32.totalorder %v8035_v51, %v5705_v11  ;;  %vm8147_vm12 = vmmov %vm8138_vm2 }
 0x33a   : > { %vm8150_vm10 = vmmov %vm8138_vm2 }
 0x33b   : > { %vm8153_vm5 = vmmov %vm8138_vm2 }
 0x33c   : > { %3432 = vmatpush1.xpose.msk.msra.mxu1 %vm8125_vm11, %v5715_v5  ;;  %vm8140_vm11 = vcmp.eq.s32.totalorder %v8037_v53, %v5707_v0 }
 0x33d   : > { %3433 = vmatprep.subr.msk.mxu1 %vm8127_vm3, %v3188_v45  ;;  %v3178_v47 = vsel %vm8140_vm11, 1.0, %v8029_v56  ;;  %vm8142_vm3 = vcmp.eq.s32.totalorder %v8037_v53, %v5705_v11  ;;  %vm8156_vm11 = vmmov %vm8153_vm5 }
 0x340   : > { %3434 = vmatpush1.xpose.msk.msra.mxu1 %vm8128_vm8, %v5715_v5  ;;  %vm8143_vm8 = vcmp.eq.s32.totalorder %v8038_v23, %v5707_v0 }
 0x341   : > { %3435 = vmatprep.subr.msk.mxu1 %vm8114_vm0, %v3186_v22  ;;  %v3176_v37 = vsel %vm8143_vm8, 1.0, %v8029_v56  ;;  %vm8145_vm0 = vcmp.eq.s32.totalorder %v8038_v23, %v5705_v11  ;;  %vm8159_vm8 = vmmov %vm8153_vm5 }
 0x344   : > { %3436 = vmatpush1.xpose.msk.msra.mxu1 %vm8130_vm14, %v5715_v5  ;;  %vm8146_vm14 = vcmp.eq.s32.totalorder %v8040_v19, %v5707_v0 }
 0x345   : > { %3437 = vmatprep.subr.msk.mxu1 %vm8132_vm6, %v3184_v15  ;;  %v3174_v51 = vsel %vm8146_vm14, 1.0, %v8029_v56  ;;  %vm8148_vm6 = vcmp.eq.s32.totalorder %v8040_v19, %v5705_v11  ;;  %vm8162_vm14 = vmmov %vm8153_vm5 }
 0x348   : > { %3438 = vmatpush1.xpose.msk.msra.mxu1 %vm8133_vm9, %v5715_v5  ;;  %vm8149_vm9 = vcmp.eq.s32.totalorder %v8041_v46, %v5707_v0 }
 0x349   : > { %3439 = vmatprep.subr.msk.mxu1 %vm8135_vm7, %v3182_v50  ;;  %v3172_v53 = vsel %vm8149_vm9, 1.0, %v8029_v56  ;;  %vm8151_vm7 = vcmp.eq.s32.totalorder %v8041_v46, %v5705_v11  ;;  %vm8165_vm9 = vmmov %vm8153_vm5 }
 0x34c   : > { %3440 = vmatpush1.xpose.msk.msra.mxu1 %vm8136_vm4, %v5715_v5  ;;  %vm8152_vm4 = vcmp.eq.s32.totalorder %v8043_v63, %v5707_v0 }
 0x34d   : > { %3441 = vmatprep.subr.msk.mxu1 %vm8138_vm2, %v3180_v32  ;;  %v3170_v23 = vsel %vm8152_vm4, 1.0, %v8029_v56  ;;  %vm8154_vm2 = vcmp.eq.s32.totalorder %v8043_v63, %v5705_v11  ;;  %vm8168_vm4 = vmmov %vm8153_vm5  ;;  %v8216_v32 = vld [vmem:[#allocation11_spill] sm:$0xff] }
 0x350   : > { %3442 = vmatpush1.xpose.msk.msra.mxu1 %vm8139_vm1, %v5715_v5  ;;  %vm8155_vm1 = vcmp.eq.s32.totalorder %v8044_v49, %v5707_v0 }
 0x351   : > { %3443 = vmatprep.subr.msk.mxu1 %vm8141_vm15, %v3178_v47  ;;  %v3168_v19 = vsel %vm8155_vm1, 1.0, %v8029_v56  ;;  %vm8157_vm15 = vcmp.eq.s32.totalorder %v8044_v49, %v5705_v11  ;;  %vm8171_vm1 = vmmov %vm8168_vm4 }
 0x354   : > { %3444 = vmatpush1.xpose.msk.msra.mxu1 %vm8142_vm3, %v5715_v5  ;;  %vm8158_vm3 = vcmp.eq.s32.totalorder %v4763_v40, %v5707_v0 }
 0x355   : > { %3445 = vmatprep.subr.msk.mxu1 %vm8144_vm13, %v3176_v37  ;;  %v3230_v46 = vsel %vm8158_vm3, 1.0, %v8029_v56  ;;  %vm8160_vm13 = vcmp.eq.s32.totalorder %v4763_v40, %v5705_v11  ;;  %vm8174_vm3 = vmmov %vm8171_vm1 }
 0x358   : > { %3446 = vmatpush1.xpose.msk.msra.mxu1 %vm8145_vm0, %v5715_v5  ;;  %vm8161_vm0 = vcmp.eq.s32.totalorder %v4760_v60, %v5707_v0 }
 0x359   : > { %3447 = vmatprep.subr.msk.mxu1 %vm8147_vm12, %v3174_v51  ;;  %v3228_v63 = vsel %vm8161_vm0, 1.0, %v8029_v56  ;;  %vm8163_vm12 = vcmp.eq.s32.totalorder %v4760_v60, %v5705_v11  ;;  %vm8177_vm0 = vmmov %vm8171_vm1 }
 0x35c   : > { %3448 = vmatpush1.xpose.msk.msra.mxu1 %vm8148_vm6, %v5715_v5  ;;  %vm8164_vm6 = vcmp.eq.s32.totalorder %v4757_v44, %v5707_v0 }
 0x35d   : > { %3449 = vmatprep.subr.msk.mxu1 %vm8150_vm10, %v3172_v53  ;;  %v3226_v48 = vsel %vm8164_vm6, 1.0, %v8029_v56  ;;  %vm8166_vm10 = vcmp.eq.s32.totalorder %v4757_v44, %v5705_v11  ;;  %vm8180_vm6 = vmmov %vm8177_vm0 }
 0x360   : > { %3450 = vmatpush1.xpose.msk.msra.mxu1 %vm8151_vm7, %v5715_v5  ;;  %vm8167_vm7 = vcmp.eq.s32.totalorder %v4754_v26, %v5707_v0 }
 0x361   : > { %3451 = vmatprep.subr.msk.mxu1 %vm8153_vm5, %v3170_v23  ;;  %v3224_v40 = vsel %vm8167_vm7, 1.0, %v8029_v56  ;;  %vm8169_vm5 = vcmp.eq.s32.totalorder %v4754_v26, %v5705_v11  ;;  %vm8183_vm7 = vmmov %vm8177_vm0 }
 0x364   : > { %3452 = vmatpush1.xpose.msk.msra.mxu1 %vm8154_vm2, %v5715_v5  ;;  %vm8170_vm2 = vcmp.eq.s32.totalorder %v4751_v16, %v5707_v0 }
 0x365   : > { %3453 = vmatprep.subr.msk.mxu1 %vm8156_vm11, %v3168_v19  ;;  %v3222_v60 = vsel %vm8170_vm2, 1.0, %v8029_v56  ;;  %vm8172_vm11 = vcmp.eq.s32.totalorder %v4751_v16, %v5705_v11  ;;  %vm8186_vm2 = vmmov %vm8177_vm0 }
 0x368   : > { %3454 = vmatpush1.xpose.msk.msra.mxu1 %vm8157_vm15, %v5715_v5  ;;  %vm8173_vm15 = vcmp.eq.s32.totalorder %v4748_v39, %v5707_v0 }
 0x369   : > { %3455 = vmatprep.subr.msk.mxu1 %vm8159_vm8, %v3230_v46  ;;  %v3220_v44 = vsel %vm8173_vm15, 1.0, %v8029_v56  ;;  %vm8175_vm8 = vcmp.eq.s32.totalorder %v4748_v39, %v5705_v11  ;;  %vm8189_vm15 = vmmov %vm8177_vm0  ;;  %v3642_v46 = vld [vmem:[#allocation2 + $0x30] sm:$0xff] }
 0x36c   : > { %3456 = vmatpush2.xpose.msk.msra.mxu1 %vm8160_vm13, %v5715_v5  ;;  %vm8176_vm13 = vcmp.eq.s32.totalorder %v4745_v41, %v5707_v0 }
 0x36d   : > { %3457 = vmatprep.subr.msk.mxu1 %vm8162_vm14, %v3228_v63  ;;  %v3218_v26 = vsel %vm8176_vm13, 1.0, %v8029_v56  ;;  %vm8178_vm14 = vcmp.eq.s32.totalorder %v4745_v41, %v5705_v11  ;;  %vm8192_vm13 = vmmov %vm8177_vm0 }
 0x370   : > { %3458 = vmatpush2.xpose.msk.msra.mxu1 %vm8163_vm12, %v5715_v5  ;;  %vm8179_vm12 = vcmp.eq.s32.totalorder %v8049_v24, %v5707_v0 }
 0x371   : > { %3459 = vmatprep.subr.msk.mxu1 %vm8165_vm9, %v3226_v48  ;;  %v3216_v16 = vsel %vm8179_vm12, 1.0, %v8029_v56  ;;  %vm8181_vm9 = vcmp.eq.s32.totalorder %v8049_v24, %v5705_v11  ;;  %vm8195_vm12 = vmmov %vm8186_vm2 }
 0x374   : > { %3460 = vmatpush2.xpose.msk.msra.mxu1 %vm8166_vm10, %v5715_v5  ;;  %vm8182_vm10 = vcmp.eq.s32.totalorder %v8051_v7, %v5707_v0 }
 0x375   : > { %3461 = vmatprep.subr.msk.mxu1 %vm8168_vm4, %v3224_v40  ;;  %v3214_v39 = vsel %vm8182_vm10, 1.0, %v8029_v56  ;;  %vm8184_vm4 = vcmp.eq.s32.totalorder %v8051_v7, %v5705_v11  ;;  %vm8199_vm10 = vmmov %vm8186_vm2 }
 0x378   : > { %3462 = vmatpush2.xpose.msk.msra.mxu1 %vm8169_vm5, %v5715_v5  ;;  %vm8185_vm5 = vcmp.eq.s32.totalorder %v8053_v2, %v5707_v0 }
 0x379   : > { %3463 = vmatprep.subr.msk.mxu1 %vm8171_vm1, %v3222_v60  ;;  %v3212_v41 = vsel %vm8185_vm5, 1.0, %v8029_v56  ;;  %vm8187_vm1 = vcmp.eq.s32.totalorder %v8053_v2, %v5705_v11  ;;  %vm8203_vm5 = vmmov %vm8186_vm2 }
 0x37c   : > { %3464 = vmatpush2.xpose.msk.msra.mxu1 %vm8172_vm11, %v5715_v5  ;;  %vm8188_vm11 = vcmp.eq.s32.totalorder %v8055_v20, %v5707_v0 }
 0x37d   : > { %3465 = vmatprep.subr.msk.mxu1 %vm8174_vm3, %v3220_v44  ;;  %v3210_v24 = vsel %vm8188_vm11, 1.0, %v8029_v56  ;;  %vm8190_vm3 = vcmp.eq.s32.totalorder %v8055_v20, %v5705_v11  ;;  %v8197_v20 = vld [vmem:[#allocation133_spill] sm:$0xff]  ;;  %vm8206_vm11 = vmmov %vm8203_vm5 }
 0x380   : > { %3466 = vmatpush2.xpose.msk.msra.mxu1 %vm8175_vm8, %v5715_v5  ;;  %vm8191_vm8 = vcmp.eq.s32.totalorder %v8057_v1, %v5707_v0 }
 0x381   : > { %3467 = vmatprep.subr.msk.mxu1 %vm8177_vm0, %v3218_v26  ;;  %v3208_v7 = vsel %vm8191_vm8, 1.0, %v8029_v56  ;;  %vm8193_vm0 = vcmp.eq.s32.totalorder %v8057_v1, %v5705_v11  ;;  %v8201_v1 = vld [vmem:[#allocation132_spill] sm:$0xff]  ;;  %vm7091_vm8 = vcmp.lt.s32.totalorder %v8209_v58, 512 }
 0x382   : > { %283 = vst.msk [vmem:[%s7096_s7] sm:$0xf] %vm7091_vm8, %v8029_v56 }
 0x384   : > { %3468 = vmatpush2.xpose.msk.msra.mxu1 %vm8178_vm14, %v5715_v5  ;;  %vm8194_vm14 = vcmp.eq.s32.totalorder %v8059_v57, %v5707_v0 }
 0x385   : > { %3469 = vmatprep.subr.msk.mxu1 %vm8180_vm6, %v3216_v16  ;;  %v3206_v2 = vsel %vm8194_vm14, 1.0, %v8029_v56  ;;  %vm8196_vm6 = vcmp.eq.s32.totalorder %v8059_v57, %v5705_v11  ;;  %v8221_v16 = vld [vmem:[#allocation10_spill] sm:$0xff] }
 0x388   : > { %3470 = vmatpush2.xpose.msk.msra.mxu1 %vm8181_vm9, %v5715_v5  ;;  %vm8198_vm9 = vcmp.eq.s32.totalorder %v8197_v20, %v5707_v0 }
 0x389   : > { %3471 = vmatprep.subr.msk.mxu1 %vm8183_vm7, %v3214_v39  ;;  %v3204_v13 = vsel %vm8198_vm9, 1.0, %v8029_v56  ;;  %vm8200_vm7 = vcmp.eq.s32.totalorder %v8197_v20, %v5705_v11 }
 0x38c   : > { %3472 = vmatpush2.xpose.msk.msra.mxu1 %vm8184_vm4, %v5715_v5  ;;  %vm8202_vm4 = vcmp.eq.s32.totalorder %v8201_v1, %v5707_v0 }
 0x38d   : > { %3473 = vmatprep.subr.msk.mxu1 %vm8186_vm2, %v3212_v41  ;;  %v3202_v27 = vsel %vm8202_vm4, 1.0, %v8029_v56  ;;  %vm8204_vm2 = vcmp.eq.s32.totalorder %v8201_v1, %v5705_v11 }
 0x390   : > { %3474 = vmatpush2.xpose.msk.msra.mxu1 %vm8187_vm1, %v5715_v5  ;;  %vm8205_vm1 = vcmp.eq.s32.totalorder %v8064_v59, %v5707_v0 }
 0x391   : > { %3475 = vmatprep.subr.msk.mxu1 %vm8189_vm15, %v3210_v24  ;;  %v3200_v57 = vsel %vm8205_vm1, 1.0, %v8029_v56  ;;  %vm8207_vm15 = vcmp.eq.s32.totalorder %v8064_v59, %v5705_v11 }
 0x394   : > { %3476 = vmatpush2.xpose.msk.msra.mxu1 %vm8190_vm3, %v5715_v5  ;;  %vm8208_vm3 = vmmov %vm8203_vm5 }
 0x395   : > { %3477 = vmatprep.subr.msk.mxu1 %vm8192_vm13, %v3208_v7  ;;  %vm8213_vm13 = vmmov %vm8208_vm3 }
 0x398   : > { %3478 = vmatpush2.xpose.msk.msra.mxu1 %vm8193_vm0, %v5715_v5  ;;  %vm8215_vm0 = vmmov %vm8208_vm3 }
 0x399   : > { %3479 = vmatprep.subr.msk.mxu1 %vm8195_vm12, %v3206_v2  ;;  %vm8217_vm14 = vmmov %vm8215_vm0 }
 0x39a   : > { %vm8218_vm12 = vmmov %vm8215_vm0 }
 0x39b   : > { %vm8220_vm9 = vmmov %vm8215_vm0 }
 0x39c   : > { %3480 = vmatpush2.xpose.msk.msra.mxu1 %vm8196_vm6, %v5715_v5  ;;  %vm8219_vm6 = vmmov %vm8215_vm0 }
 0x39d   : > { %3481 = vmatprep.subr.msk.mxu1 %vm8199_vm10, %v3204_v13 }
 0x3a0   : > { %3482 = vmatpush2.xpose.msk.msra.mxu1 %vm8200_vm7, %v5715_v5 }
 0x3a1   : > { %3483 = vmatprep.subr.msk.mxu1 %vm8203_vm5, %v3202_v27 }
 0x3a4   : > { %3484 = vmatpush2.xpose.msk.msra.mxu1 %vm8204_vm2, %v5715_v5 }
 0x3a5   : > { %3485 = vmatprep.subr.msk.mxu1 %vm8206_vm11, %v3200_v57 }
 0x3a8   : > { %3486 = vmatpush2.xpose.msk.msra.mxu1 %vm8207_vm15, %v5715_v5 }
 0x3ab   : > { %2784 = vmatmul.mubr.f32.vlgmr.msra.gmra.mxu1 %v5715_v5  ;;  %v2342_v43 = vpop.f32.mrf.mxu1 }
 0x3ad   : > { %v2344_v12 = vpop.f32.mrf.mxu1 }
 0x3af   : > { %v2348_v17 = vpop.f32.mrf.mxu1 }
 0x3b1   : > { %v2350_v38 = vpop.f32.mrf.mxu1 }
 0x3b3   : > { %v2354_v21 = vpop.f32.mrf.mxu1 }
 0x3b5   : > { %v2356_v6 = vpop.f32.mrf.mxu1 }
 0x3b7   : > { %v2360_v61 = vpop.f32.mrf.mxu1 }
 0x3b9   : > { %v2362_v0 = vpop.f32.mrf.mxu1 }
 0x3eb   : > { %v2431_v18 = vpop.f32.mrf.mxu1 }
 0x3ec   : > { %v2432_v14 = vadd.f32 %v2431_v18, %v2342_v43 }
 0x3ed   : > { %v2433_v33 = vpop.f32.mrf.mxu1 }
 0x3ee   : > { %2454 = vst [vmem:[%s7084_s27] sm:$0xff] %v2432_v14  ;;  %v2434_v11 = vadd.f32 %v2433_v33, %v2344_v12  ;;  %v2462_v3 = vsub.f32 %v3640_v52, %v2432_v14 }
 0x3ef   : > { %v2437_v5 = vpop.f32.mrf.mxu1 }
 0x3f0   : > { %2455 = vst.msk [vmem:[%s7084_s27 + $0x8] sm:$0xff] %vm8208_vm3, %v2434_v11  ;;  %v2438_v59 = vadd.f32 %v2437_v5, %v2348_v17  ;;  %v2463_v62 = vsub.f32 %v8212_v30, %v2434_v11  ;;  %v2470_v56 = vmul.f32 %v2462_v3, %v2462_v3 }
 0x3f1   : > { %v2439_v42 = vpop.f32.mrf.mxu1 }
 0x3f2   : > { %2456 = vst [vmem:[%s7084_s27 + $0x10] sm:$0xff] %v2438_v59  ;;  %v2464_v28 = vsub.f32 %v3639_v31, %v2438_v59  ;;  %v2440_v35 = vadd.f32 %v2439_v42, %v2350_v38  ;;  %v2471_v22 = vmul.f32 %v2463_v62, %v2463_v62 }
 0x3f3   : > { %v2443_v29 = vpop.f32.mrf.mxu1 }
 0x3f4   : > { %2457 = vst.msk [vmem:[%s7084_s27 + $0x18] sm:$0xff] %vm8213_vm13, %v2440_v35  ;;  %v2465_v9 = vsub.f32 %v8214_v54, %v2440_v35  ;;  %v2444_v4 = vadd.f32 %v2443_v29, %v2354_v21  ;;  %v2472_v25 = vmul.f32 %v2464_v28, %v2464_v28  ;;  %v2487_v40 = vsel %vm8218_vm12, %v2471_v22, 0.0 }
 0x3f5   : > { %v2445_v36 = vpop.f32.mrf.mxu1 }
 0x3f6   : > { %v2473_v10 = vmul.f32 %v2465_v9, %v2465_v9  ;;  %2458 = vst [vmem:[%s7084_s27 + $0x20] sm:$0xff] %v2444_v4  ;;  %v2466_v34 = vsub.f32 %v3641_v55, %v2444_v4  ;;  %v2446_v45 = vadd.f32 %v2445_v36, %v2356_v6  ;;  %v2478_v51 = vadd.f32 %v2472_v25, %v2470_v56 }
 0x3f7   : > { %v2449_v15 = vpop.f32.mrf.mxu1 }
 0x3f8   : > { %v2474_v50 = vmul.f32 %v2466_v34, %v2466_v34  ;;  %2459 = vst.msk [vmem:[%s7084_s27 + $0x28] sm:$0xff] %vm8215_vm0, %v2446_v45  ;;  %v2467_v47 = vsub.f32 %v8216_v32, %v2446_v45  ;;  %v2450_v37 = vadd.f32 %v2449_v15, %v2360_v61  ;;  %v2488_v23 = vsel %vm8217_vm14, %v2473_v10, 0.0 }
 0x3f9   : > { %v2451_v53 = vpop.f32.mrf.mxu1  ;;  %v2489_v41 = vadd.f32 %v2488_v23, %v2487_v40 }
 0x3fa   : > { %v2475_v19 = vmul.f32 %v2467_v47, %v2467_v47  ;;  %2460 = vst [vmem:[%s7084_s27 + $0x30] sm:$0xff] %v2450_v37  ;;  %v2468_v63 = vsub.f32 %v3642_v46, %v2450_v37  ;;  %v2452_v48 = vadd.f32 %v2451_v53, %v2362_v0  ;;  %v2479_v60 = vadd.f32 %v2478_v51, %v2474_v50 }
 0x3fc   : > { %v2490_v44 = vsel %vm8219_vm6, %v2475_v19, 0.0  ;;  %v2476_v26 = vmul.f32 %v2468_v63, %v2468_v63  ;;  %2461 = vst.msk [vmem:[%s7084_s27 + $0x38] sm:$0xff] %vm8220_vm9, %v2452_v48  ;;  %v2469_v39 = vsub.f32 %v8221_v16, %v2452_v48 }
 0x3fe   : > { %v2480_v24 = vadd.f32 %v2479_v60, %v2476_v26  ;;  %v2477_v7 = vmul.f32 %v2469_v39, %v2469_v39 }
 0x3ff   : > { %3656 = shalt.err (!%p3653_p5)
}
 0x400   : > { %s3657_s27 = scalar_lea.hbm %s7117_s11, 1024  ;;  %s3661_s10 = scalar_lea.hbm %s7226_s3, 2048 }
 0x401   : > { %p3658_p6 = scmp.ne.s32.totalorder %s7117_s11, %s3657_s27  ;;  %p3662_p10 = scmp.lt.s32.totalorder %s7117_s11, %s7226_s3 }
 0x402   : > { %p3663_p11 = scmp.lt.s32.totalorder %s3661_s10, %s3657_s27 }
 0x403   : > { %p3659_p7 = pnand %p3658_p6, %p3857_p4 }
 0x404   : > { %p3664_p12 = por %p3663_p11, %p3662_p10 }
 0x405   : > { %p3660_p9 = pneg %p3659_p7 }
 0x407   : > { %p3665_p13 = pnand %p3664_p12, %p3660_p9 }
 0x409   : > { %3668 = shalt.err (!%p3665_p13)
}
 0x40a   : > { %s3780_s14 = smov 256   ;;  %s3781_s17 = smov 16   ;;  %v2491_v2 = vadd.f32 %v2490_v44, %v2489_v41  ;;  %v2481_v20 = vrot.slane %v2480_v24, 4  ;;  %vm8222_vm10 = vmmov %vm8215_vm0  ;;  %v3782_v17 = vmov 1966171168   ;;  %vm2520_vm7 = vcmp.lt.s32.totalorder %v8209_v58, 200 }
 0x40b   : > { %3568 = dma.vmem_to_hbm [thread:$0]  (%p3857_p4), %s7124_s12, 1024, %s7117_s11, %s2895_s13, %s3780_s14, %s3780_s14, %s3781_s17   ;;  %v2492_v13 = vsel %vm8222_vm10, %v2477_v7, 0.0  ;;  %v2504_v38 = vunpack.c.l.s4 %v3782_v17 }
 0x40c   : > { %v2493_v1 = vadd.f32 %v2492_v13, %v2491_v2  ;;  %v2482_v27 = vadd.f32 %v2481_v20, %v2480_v24  ;;  %s3099_s25 = sshll.u32 %s7081_s16, 1  ;;  %s7154_s11 = sand.u32 1, %s3093_s24  }
 0x40d   : > { %v2505_v18 = vunpack.c.0.s8 %v2504_v38  ;;  %s3566_s12 = sshll.u32 %s3767_s21, 5  ;;  %s255_s13 = scalar_lea.vmem [#allocation5], %s3099_s25 }
 0x40e   : > { %v2494_v57 = vrot.slane %v2493_v1, 4  ;;  %v2483_v43 = vrot.slane %v2482_v27, 2  ;;  %s2939_s29 = sshll.u32 %s255_s13, 4  ;;  %s2937_s16 = scalar_lea.hbm %s7227_s4, %s3566_s12  ;;  %s2940_s29 = int_to_ptr.vmem [resolvable:$true] %s2939_s29 }
 0x40f   : > { %v2508_v5 = vsub.s32 %v2505_v18, %v8044_v49  ;;  %s2900_s9 = scalar_lea.sflag [#allocation6], %s7154_s11  ;;  %s3669_s10 = scalar_lea.vmem %s2940_s29, 32 }
 0x410   : > { %v2495_v12 = vadd.f32 %v2494_v57, %v2493_v1  ;;  %v2484_v21 = vadd.f32 %v2483_v43, %v2482_v27  ;;  %p3670_p0 = scmp.ne.s32.totalorder %s2940_s29, %s3669_s10  ;;  %s3783_s24 = smov [#allocation5]  }
 0x411   : > { %s3673_s15 = sshll.u32 %s3783_s24, 4  ;;  %s3674_s15 = int_to_ptr.vmem [resolvable:$false] %s3673_s15 }
 0x412   : > { %v2496_v6 = vrot.slane %v2495_v12, 2  ;;  %v2485_v61 = vrot.slane %v2484_v21, 1  ;;  %p3671_p1 = pnand %p3670_p0, %p3857_p4  ;;  %s3675_s14 = scalar_lea.vmem %s3674_s15, 64 }
 0x413   : > { %p3676_p3 = scmp.lt.s32.totalorder %s2940_s29, %s3674_s15  ;;  %p3677_p5 = scmp.lt.s32.totalorder %s3675_s14, %s3669_s10 }
 0x414   : > { %v2497_v0 = vadd.f32 %v2496_v6, %v2495_v12  ;;  %v2486_v33 = vadd.f32 %v2485_v61, %v2484_v21  ;;  %p3672_p2 = pneg %p3671_p1 }
 0x415   : > { %p3678_p6 = por %p3677_p5, %p3676_p3 }
 0x416   : > { %v2498_v14 = vrot.slane %v2497_v0, 1 }
 0x417   : > { %p3679_p7 = pnand %p3678_p6, %p3672_p2 }
 0x418   : > { %v2499_v11 = vadd.f32 %v2498_v14, %v2497_v0 }
 0x41a   : > { %v2502_v59 = vcombine.low %v2486_v33, %v2499_v11 }
 0x41c   : > { %v2509_v42 = vrot.slane %v2502_v59, %v2508_v5 }
 0x41e   : > { %v2516_v31 = vrot.slane %v2509_v42, %v2508_v5 }
 0x420   : > { %2522 = vst.msk [vmem:[%s255_s13] sm:$0x3] %vm2520_vm7, %v2516_v31 }
 0x421   : > { %3682 = shalt.err (!%p3679_p7)
}
 0x422   : > { %s3683_s17 = scalar_lea.hbm %s2937_s16, 32  ;;  %s3687_s13 = scalar_lea.hbm %s7227_s4, 64 }
 0x423   : > { %p3684_p9 = scmp.ne.s32.totalorder %s2937_s16, %s3683_s17  ;;  %p3688_p12 = scmp.lt.s32.totalorder %s2937_s16, %s7227_s4 }
 0x424   : > { %p3689_p13 = scmp.lt.s32.totalorder %s3687_s13, %s3683_s17 }
 0x425   : > { %p3685_p10 = pnand %p3684_p9, %p3857_p4 }
 0x426   : > { %p3690_p0 = por %p3689_p13, %p3688_p12 }
 0x427   : > { %p3686_p11 = pneg %p3685_p10 }
 0x429   : > { %p3691_p1 = pnand %p3690_p0, %p3686_p11 }
 0x42b   : > { %3694 = shalt.err (!%p3691_p1)
}
 0x42c   : > { %3569 = dma.vmem_to_hbm [thread:$0]  (%p3857_p4), %s2940_s29, 32, %s2937_s16, %s2900_s9   ;;  %v2856_v49 = vpop.f32.mrf.mxu0  ;;  %v2523_v54 = vld [vmem:[%s7096_s7] sm:$0xf] }
 0x42d   : > { %s3567_s10 = sshll.u32 %s3767_s21, 6  ;;  %s2953_s24 = sshll.u32 %s7096_s7, 4  ;;  %s2954_s24 = int_to_ptr.vmem [resolvable:$true] %s2953_s24 }
 0x42e   : > { %v2858_v58 = vpop.f32.mrf.mxu0  ;;  %s2951_s29 = scalar_lea.hbm %s7228_s5, %s3567_s10  ;;  %s3695_s16 = scalar_lea.vmem %s2954_s24, 64 }
 0x42f   : > { %v2866_v35 = vcombine.low %v2856_v49, %v2858_v58  ;;  %p3696_p2 = scmp.ne.s32.totalorder %s2954_s24, %s3695_s16  ;;  %s3784_s17 = smov [#allocation7]  }
 0x430   : > { %s3699_s25 = sshll.u32 %s3784_s17, 4  ;;  %s3700_s25 = int_to_ptr.vmem [resolvable:$false] %s3699_s25 }
 0x431   : > { %v2880_v62 = vrot.slane %v2866_v35, %v2508_v5  ;;  %p3697_p3 = pnand %p3696_p2, %p3857_p4  ;;  %s3701_s21 = scalar_lea.vmem %s3700_s25, 128 }
 0x432   : > { %p3702_p6 = scmp.lt.s32.totalorder %s2954_s24, %s3700_s25  ;;  %p3703_p7 = scmp.lt.s32.totalorder %s3701_s21, %s3695_s16 }
 0x433   : > { %p3698_p5 = pneg %p3697_p3 }
 0x434   : > { %p3704_p9 = por %p3703_p7, %p3702_p6 }
 0x436   : > { %p3705_p10 = pnand %p3704_p9, %p3698_p5 }
 0x46b   : > { %v2785_v28 = vpop.f32.mrf.mxu1 }
 0x46d   : > { %v2787_v52 = vpop.f32.mrf.mxu1 }
 0x46e   : > { %v2865_v3 = vcombine.low %v2785_v28, %v2787_v52 }
 0x470   : > { %v2873_v30 = vrot.slane %v2865_v3, %v2508_v5 }
 0x472   : > { %v2881_v29 = vcombine.low %v2873_v30, %v2880_v62 }
 0x474   : > { %v2888_v9 = vrot.slane %v2881_v29, %v2508_v5 }
 0x476   : > { %v2890_v4 = vadd.f32 %v2888_v9, %v2523_v54 }
 0x478   : > { %2893 = vst.msk [vmem:[%s7096_s7] sm:$0xf] %vm7091_vm8, %v2890_v4 }
 0x479   : > { %3708 = shalt.err (!%p3705_p10)
}
 0x47a   : > { %s3709_s12 = scalar_lea.hbm %s2951_s29, 64  ;;  %s3713_s27 = scalar_lea.hbm %s7228_s5, 128 }
 0x47b   : > { %p3710_p11 = scmp.ne.s32.totalorder %s2951_s29, %s3709_s12  ;;  %p3714_p0 = scmp.lt.s32.totalorder %s2951_s29, %s7228_s5 }
 0x47c   : > { %p3715_p1 = scmp.lt.s32.totalorder %s3713_s27, %s3709_s12 }
 0x47d   : > { %p3711_p12 = pnand %p3710_p11, %p3857_p4 }
 0x47e   : > { %p3716_p2 = por %p3715_p1, %p3714_p0 }
 0x47f   : > { %p3712_p13 = pneg %p3711_p12 }
 0x481   : > { %p3717_p3 = pnand %p3716_p2, %p3712_p13 }
 0x483   : > { %3720 = shalt.err (!%p3717_p3)
}
 0x484   : > { %3570 = dma.vmem_to_hbm [thread:$0]  (%p3857_p4), %s2954_s24, 64, %s2951_s29, %s2900_s9  }
 0x485 PF: > { %p3584_p5 = scmp.ge.s32.totalorder %s3775_s23, 2  ;;  %s2965_s15 = sand.u32 1, %s3755_s18  }
 0x486   : > { %s2966_s14 = scalar_lea.sflag [#allocation4], %s2965_s15 }
 0x487   : > { %p3575_p6 = pnand %p3584_p5, %p3866_p8 }
 0x489   : > { %p3576_p7 = pneg %p3575_p6 }
 0x48b   : > { %3746 = dma.done.wait (%p3576_p7), %s2966_s14, 1024  }
 0x48c   : > { %3748 = vsyncadd (%p3576_p7), %s2966_s14, 4294966272  ;;  %s8223_s16 = sadd.s32 4294967294, %s3775_s23  }
 0x48d   : > { %s2974_s17 = sand.u32 1, %s8223_s16  }
 0x48e   : > { %s2975_s25 = scalar_lea.sflag [#allocation6], %s2974_s17 }
 0x48f   : > { %3750 = dma.done.wait (%p3576_p7), %s2975_s25, 96  }
 0x490   : > { %3752 = vsyncadd (%p3576_p7), %s2975_s25, 4294967200  ;;  %s22_s23 = sadd.s32 1, %s3775_s23   ;;  %s8224_s18 = smov %s3759_s19 }
 0x491   : > { %p19_p4 = scmp.ge.s32.totalorder %s22_s23, 4   ;;  %s8225_s19 = smov %s3763_s20 }
 0x492   : > { %s8226_s20 = smov %s3872_s6  ;;  %s8227_s21 = smov %s3771_s22 }
 0x493   : > { %s8228_s22 = smov %s8230_s26  ;;  %21 = sbr.rel (!%p19_p4) target bundleno = 6 (0x6), region = 103 }
 0x498   :  { %2989 = vsyncpa [#allocation4], 1 }
 0x499   :  { %2991 = vsyncpa [#allocation4 + $0x1], 1 }
 0x49a   :  { %2992 = vsyncpa [#allocation6], 1 }
 0x49b   :  { %2994 = vsyncpa [#allocation6 + $0x1], 1 }

</bundles_post_ra>
